<compile_context>
chip_gen: v5e
topology: v5e:2x2
jax: 0.10.0
libtpu: 0.0.40
codegen_flags: <defaults>
</compile_context>

<pallas_src>
import functools

import jax
import jax.numpy as jnp
from jax.experimental import pallas as pl
from jax.experimental.pallas import tpu as pltpu


def _round_up(a: int, b: int) -> int:
    return -(-a // b) * b


def _convlstm_kernel(comb_ref, w_ref, c_ref, h_ref, c_out_ref, *,
                     K, WROW, TM, Hd, CHUNK):
    """One row tile of the fused ConvLSTM cell.

    comb_ref  : (TM + SH, Cf) bf16  kx-fused, zero-padded rows of concat([x, h])
                                    plus a ones column; SH = (K-1)*WROW halo
    w_ref     : (K, Cf, 4*Hd) bf16  per-ky weight slab (kx folded into Cf,
                                    bias folded into the ky=0 slab)
    c_ref     : (TM, Hd) f32        previous cell state (row-flattened)
    h_ref     : (TM, Hd) x.dtype    h_next
    c_out_ref : (TM, Hd) f32        c_next (kept f32: recurrent state is never
                                    re-quantized)
    """
    n_chunks = TM // CHUNK

    def chunk_body(ci, carry):
        off = pl.multiple_of(ci * CHUNK, CHUNK)

        # ---- convolution for this row chunk: K row-shifted MXU matmuls with
        #      the f32 accumulator kept in registers.  Shifts ky*WROW are
        #      multiples of 16 -> bf16 sublane-tile-aligned slices. ----
        acc = jnp.dot(comb_ref[pl.ds(off, CHUNK), :], w_ref[0],
                      preferred_element_type=jnp.float32)
        for ky in range(1, K):
            acc = acc + jnp.dot(
                comb_ref[pl.ds(off + ky * WROW, CHUNK), :], w_ref[ky],
                preferred_element_type=jnp.float32)

        # ---- gates + LSTM state update (f32; torch gate order i, f, o, g).
        #      Single sigmoid over [i|f|o], single tanh over g. ----
        ifo = jax.nn.sigmoid(acc[:, : 3 * Hd])
        g = jnp.tanh(acc[:, 3 * Hd:])
        i_g = ifo[:, 0 * Hd:1 * Hd]
        f_g = ifo[:, 1 * Hd:2 * Hd]
        o_g = ifo[:, 2 * Hd:3 * Hd]

        c_prev = c_ref[pl.ds(off, CHUNK), :]
        c_next = f_g * c_prev + i_g * g
        h_next = o_g * jnp.tanh(c_next)

        c_out_ref[pl.ds(off, CHUNK), :] = c_next
        h_ref[pl.ds(off, CHUNK), :] = h_next.astype(h_ref.dtype)
        return carry

    jax.lax.fori_loop(0, n_chunks, chunk_body, 0, unroll=True)


def conv_lstm_cell(x, h, c, weight, bias, kernel_size, *,
                   row_chunk=128, rows_per_tile_target=512):
    """ConvLSTMCell.forward(x, h, c) -> (h_next, c_next).

    x      : (B, H, W, Cin_x)             NHWC
    h, c   : (B, H, W, Hd)                NHWC
    weight : (K, K, Cin_x + Hd, 4 * Hd)   HWIO
    bias   : (4 * Hd,)
    """
    B, H, W, _ = x.shape
    Hd = c.shape[-1]
    K = int(kernel_size)
    if K % 2 != 1:
        raise ValueError("kernel_size must be odd to match PyTorch 'same' padding")
    p = K // 2
    Hp = H + 2 * p
    Wp = W + 2 * p
    # Align padded row width so ky*Wp shifts are bf16 sublane-tile (16) aligned.
    Wp_a = _round_up(Wp, 16)
    Cin = x.shape[-1] + Hd
    Cf = K * Cin + 1                      # kx-fused channels + ones column (bias)

    # ---- row tiling: target ~512 rows/tile, even tile count (v7x: 2 TCs),
    #      tile size a multiple of the epilogue row chunk ----
    M = B * Hp * Wp_a
    n_tiles = max(2, -(-M // rows_per_tile_target))
    if n_tiles % 2:
        n_tiles += 1
    TM = _round_up(-(-M // n_tiles), row_chunk)
    Mt = TM * n_tiles
    SH = (K - 1) * Wp_a                   # row halo covering all ky tap shifts

    # ---- wrapper glue (plain XLA): concat, pad, flatten, kx-fuse, tile ----
    comb = jnp.concatenate([x, h], axis=-1)                        # (B, H, W, Cin)
    comb_p = jnp.pad(comb, ((0, 0), (p, p), (p, Wp_a - W - p), (0, 0)))
    comb_flat = comb_p.reshape(B * Hp * Wp_a, Cin).astype(jnp.bfloat16)
    rows_needed = Mt + SH + (K - 1)
    comb_flat = jnp.pad(comb_flat, ((0, rows_needed - comb_flat.shape[0]), (0, 0)))

    # Per-tile overlapping (TM+SH)-row windows built directly from static slices
    # of comb_flat, with the K horizontal (kx) taps concatenated into lanes and
    # a trailing ones column (folded bias).  Single materialization — no
    # separate "fused array" + "stacked tiles" passes over HBM.
    # TODO(synk): for very large B*H*W pass comb via memory_space=pl.ANY and DMA
    # the overlapping windows manually (avoids the duplicated-halo HBM pass).
    windows = []
    ones_col = jnp.ones((TM + SH, 1), jnp.bfloat16)
    for m in range(n_tiles):
        start = m * TM
        shifted = [jax.lax.slice_in_dim(comb_flat, start + kx,
                                        start + kx + TM + SH, axis=0)
                   for kx in range(K)]
        windows.append(jnp.concatenate(shifted + [ones_col], axis=-1))
    comb_tiles = jnp.stack(windows)                                # (n_tiles, TM+SH, Cf)

    # Previous cell state in the same flat row space (bottom/right pad only; the
    # padded rows/cols are garbage outputs and are sliced off below).
    c_p = jnp.pad(c, ((0, 0), (0, 2 * p), (0, Wp_a - W), (0, 0)))
    c_flat = c_p.reshape(M, Hd).astype(jnp.float32)
    c_flat = jnp.pad(c_flat, ((0, Mt - M), (0, 0)))

    # Weights: (K, K*Cin, 4*Hd) with kx folded into the contraction dim; append
    # a bias row on the ky=0 slab (pairs with the ones column of comb_tiles).
    w_flat = weight.reshape(K, K * Cin, 4 * Hd)
    b_row = jnp.zeros((K, 1, 4 * Hd), weight.dtype).at[0, 0].set(bias)
    w_fused = jnp.concatenate([w_flat, b_row], axis=1).astype(jnp.bfloat16)

    # ---- explicit VMEM budget (v5e scoped default is 16 MiB; cap < v7x 64 MiB) ----
    out_itemsize = jnp.dtype(x.dtype).itemsize
    est = (2 * (TM + SH) * _round_up(Cf, 128) * 2                  # comb, dbl-buffered
           + 2 * K * _round_up(Cf, 16) * _round_up(4 * Hd, 128) * 2  # weights
           + 2 * TM * _round_up(Hd, 128) * 4                       # c_prev
           + 2 * TM * _round_up(Hd, 128) * out_itemsize            # h_next
           + 2 * TM * _round_up(Hd, 128) * 4)                      # c_next
    vmem_limit = int(min(max(2 * est, 32 << 20), 56 << 20))

    kernel = functools.partial(_convlstm_kernel, K=K, WROW=Wp_a, TM=TM, Hd=Hd,
                               CHUNK=row_chunk)

    h_flat, c_next_flat = pl.pallas_call(
        kernel,
        out_shape=(jax.ShapeDtypeStruct((Mt, Hd), x.dtype),
                   jax.ShapeDtypeStruct((Mt, Hd), jnp.float32)),
        grid_spec=pltpu.PrefetchScalarGridSpec(
            num_scalar_prefetch=0,
            grid=(n_tiles,),
            in_specs=[
                pl.BlockSpec((None, TM + SH, Cf), lambda m: (m, 0, 0)),
                # Grid-invariant weights: constant index_map so they are fetched
                # once; (pl.Buffered(1) would also drop the second VMEM copy on
                # v7x, but the slab is tiny here.)
                pl.BlockSpec((K, Cf, 4 * Hd), lambda m: (0, 0, 0)),
                pl.BlockSpec((TM, Hd), lambda m: (m, 0)),
            ],
            out_specs=[
                pl.BlockSpec((TM, Hd), lambda m: (m, 0)),
                pl.BlockSpec((TM, Hd), lambda m: (m, 0)),
            ],
        ),
        compiler_params=pltpu.CompilerParams(
            dimension_semantics=("parallel",),
            vmem_limit_bytes=vmem_limit),
    )(comb_tiles, w_fused, c_flat)

    h_next = h_flat[:M].reshape(B, Hp, Wp_a, Hd)[:, :H, :W, :]
    c_next = c_next_flat[:M].reshape(B, Hp, Wp_a, Hd)[:, :H, :W, :]
    return h_next, c_next


def conv_lstm_cell_ref(x, h, c, weight, bias):
    """Pure-JAX reference (mirrors the PyTorch forward) for verification."""
    comb = jnp.concatenate([x, h], axis=-1)
    conv = jax.lax.conv_general_dilated(
        comb, weight, window_strides=(1, 1), padding="SAME",
        dimension_numbers=("NHWC", "HWIO", "NHWC"),
        precision=jax.lax.Precision.HIGHEST)
    conv = conv + bias
    cc_i, cc_f, cc_o, cc_g = jnp.split(conv, 4, axis=-1)
    i = jax.nn.sigmoid(cc_i)
    f = jax.nn.sigmoid(cc_f)
    o = jax.nn.sigmoid(cc_o)
    g = jnp.tanh(cc_g)
    c_next = f * c + i * g
    h_next = o * jnp.tanh(c_next)
    return h_next, c_next


if __name__ == "__main__":
    # Small deterministic problem consistent with the module:
    #   input_dim=4, hidden_dim=32, kernel_size=3, batch=2, spatial=16x16
    B, Hsp, Wsp = 2, 16, 16
    input_dim, hidden_dim, kernel_size = 4, 32, 3
    Cin = input_dim + hidden_dim

    key = jax.random.PRNGKey(0)
    k_x, k_h, k_c, k_w, k_b = jax.random.split(key, 5)

    x = jax.random.normal(k_x, (B, Hsp, Wsp, input_dim), jnp.float32)
    h = jax.random.normal(k_h, (B, Hsp, Wsp, hidden_dim), jnp.float32)
    c = jax.random.normal(k_c, (B, Hsp, Wsp, hidden_dim), jnp.float32)

    # Deterministic synthetic conv parameters (PyTorch shapes: (4*Hd, Cin, K, K)
    # + (4*Hd,); stored here directly as HWIO).
    weight = 0.05 * jax.random.normal(
        k_w, (kernel_size, kernel_size, Cin, 4 * hidden_dim), jnp.float32)
    bias = 0.05 * jax.random.normal(k_b, (4 * hidden_dim,), jnp.float32)

    h_next, c_next = jax.jit(
        functools.partial(conv_lstm_cell, kernel_size=kernel_size)
    )(x, h, c, weight, bias)
    jax.block_until_ready((h_next, c_next))

    assert h_next.shape == (B, Hsp, Wsp, hidden_dim)
    assert c_next.shape == (B, Hsp, Wsp, hidden_dim)
    assert c_next.dtype == jnp.float32     # cell state stays f32

    # Tight check: reference computed on bf16-rounded conv operands (matches the
    # kernel's matmul quantization; residual is f32 accumulation order + EUP
    # transcendental approximation only).
    x_q = x.astype(jnp.bfloat16).astype(jnp.float32)
    h_q = h.astype(jnp.bfloat16).astype(jnp.float32)
    w_q = weight.astype(jnp.bfloat16).astype(jnp.float32)
    b_q = bias.astype(jnp.bfloat16).astype(jnp.float32)
    h_ref_q, c_ref_q = conv_lstm_cell_ref(x_q, h_q, c, w_q, b_q)
    assert jnp.allclose(h_next, h_ref_q, atol=5e-3, rtol=5e-3)
    assert jnp.allclose(c_next, c_ref_q, atol=5e-3, rtol=5e-3)

    # Loose sanity check against the full-f32 reference (bf16 matmul operands).
    h_ref, c_ref = conv_lstm_cell_ref(x, h, c, weight, bias)
    assert jnp.allclose(h_next, h_ref, atol=5e-2, rtol=5e-2)
    assert jnp.allclose(c_next, c_ref, atol=5e-2, rtol=5e-2)

    print("KERNEL_OK")
</pallas_src>

<mosaic_0001>
module attributes {stable_mosaic.version = 11 : i64} {
  func.func @_convlstm_kernel(%arg0: i32, %arg1: memref<1x448x109xbf16, #tpu.memory_space<vmem>>, %arg2: memref<3x109x128xbf16, #tpu.memory_space<vmem>>, %arg3: memref<384x32xf32, #tpu.memory_space<vmem>>, %arg4: memref<384x32xf32, #tpu.memory_space<vmem>>, %arg5: memref<384x32xf32, #tpu.memory_space<vmem>>) attributes {dimension_semantics = [#tpu.dimension_semantics<parallel>], iteration_bounds = array<i64: 4>, scalar_prefetch = 0 : i64, scratch_operands = 0 : i64, tpu.core_type = #tpu.core_type<tc>, window_params = [{transform_indices = @transform_0, window_bounds = array<i64: 1, 448, 109>}, {pipeline_mode = #tpu.pipeline_mode<synchronous>, transform_indices = @transform_1, window_bounds = array<i64: 3, 109, 128>}, {transform_indices = @transform_2, window_bounds = array<i64: 384, 32>}, {transform_indices = @transform_3, window_bounds = array<i64: 384, 32>}, {transform_indices = @transform_4, window_bounds = array<i64: 384, 32>}]} {
    %c0_i32 = arith.constant 0 : i32
    %c128_i32 = arith.constant 128 : i32
    %0 = arith.muli %c0_i32, %c128_i32 : i32
    %1 = tpu.assume_multiple %0, 128 : i32
    %c0 = arith.constant 0 : index
    %2 = arith.index_cast %1 : i32 to index
    %c0_0 = arith.constant 0 : index
    %3 = vector.load %arg1[%c0, %2, %c0_0] : memref<1x448x109xbf16, #tpu.memory_space<vmem>>, vector<1x128x109xbf16>
    %4 = vector.shape_cast %3 : vector<1x128x109xbf16> to vector<128x109xbf16>
    %c0_1 = arith.constant 0 : index
    %c0_2 = arith.constant 0 : index
    %c0_3 = arith.constant 0 : index
    %5 = vector.load %arg2[%c0_1, %c0_2, %c0_3] : memref<3x109x128xbf16, #tpu.memory_space<vmem>>, vector<1x109x128xbf16>
    %6 = vector.shape_cast %5 : vector<1x109x128xbf16> to vector<109x128xbf16>
    %cst = arith.constant dense<0.000000e+00> : vector<128x128xf32>
    %7 = tpu.matmul %4, %6, %cst {dimension_numbers = #tpu.dot_dimension_numbers<[1], [0], [0], [1], [0, 0, 1, 1], [], []>} : vector<128x109xbf16>, vector<109x128xbf16>, vector<128x128xf32> -> vector<128x128xf32>
    %c32_i32 = arith.constant 32 : i32
    %8 = arith.addi %1, %c32_i32 : i32
    %c0_4 = arith.constant 0 : index
    %9 = arith.index_cast %8 : i32 to index
    %c0_5 = arith.constant 0 : index
    %10 = vector.load %arg1[%c0_4, %9, %c0_5] : memref<1x448x109xbf16, #tpu.memory_space<vmem>>, vector<1x128x109xbf16>
    %11 = vector.shape_cast %10 : vector<1x128x109xbf16> to vector<128x109xbf16>
    %c1 = arith.constant 1 : index
    %c0_6 = arith.constant 0 : index
    %c0_7 = arith.constant 0 : index
    %12 = vector.load %arg2[%c1, %c0_6, %c0_7] : memref<3x109x128xbf16, #tpu.memory_space<vmem>>, vector<1x109x128xbf16>
    %13 = vector.shape_cast %12 : vector<1x109x128xbf16> to vector<109x128xbf16>
    %cst_8 = arith.constant dense<0.000000e+00> : vector<128x128xf32>
    %14 = tpu.matmul %11, %13, %cst_8 {dimension_numbers = #tpu.dot_dimension_numbers<[1], [0], [0], [1], [0, 0, 1, 1], [], []>} : vector<128x109xbf16>, vector<109x128xbf16>, vector<128x128xf32> -> vector<128x128xf32>
    %15 = arith.addf %7, %14 : vector<128x128xf32>
    %c64_i32 = arith.constant 64 : i32
    %16 = arith.addi %1, %c64_i32 : i32
    %c0_9 = arith.constant 0 : index
    %17 = arith.index_cast %16 : i32 to index
    %c0_10 = arith.constant 0 : index
    %18 = vector.load %arg1[%c0_9, %17, %c0_10] : memref<1x448x109xbf16, #tpu.memory_space<vmem>>, vector<1x128x109xbf16>
    %19 = vector.shape_cast %18 : vector<1x128x109xbf16> to vector<128x109xbf16>
    %c2 = arith.constant 2 : index
    %c0_11 = arith.constant 0 : index
    %c0_12 = arith.constant 0 : index
    %20 = vector.load %arg2[%c2, %c0_11, %c0_12] : memref<3x109x128xbf16, #tpu.memory_space<vmem>>, vector<1x109x128xbf16>
    %21 = vector.shape_cast %20 : vector<1x109x128xbf16> to vector<109x128xbf16>
    %cst_13 = arith.constant dense<0.000000e+00> : vector<128x128xf32>
    %22 = tpu.matmul %19, %21, %cst_13 {dimension_numbers = #tpu.dot_dimension_numbers<[1], [0], [0], [1], [0, 0, 1, 1], [], []>} : vector<128x109xbf16>, vector<109x128xbf16>, vector<128x128xf32> -> vector<128x128xf32>
    %23 = arith.addf %15, %22 : vector<128x128xf32>
    %24 = vector.extract_strided_slice %23 {offsets = [0, 0], sizes = [128, 96], strides = [1, 1]} : vector<128x128xf32> to vector<128x96xf32>
    %25 = arith.negf %24 : vector<128x96xf32>
    %26 = math.exp %25 : vector<128x96xf32>
    %cst_14 = arith.constant 1.000000e+00 : f32
    %27 = vector.broadcast %cst_14 : f32 to vector<128x96xf32>
    %28 = arith.addf %27, %26 : vector<128x96xf32>
    %29 = arith.divf %27, %28 : vector<128x96xf32>
    %30 = vector.extract_strided_slice %23 {offsets = [0, 96], sizes = [128, 32], strides = [1, 1]} : vector<128x128xf32> to vector<128x32xf32>
    %31 = math.tanh %30 : vector<128x32xf32>
    %32 = vector.extract_strided_slice %29 {offsets = [0, 0], sizes = [128, 32], strides = [1, 1]} : vector<128x96xf32> to vector<128x32xf32>
    %33 = vector.extract_strided_slice %29 {offsets = [0, 32], sizes = [128, 32], strides = [1, 1]} : vector<128x96xf32> to vector<128x32xf32>
    %34 = vector.extract_strided_slice %29 {offsets = [0, 64], sizes = [128, 32], strides = [1, 1]} : vector<128x96xf32> to vector<128x32xf32>
    %35 = arith.index_cast %1 : i32 to index
    %c0_15 = arith.constant 0 : index
    %36 = vector.load %arg3[%35, %c0_15] : memref<384x32xf32, #tpu.memory_space<vmem>>, vector<128x32xf32>
    %37 = arith.mulf %33, %36 : vector<128x32xf32>
    %38 = arith.mulf %32, %31 : vector<128x32xf32>
    %39 = arith.addf %37, %38 : vector<128x32xf32>
    %40 = math.tanh %39 : vector<128x32xf32>
    %41 = arith.mulf %34, %40 : vector<128x32xf32>
    %42 = arith.index_cast %1 : i32 to index
    %c0_16 = arith.constant 0 : index
    %43 = vector.load %arg5[%42, %c0_16] : memref<384x32xf32, #tpu.memory_space<vmem>>, vector<128x32xf32>
    tpu.vector_store %arg5[%42, %c0_16], %39 {strides = array<i32>} : memref<384x32xf32, #tpu.memory_space<vmem>>, vector<128x32xf32>,
    %44 = arith.index_cast %1 : i32 to index
    %c0_17 = arith.constant 0 : index
    %45 = vector.load %arg4[%44, %c0_17] : memref<384x32xf32, #tpu.memory_space<vmem>>, vector<128x32xf32>
    tpu.vector_store %arg4[%44, %c0_17], %41 {strides = array<i32>} : memref<384x32xf32, #tpu.memory_space<vmem>>, vector<128x32xf32>,
    %c1_i32 = arith.constant 1 : i32
    %c128_i32_18 = arith.constant 128 : i32
    %46 = arith.muli %c1_i32, %c128_i32_18 : i32
    %47 = tpu.assume_multiple %46, 128 : i32
    %c0_19 = arith.constant 0 : index
    %48 = arith.index_cast %47 : i32 to index
    %c0_20 = arith.constant 0 : index
    %49 = vector.load %arg1[%c0_19, %48, %c0_20] : memref<1x448x109xbf16, #tpu.memory_space<vmem>>, vector<1x128x109xbf16>
    %50 = vector.shape_cast %49 : vector<1x128x109xbf16> to vector<128x109xbf16>
    %c0_21 = arith.constant 0 : index
    %c0_22 = arith.constant 0 : index
    %c0_23 = arith.constant 0 : index
    %51 = vector.load %arg2[%c0_21, %c0_22, %c0_23] : memref<3x109x128xbf16, #tpu.memory_space<vmem>>, vector<1x109x128xbf16>
    %52 = vector.shape_cast %51 : vector<1x109x128xbf16> to vector<109x128xbf16>
    %cst_24 = arith.constant dense<0.000000e+00> : vector<128x128xf32>
    %53 = tpu.matmul %50, %52, %cst_24 {dimension_numbers = #tpu.dot_dimension_numbers<[1], [0], [0], [1], [0, 0, 1, 1], [], []>} : vector<128x109xbf16>, vector<109x128xbf16>, vector<128x128xf32> -> vector<128x128xf32>
    %c32_i32_25 = arith.constant 32 : i32
    %54 = arith.addi %47, %c32_i32_25 : i32
    %c0_26 = arith.constant 0 : index
    %55 = arith.index_cast %54 : i32 to index
    %c0_27 = arith.constant 0 : index
    %56 = vector.load %arg1[%c0_26, %55, %c0_27] : memref<1x448x109xbf16, #tpu.memory_space<vmem>>, vector<1x128x109xbf16>
    %57 = vector.shape_cast %56 : vector<1x128x109xbf16> to vector<128x109xbf16>
    %c1_28 = arith.constant 1 : index
    %c0_29 = arith.constant 0 : index
    %c0_30 = arith.constant 0 : index
    %58 = vector.load %arg2[%c1_28, %c0_29, %c0_30] : memref<3x109x128xbf16, #tpu.memory_space<vmem>>, vector<1x109x128xbf16>
    %59 = vector.shape_cast %58 : vector<1x109x128xbf16> to vector<109x128xbf16>
    %cst_31 = arith.constant dense<0.000000e+00> : vector<128x128xf32>
    %60 = tpu.matmul %57, %59, %cst_31 {dimension_numbers = #tpu.dot_dimension_numbers<[1], [0], [0], [1], [0, 0, 1, 1], [], []>} : vector<128x109xbf16>, vector<109x128xbf16>, vector<128x128xf32> -> vector<128x128xf32>
    %61 = arith.addf %53, %60 : vector<128x128xf32>
    %c64_i32_32 = arith.constant 64 : i32
    %62 = arith.addi %47, %c64_i32_32 : i32
    %c0_33 = arith.constant 0 : index
    %63 = arith.index_cast %62 : i32 to index
    %c0_34 = arith.constant 0 : index
    %64 = vector.load %arg1[%c0_33, %63, %c0_34] : memref<1x448x109xbf16, #tpu.memory_space<vmem>>, vector<1x128x109xbf16>
    %65 = vector.shape_cast %64 : vector<1x128x109xbf16> to vector<128x109xbf16>
    %c2_35 = arith.constant 2 : index
    %c0_36 = arith.constant 0 : index
    %c0_37 = arith.constant 0 : index
    %66 = vector.load %arg2[%c2_35, %c0_36, %c0_37] : memref<3x109x128xbf16, #tpu.memory_space<vmem>>, vector<1x109x128xbf16>
    %67 = vector.shape_cast %66 : vector<1x109x128xbf16> to vector<109x128xbf16>
    %cst_38 = arith.constant dense<0.000000e+00> : vector<128x128xf32>
    %68 = tpu.matmul %65, %67, %cst_38 {dimension_numbers = #tpu.dot_dimension_numbers<[1], [0], [0], [1], [0, 0, 1, 1], [], []>} : vector<128x109xbf16>, vector<109x128xbf16>, vector<128x128xf32> -> vector<128x128xf32>
    %69 = arith.addf %61, %68 : vector<128x128xf32>
    %70 = vector.extract_strided_slice %69 {offsets = [0, 0], sizes = [128, 96], strides = [1, 1]} : vector<128x128xf32> to vector<128x96xf32>
    %71 = arith.negf %70 : vector<128x96xf32>
    %72 = math.exp %71 : vector<128x96xf32>
    %cst_39 = arith.constant 1.000000e+00 : f32
    %73 = vector.broadcast %cst_39 : f32 to vector<128x96xf32>
    %74 = arith.addf %73, %72 : vector<128x96xf32>
    %75 = arith.divf %73, %74 : vector<128x96xf32>
    %76 = vector.extract_strided_slice %69 {offsets = [0, 96], sizes = [128, 32], strides = [1, 1]} : vector<128x128xf32> to vector<128x32xf32>
    %77 = math.tanh %76 : vector<128x32xf32>
    %78 = vector.extract_strided_slice %75 {offsets = [0, 0], sizes = [128, 32], strides = [1, 1]} : vector<128x96xf32> to vector<128x32xf32>
    %79 = vector.extract_strided_slice %75 {offsets = [0, 32], sizes = [128, 32], strides = [1, 1]} : vector<128x96xf32> to vector<128x32xf32>
    %80 = vector.extract_strided_slice %75 {offsets = [0, 64], sizes = [128, 32], strides = [1, 1]} : vector<128x96xf32> to vector<128x32xf32>
    %81 = arith.index_cast %47 : i32 to index
    %c0_40 = arith.constant 0 : index
    %82 = vector.load %arg3[%81, %c0_40] : memref<384x32xf32, #tpu.memory_space<vmem>>, vector<128x32xf32>
    %83 = arith.mulf %79, %82 : vector<128x32xf32>
    %84 = arith.mulf %78, %77 : vector<128x32xf32>
    %85 = arith.addf %83, %84 : vector<128x32xf32>
    %86 = math.tanh %85 : vector<128x32xf32>
    %87 = arith.mulf %80, %86 : vector<128x32xf32>
    %88 = arith.index_cast %47 : i32 to index
    %c0_41 = arith.constant 0 : index
    %89 = vector.load %arg5[%88, %c0_41] : memref<384x32xf32, #tpu.memory_space<vmem>>, vector<128x32xf32>
    tpu.vector_store %arg5[%88, %c0_41], %85 {strides = array<i32>} : memref<384x32xf32, #tpu.memory_space<vmem>>, vector<128x32xf32>,
    %90 = arith.index_cast %47 : i32 to index
    %c0_42 = arith.constant 0 : index
    %91 = vector.load %arg4[%90, %c0_42] : memref<384x32xf32, #tpu.memory_space<vmem>>, vector<128x32xf32>
    tpu.vector_store %arg4[%90, %c0_42], %87 {strides = array<i32>} : memref<384x32xf32, #tpu.memory_space<vmem>>, vector<128x32xf32>,
    %c2_i32 = arith.constant 2 : i32
    %c128_i32_43 = arith.constant 128 : i32
    %92 = arith.muli %c2_i32, %c128_i32_43 : i32
    %93 = tpu.assume_multiple %92, 128 : i32
    %c0_44 = arith.constant 0 : index
    %94 = arith.index_cast %93 : i32 to index
    %c0_45 = arith.constant 0 : index
    %95 = vector.load %arg1[%c0_44, %94, %c0_45] : memref<1x448x109xbf16, #tpu.memory_space<vmem>>, vector<1x128x109xbf16>
    %96 = vector.shape_cast %95 : vector<1x128x109xbf16> to vector<128x109xbf16>
    %c0_46 = arith.constant 0 : index
    %c0_47 = arith.constant 0 : index
    %c0_48 = arith.constant 0 : index
    %97 = vector.load %arg2[%c0_46, %c0_47, %c0_48] : memref<3x109x128xbf16, #tpu.memory_space<vmem>>, vector<1x109x128xbf16>
    %98 = vector.shape_cast %97 : vector<1x109x128xbf16> to vector<109x128xbf16>
    %cst_49 = arith.constant dense<0.000000e+00> : vector<128x128xf32>
    %99 = tpu.matmul %96, %98, %cst_49 {dimension_numbers = #tpu.dot_dimension_numbers<[1], [0], [0], [1], [0, 0, 1, 1], [], []>} : vector<128x109xbf16>, vector<109x128xbf16>, vector<128x128xf32> -> vector<128x128xf32>
    %c32_i32_50 = arith.constant 32 : i32
    %100 = arith.addi %93, %c32_i32_50 : i32
    %c0_51 = arith.constant 0 : index
    %101 = arith.index_cast %100 : i32 to index
    %c0_52 = arith.constant 0 : index
    %102 = vector.load %arg1[%c0_51, %101, %c0_52] : memref<1x448x109xbf16, #tpu.memory_space<vmem>>, vector<1x128x109xbf16>
    %103 = vector.shape_cast %102 : vector<1x128x109xbf16> to vector<128x109xbf16>
    %c1_53 = arith.constant 1 : index
    %c0_54 = arith.constant 0 : index
    %c0_55 = arith.constant 0 : index
    %104 = vector.load %arg2[%c1_53, %c0_54, %c0_55] : memref<3x109x128xbf16, #tpu.memory_space<vmem>>, vector<1x109x128xbf16>
    %105 = vector.shape_cast %104 : vector<1x109x128xbf16> to vector<109x128xbf16>
    %cst_56 = arith.constant dense<0.000000e+00> : vector<128x128xf32>
    %106 = tpu.matmul %103, %105, %cst_56 {dimension_numbers = #tpu.dot_dimension_numbers<[1], [0], [0], [1], [0, 0, 1, 1], [], []>} : vector<128x109xbf16>, vector<109x128xbf16>, vector<128x128xf32> -> vector<128x128xf32>
    %107 = arith.addf %99, %106 : vector<128x128xf32>
    %c64_i32_57 = arith.constant 64 : i32
    %108 = arith.addi %93, %c64_i32_57 : i32
    %c0_58 = arith.constant 0 : index
    %109 = arith.index_cast %108 : i32 to index
    %c0_59 = arith.constant 0 : index
    %110 = vector.load %arg1[%c0_58, %109, %c0_59] : memref<1x448x109xbf16, #tpu.memory_space<vmem>>, vector<1x128x109xbf16>
    %111 = vector.shape_cast %110 : vector<1x128x109xbf16> to vector<128x109xbf16>
    %c2_60 = arith.constant 2 : index
    %c0_61 = arith.constant 0 : index
    %c0_62 = arith.constant 0 : index
    %112 = vector.load %arg2[%c2_60, %c0_61, %c0_62] : memref<3x109x128xbf16, #tpu.memory_space<vmem>>, vector<1x109x128xbf16>
    %113 = vector.shape_cast %112 : vector<1x109x128xbf16> to vector<109x128xbf16>
    %cst_63 = arith.constant dense<0.000000e+00> : vector<128x128xf32>
    %114 = tpu.matmul %111, %113, %cst_63 {dimension_numbers = #tpu.dot_dimension_numbers<[1], [0], [0], [1], [0, 0, 1, 1], [], []>} : vector<128x109xbf16>, vector<109x128xbf16>, vector<128x128xf32> -> vector<128x128xf32>
    %115 = arith.addf %107, %114 : vector<128x128xf32>
    %116 = vector.extract_strided_slice %115 {offsets = [0, 0], sizes = [128, 96], strides = [1, 1]} : vector<128x128xf32> to vector<128x96xf32>
    %117 = arith.negf %116 : vector<128x96xf32>
    %118 = math.exp %117 : vector<128x96xf32>
    %cst_64 = arith.constant 1.000000e+00 : f32
    %119 = vector.broadcast %cst_64 : f32 to vector<128x96xf32>
    %120 = arith.addf %119, %118 : vector<128x96xf32>
    %121 = arith.divf %119, %120 : vector<128x96xf32>
    %122 = vector.extract_strided_slice %115 {offsets = [0, 96], sizes = [128, 32], strides = [1, 1]} : vector<128x128xf32> to vector<128x32xf32>
    %123 = math.tanh %122 : vector<128x32xf32>
    %124 = vector.extract_strided_slice %121 {offsets = [0, 0], sizes = [128, 32], strides = [1, 1]} : vector<128x96xf32> to vector<128x32xf32>
    %125 = vector.extract_strided_slice %121 {offsets = [0, 32], sizes = [128, 32], strides = [1, 1]} : vector<128x96xf32> to vector<128x32xf32>
    %126 = vector.extract_strided_slice %121 {offsets = [0, 64], sizes = [128, 32], strides = [1, 1]} : vector<128x96xf32> to vector<128x32xf32>
    %127 = arith.index_cast %93 : i32 to index
    %c0_65 = arith.constant 0 : index
    %128 = vector.load %arg3[%127, %c0_65] : memref<384x32xf32, #tpu.memory_space<vmem>>, vector<128x32xf32>
    %129 = arith.mulf %125, %128 : vector<128x32xf32>
    %130 = arith.mulf %124, %123 : vector<128x32xf32>
    %131 = arith.addf %129, %130 : vector<128x32xf32>
    %132 = math.tanh %131 : vector<128x32xf32>
    %133 = arith.mulf %126, %132 : vector<128x32xf32>
    %134 = arith.index_cast %93 : i32 to index
    %c0_66 = arith.constant 0 : index
    %135 = vector.load %arg5[%134, %c0_66] : memref<384x32xf32, #tpu.memory_space<vmem>>, vector<128x32xf32>
    tpu.vector_store %arg5[%134, %c0_66], %131 {strides = array<i32>} : memref<384x32xf32, #tpu.memory_space<vmem>>, vector<128x32xf32>,
    %136 = arith.index_cast %93 : i32 to index
    %c0_67 = arith.constant 0 : index
    %137 = vector.load %arg4[%136, %c0_67] : memref<384x32xf32, #tpu.memory_space<vmem>>, vector<128x32xf32>
    tpu.vector_store %arg4[%136, %c0_67], %133 {strides = array<i32>} : memref<384x32xf32, #tpu.memory_space<vmem>>, vector<128x32xf32>,
    %c3_i32 = arith.constant 3 : i32
    return
  }
  func.func @transform_0(%arg0: i32) -> (i32, i32, i32) {
    %c0_i32 = arith.constant 0 : i32
    %c0_i32_0 = arith.constant 0 : i32
    %c0_i32_1 = arith.constant 0 : i32
    return %arg0, %c0_i32, %c0_i32_0 : i32, i32, i32
  }
  func.func @transform_1(%arg0: i32) -> (i32, i32, i32) {
    %c0_i32 = arith.constant 0 : i32
    %c0_i32_0 = arith.constant 0 : i32
    %c0_i32_1 = arith.constant 0 : i32
    %c0_i32_2 = arith.constant 0 : i32
    return %c0_i32, %c0_i32_0, %c0_i32_1 : i32, i32, i32
  }
  func.func @transform_2(%arg0: i32) -> (i32, i32) {
    %c0_i32 = arith.constant 0 : i32
    %c0_i32_0 = arith.constant 0 : i32
    return %arg0, %c0_i32 : i32, i32
  }
  func.func @transform_3(%arg0: i32) -> (i32, i32) {
    %c0_i32 = arith.constant 0 : i32
    %c0_i32_0 = arith.constant 0 : i32
    return %arg0, %c0_i32 : i32, i32
  }
  func.func @transform_4(%arg0: i32) -> (i32, i32) {
    %c0_i32 = arith.constant 0 : i32
    %c0_i32_0 = arith.constant 0 : i32
    return %arg0, %c0_i32 : i32, i32
  }
}

</mosaic_0001>

<bundles_post_ra>
// kernel: conv_lstm_cell.1
= control target key start
LH: loop header
LB: loop body
LE: loop exit
PB: predicated region body
PF: predicated region fallthrough
CT: control target
= control target key end

     0   :  { %s6192_s15 = smov 0   ;;  %s9094_s0 = inlined_call_operand.vmem [shape: bf16[4,448,109], index: 0, kind: input, shape index: {}]   ;;  %s9095_s1 = inlined_call_operand.vmem [shape: bf16[3,109,128], index: 1, kind: input, shape index: {}]   ;;  %s9096_s2 = inlined_call_operand.vmem [shape: f32[1536,32], index: 2, kind: input, shape index: {}]   ;;  %s9097_s3 = inlined_call_operand.vmem [shape: f32[1536,32], index: 3, kind: output, shape index: {0}]   ;;  %s9098_s4 = inlined_call_operand.vmem [shape: f32[1536,32], index: 4, kind: output, shape index: {1}]  }
   0x1 LB: > { %s6198_s16 = sadd.s32 4294967295, %s6161_s15   ;;  %p4627_p0 = scmp.ge.s32.totalorder %s6161_s15, 1  ;;  %s6161_s15 = sphi %s6192_s15, %s15_s15  }
   0x2   : > { %p176_p1 = scmp.lt.s32.totalorder %s6161_s15, 5 }
   0x4   : > { %p177_p2 = pnand %p4627_p0, %p176_p1 }
   0x6   : > { %180 = sbr.rel (%p177_p2) target bundleno = 1074 (0x432), region = 32 }
   0xb   : > { %v4720_v0 = vld [vmem:[%s9095_s1 + $0x68] sm:$0xf]  ;;  %v5631_v1 = vld [vmem:[%s9095_s1 + $0x68] sm:$0x70]  ;;  %vm408_vm0 = vcmask 1045504   ;;  %vm409_vm1 = vcmask 1046528  }
   0xc   : > { %v4721_v2 = vor.u32 %v5631_v1, %v4720_v0  ;;  %v6163_v3 = vmov 65535   ;;  %v5630_v7 = vld [vmem:[%s9095_s1 + $0x60] sm:$0xff]  ;;  %v5629_v8 = vld [vmem:[%s9095_s1 + $0x58] sm:$0xff]  ;;  %v5628_v9 = vld [vmem:[%s9095_s1 + $0x50] sm:$0xff]  ;;  %p212_p3 = scmp.lt.s32.totalorder %s6198_s16, 3  ;;  %s217_s8 = smul.u32 48, %s6198_s16 }
   0xd   : > { %v410_v4 = vsel %vm408_vm0, 4294967295, %v6163_v3  ;;  %v5627_v10 = vld [vmem:[%s9095_s1 + $0x48] sm:$0xff]  ;;  %v4886_v11 = vld [vmem:[%s9095_s1 + $0xa0] sm:$0xf]  ;;  %v5646_v12 = vld [vmem:[%s9095_s1 + $0xa0] sm:$0x70] }
   0xe   : > { %v6208_v5 = vsel %vm409_vm1, %v410_v4, 0  ;;  %s213_s29 = scalar_select %p212_p3, %s6198_s16, 3  ;;  %v4788_v13 = vld [vmem:[%s9095_s1 + $0x30] sm:$0xf]  ;;  %v5616_v14 = vld [vmem:[%s9095_s1 + $0x30] sm:$0x70]  ;;  %v4887_v16 = vor.u32 %v5646_v12, %v4886_v11 }
   0xf   : > { %v413_v6 = vand.u32 %v4721_v2, %v6208_v5  ;;  %v5626_v15 = vld [vmem:[%s9095_s1 + $0x40] sm:$0xff]  ;;  %v5084_v17 = vld [vmem:[%s9095_s1 + $0x30] sm:$0xf]  ;;  %v5661_v18 = vld [vmem:[%s9095_s1 + $0x30] sm:$0x70]  ;;  %v4789_v19 = vor.u32 %v5616_v14, %v4788_v13  ;;  %p218_p4 = scmp.lt.s32.totalorder %s217_s8, 191 }
  0x10   : > { %s5758_s17 = smul.u32 224, %s213_s29  ;;  %v5016_v20 = vld [vmem:[%s9095_s1 + $0x68] sm:$0xf]  ;;  %v5676_v21 = vld [vmem:[%s9095_s1 + $0x68] sm:$0x70]  ;;  %v5625_v22 = vld [vmem:[%s9095_s1 + $0x38] sm:$0xff]  ;;  %v5085_v23 = vor.u32 %v5661_v18, %v5084_v17  ;;  %v763_v24 = vand.u32 %v4887_v16, %v6208_v5 }
  0x11   : > { %5737 = vmatpush.bf16.msra.mxu1 %v413_v6  ;;  %5738 = vmatpush.bf16.msra.mxu2 %v413_v6  ;;  %v5017_v25 = vor.u32 %v5676_v21, %v5016_v20  ;;  %v570_v26 = vand.u32 %v4789_v19, %v6208_v5  ;;  %s9361_s8 = smov (!%p218_p4, %s217_s8), 191  ;;  %vm383_vm2 = vcmask 891904   ;;  %v5645_v31 = vld [vmem:[%s9095_s1 + $0x98] sm:$0xff]  ;;  %v5615_v34 = vld [vmem:[%s9095_s1 + $0x28] sm:$0xff]  ;;  %v5675_v36 = vld [vmem:[%s9095_s1 + $0x60] sm:$0xff]  ;;  %s6164_s30 = smov 32  }
  0x12   : > { %5739 = vmatpush.bf16.msra.mxu3 %v413_v6  ;;  %416 = vmatpush.bf16.msra.mxu0 %v413_v6  ;;  %s6259_s29 = scalar_lea.vmem %s9094_s0, %s5758_s17  ;;  %v1992_v30 = vand.u32 %v5085_v23, %v6208_v5  ;;  %s6275_s9 = sshll.u32 %s9361_s8, 3  ;;  %v5660_v35 = vld [vmem:[%s9095_s1 + $0x28] sm:$0xff]  ;;  %v5644_v37 = vld [vmem:[%s9095_s1 + $0x90] sm:$0xff]  ;;  %v5614_v38 = vld [vmem:[%s9095_s1 + $0x20] sm:$0xff] }
  0x13   : > { %v5619_v27 = vld [vmem:[%s6259_s29 + $0x20] sm:$0xff]  ;;  %v5621_v28 = vld [vmem:[%s6259_s29 + $0x30] sm:$0xff]  ;;  %v1835_v32 = vand.u32 %v5017_v25, %v6208_v5  ;;  %s6293_s16 = scalar_lea.vmem %s9096_s2, %s6275_s9  ;;  %v5674_v41 = vld [vmem:[%s9095_s1 + $0x58] sm:$0xff]  ;;  %s8138_s17 = scalar_lea.vmem %s9098_s4, %s6275_s9 }
  0x14   : > { %v5623_v29 = vld [vmem:[%s6259_s29 + $0x40] sm:$0xff]  ;;  %v5617_v33 = vld [vmem:[%s6259_s29 + $0x10] sm:$0xff]  ;;  %v5643_v42 = vld [vmem:[%s9095_s1 + $0x88] sm:$0xff]  ;;  %s6166_s18 = smov 64   ;;  %s8676_s21 = scalar_lea.vmem %s9097_s3, %s6275_s9 }
  0x15   : > { %5740 = vmatpush.bf16.msra.mxu1 %v5630_v7  ;;  %5741 = vmatpush.bf16.msra.mxu2 %v5630_v7  ;;  %v5659_v39 = vld [vmem:[%s9095_s1 + $0x20] sm:$0xff]  ;;  %v5613_v43 = vld [vmem:[%s9095_s1 + $0x18] sm:$0xff]  ;;  %v5673_v45 = vld [vmem:[%s9095_s1 + $0x50] sm:$0xff] }
  0x16   : > { %5742 = vmatpush.bf16.msra.mxu3 %v5630_v7  ;;  %417 = vmatpush.bf16.msra.mxu0 %v5630_v7  ;;  %v1150_v40 = vld [vmem:[%s6293_s16] sm:$0xff]  ;;  %v5658_v44 = vld [vmem:[%s9095_s1 + $0x18] sm:$0xff]  ;;  %v5620_v47 = vld [vmem:[%s6259_s29 + $0x28] sm:$0xff] }
  0x17   : > { %1182 = vrot.lane.b32.xlu0 %v1150_v40, %s6164_s30  ;;  %v5642_v46 = vld [vmem:[%s9095_s1 + $0x80] sm:$0xff]  ;;  %v5622_v48 = vld [vmem:[%s6259_s29 + $0x38] sm:$0xff]  ;;  %v5612_v49 = vld [vmem:[%s9095_s1 + $0x10] sm:$0xff] }
  0x18   : > { %v5624_v50 = vld [vmem:[%s6259_s29 + $0x48] sm:$0xff]  ;;  %v5657_v53 = vld [vmem:[%s9095_s1 + $0x10] sm:$0xff]  ;;  %v5182_v54 = vld [vmem:[%s9095_s1 + $0xa0] sm:$0xf] }
  0x19   : > { %5743 = vmatpush.bf16.msra.mxu1 %v5629_v8  ;;  %5744 = vmatpush.bf16.msra.mxu2 %v5629_v8  ;;  %v5360_v51 = vld [vmem:[%s9095_s1 + $0x68] sm:$0xf]  ;;  %v5721_v52 = vld [vmem:[%s9095_s1 + $0x68] sm:$0x70]  ;;  %v5691_v55 = vld [vmem:[%s9095_s1 + $0xa0] sm:$0x70] }
  0x1a   : > { %5745 = vmatpush.bf16.msra.mxu3 %v5629_v8  ;;  %418 = vmatpush.bf16.msra.mxu0 %v5629_v8  ;;  %v5672_v56 = vld [vmem:[%s9095_s1 + $0x48] sm:$0xff]  ;;  %v5618_v57 = vld [vmem:[%s6259_s29 + $0x18] sm:$0xff]  ;;  %v5361_v60 = vor.u32 %v5721_v52, %v5360_v51  ;;  %v5526_v61 = vld [vmem:[%s9095_s1 + $0xa0] sm:$0xf]  ;;  %v5183_v63 = vor.u32 %v5691_v55, %v5182_v54 }
  0x1b   : > { %v5641_v58 = vld [vmem:[%s9095_s1 + $0x78] sm:$0xff]  ;;  %v5611_v59 = vld [vmem:[%s9095_s1 + $0x8] sm:$0xff]  ;;  %v5736_v62 = vld [vmem:[%s9095_s1 + $0xa0] sm:$0x70] }
  0x1c   : > { %v5428_v0 = vld [vmem:[%s9095_s1 + $0x30] sm:$0xf]  ;;  %v5706_v1 = vld [vmem:[%s9095_s1 + $0x30] sm:$0x70]  ;;  %v5656_v2 = vld [vmem:[%s9095_s1 + $0x8] sm:$0xff]  ;;  %v5527_v8 = vor.u32 %v5736_v62, %v5526_v61  ;;  %v2184_v12 = vand.u32 %v5183_v63, %v6208_v5 }
  0x1d   : > { %5746 = vmatpush.bf16.msra.mxu1 %v5628_v9  ;;  %5747 = vmatpush.bf16.msra.mxu2 %v5628_v9  ;;  %v1152_v3 = vld [vmem:[%s6293_s16 + $0x10] sm:$0xff]  ;;  %v1151_v4 = vld [vmem:[%s6293_s16 + $0x8] sm:$0xff]  ;;  %v5671_v6 = vld [vmem:[%s9095_s1 + $0x40] sm:$0xff]  ;;  %v5429_v11 = vor.u32 %v5706_v1, %v5428_v0 }
  0x1e   : > { %5748 = vmatpush.bf16.msra.mxu3 %v5628_v9  ;;  %419 = vmatpush.bf16.msra.mxu0 %v5628_v9  ;;  %v5640_v7 = vld [vmem:[%s9095_s1 + $0x70] sm:$0xff]  ;;  %v5610_v9 = vld [vmem:[%s9095_s1] sm:$0xff]  ;;  %v3607_v16 = vand.u32 %v5527_v8, %v6208_v5  ;;  %v5690_v19 = vld [vmem:[%s9095_s1 + $0x98] sm:$0xff] }
  0x1f   : > { %1186 = vrot.lane.b32.xlu1 %v1152_v3, %s6164_s30  ;;  %1184 = vrot.lane.b32.xlu0 %v1151_v4, %s6164_s30  ;;  %v1154_v13 = vld [vmem:[%s6293_s16 + $0x20] sm:$0xff]  ;;  %v3415_v17 = vand.u32 %v5429_v11, %v6208_v5  ;;  %v1153_v20 = vld [vmem:[%s6293_s16 + $0x18] sm:$0xff] }
  0x20   : > { %v5655_v14 = vld [vmem:[%s9095_s1] sm:$0xff]  ;;  %1190 = vrot.lane.b32.xlu2 %v1154_v13, %s6164_s30  ;;  %v1156_v21 = vld [vmem:[%s6293_s16 + $0x30] sm:$0xff]  ;;  %v5605_v61 = vld [vmem:[%s6259_s29 + $0x18] sm:$0xff] }
  0x21   : > { %5749 = vmatpush.bf16.msra.mxu1 %v5627_v10  ;;  %5750 = vmatpush.bf16.msra.mxu2 %v5627_v10  ;;  %v5720_v18 = vld [vmem:[%s9095_s1 + $0x60] sm:$0xff]  ;;  %v5734_v40 = vld [vmem:[%s9095_s1 + $0x90] sm:$0xff]  ;;  %v5635_v62 = vld [vmem:[%s6259_s29 + $0x38] sm:$0xff] }
  0x22   : > { %5751 = vmatpush.bf16.msra.mxu3 %v5627_v10  ;;  %420 = vmatpush.bf16.msra.mxu0 %v5627_v10  ;;  %v3258_v10 = vand.u32 %v5361_v60, %v6208_v5  ;;  %v5705_v5 = vld [vmem:[%s9095_s1 + $0x28] sm:$0xff]  ;;  %v5632_v23 = vld [vmem:[%s6259_s29 + $0x20] sm:$0xff]  ;;  %v5634_v51 = vld [vmem:[%s6259_s29 + $0x30] sm:$0xff] }
  0x23   : > { %v5647_v25 = vld [vmem:[%s6259_s29 + $0x40] sm:$0xff]  ;;  %v5210_v54 = vld [vmem:[%s6293_s16 + $0x90] sm:$0xff]  ;;  %v5665_v63 = vld [vmem:[%s6259_s29 + $0x68] sm:$0xff] }
  0x24   : > { %v5664_v52 = vld [vmem:[%s6259_s29 + $0x60] sm:$0xff]  ;;  %v5214_v60 = vld [vmem:[%s6293_s16 + $0xb0] sm:$0xff]  ;;  %v5650_v0 = vld [vmem:[%s6259_s29 + $0x58] sm:$0xff] }
  0x25   : > { %5752 = vmatpush.bf16.msra.mxu1 %v5626_v15  ;;  %5753 = vmatpush.bf16.msra.mxu2 %v5626_v15  ;;  %v5212_v55 = vld [vmem:[%s6293_s16 + $0xa0] sm:$0xff]  ;;  %v5702_v3 = vld [vmem:[%s9095_s1 + $0x10] sm:$0xff] }
  0x26   : > { %5754 = vmatpush.bf16.msra.mxu3 %v5626_v15  ;;  %421 = vmatpush.bf16.msra.mxu0 %v5626_v15  ;;  %v5670_v15 = vld [vmem:[%s9095_s1 + $0x38] sm:$0xff]  ;;  %v5687_v1 = vld [vmem:[%s9095_s1 + $0x80] sm:$0xff] }
  0x27   : > { %1188 = vrot.lane.b32.xlu1 %v1153_v20, %s6164_s30  ;;  %1194 = vrot.lane.b32.xlu0 %v1156_v21, %s6164_s30  ;;  %v5216_v4 = vld [vmem:[%s6293_s16 + $0xc0] sm:$0xff]  ;;  %v5553_v20 = vld [vmem:[%s6293_s16 + $0x108] sm:$0xff] }
  0x28   : > { %v5732_v8 = vld [vmem:[%s9095_s1 + $0x80] sm:$0xff]  ;;  %v5223_v21 = vld [vmem:[%s6293_s16 + $0xf8] sm:$0xff] }
  0x29   : > { %5755 = vmatpush.bf16.msra.mxu1 %v5625_v22  ;;  %5756 = vmatpush.bf16.msra.mxu2 %v5625_v22  ;;  %v5220_v11 = vld [vmem:[%s6293_s16 + $0xe0] sm:$0xff] }
  0x2a   : > { %5757 = vmatpush.bf16.msra.mxu3 %v5625_v22  ;;  %422 = vmatpush.bf16.msra.mxu0 %v5625_v22  ;;  %v5602_v22 = vld [vmem:[%s6259_s29] sm:$0xff] }
  0x2b   : > { %v5636_v13 = vld [vmem:[%s6259_s29 + $0x40] sm:$0xff] }
  0x2c   : > { %4724 = vmatmul.msk.bf16.vlgmr.msra.gmra.mxu1 %vm383_vm2, %v5619_v27  ;;  %4726 = vmatmul.msk.bf16.vlgmr.msra.gmra.mxu2 %vm383_vm2, %v5621_v28  ;;  %v1155_v27 = vld [vmem:[%s6293_s16 + $0x28] sm:$0xff]  ;;  %v1157_v28 = vld [vmem:[%s6293_s16 + $0x38] sm:$0xff] }
  0x2d   : > { %766 = vmatpush.bf16.msrb.mxu2 %v763_v24  ;;  %573 = vmatpush.bf16.msrb.mxu1 %v570_v26  ;;  %v5662_v24 = vld [vmem:[%s6259_s29 + $0x50] sm:$0xff]  ;;  %v5735_v26 = vld [vmem:[%s9095_s1 + $0x98] sm:$0xff] }
  0x2e   : > { %4728 = vmatmul.msk.bf16.vlgmr.msra.gmra.mxu3 %vm383_vm2, %v5623_v29  ;;  %1995 = vmatpush.bf16.msrb.mxu0 %v1992_v30  ;;  %v1159_v29 = vld [vmem:[%s6293_s16 + $0x48] sm:$0xff]  ;;  %v5689_v30 = vld [vmem:[%s9095_s1 + $0x90] sm:$0xff] }
  0x2f   : > { %1838 = vmatpush.bf16.msrb.mxu3 %v1835_v32  ;;  %4722 = vmatmul.msk.bf16.vlgmr.msra.gmra.mxu0 %vm383_vm2, %v5617_v33  ;;  %v5704_v32 = vld [vmem:[%s9095_s1 + $0x20] sm:$0xff] }
  0x30   : > { %1192 = vrot.lane.b32.xlu2 %v1155_v27, %s6164_s30  ;;  %1196 = vrot.lane.b32.xlu1 %v1157_v28, %s6164_s30  ;;  %v1158_v33 = vld [vmem:[%s6293_s16 + $0x40] sm:$0xff]  ;;  %v5667_v27 = vld [vmem:[%s6259_s29 + $0x78] sm:$0xff] }
  0x31   : > { %767 = vmatpush.bf16.msrb.mxu2 %v5645_v31  ;;  %574 = vmatpush.bf16.msrb.mxu1 %v5615_v34  ;;  %v5719_v31 = vld [vmem:[%s9095_s1 + $0x58] sm:$0xff]  ;;  %v1160_v34 = vld [vmem:[%s6293_s16 + $0x50] sm:$0xff]  ;;  %v5652_v28 = vld [vmem:[%s6259_s29 + $0x68] sm:$0xff] }
  0x32   : > { %1996 = vmatpush.bf16.msrb.mxu0 %v5660_v35  ;;  %1200 = vrot.lane.b32.xlu0 %v1159_v29, %s6164_s30  ;;  %v1162_v35 = vld [vmem:[%s6293_s16 + $0x60] sm:$0xff]  ;;  %v5685_v29 = vld [vmem:[%s9095_s1 + $0x70] sm:$0xff] }
  0x33   : > { %1839 = vmatpush.bf16.msrb.mxu3 %v5675_v36  ;;  %v5603_v36 = vld [vmem:[%s6259_s29 + $0x8] sm:$0xff] }
  0x35   : > { %768 = vmatpush.bf16.msrb.mxu2 %v5644_v37  ;;  %575 = vmatpush.bf16.msrb.mxu1 %v5614_v38  ;;  %v5633_v37 = vld [vmem:[%s6259_s29 + $0x28] sm:$0xff]  ;;  %v5663_v38 = vld [vmem:[%s6259_s29 + $0x58] sm:$0xff] }
  0x36   : > { %1997 = vmatpush.bf16.msrb.mxu0 %v5659_v39  ;;  %v5648_v39 = vld [vmem:[%s6259_s29 + $0x48] sm:$0xff] }
  0x37   : > { %1840 = vmatpush.bf16.msrb.mxu3 %v5674_v41  ;;  %v1161_v41 = vld [vmem:[%s6293_s16 + $0x58] sm:$0xff] }
  0x38   : > { %1198 = vrot.lane.b32.xlu2 %v1158_v33, %s6164_s30  ;;  %1202 = vrot.lane.b32.xlu1 %v1160_v34, %s6164_s30  ;;  %v5559_v33 = vld [vmem:[%s6293_s16 + $0x138] sm:$0xff] }
  0x39   : > { %769 = vmatpush.bf16.msrb.mxu2 %v5643_v42  ;;  %576 = vmatpush.bf16.msrb.mxu1 %v5613_v43  ;;  %v1163_v42 = vld [vmem:[%s6293_s16 + $0x68] sm:$0xff]  ;;  %v1165_v43 = vld [vmem:[%s6293_s16 + $0x78] sm:$0xff] }
  0x3a   : > { %1998 = vmatpush.bf16.msrb.mxu0 %v5658_v44  ;;  %1206 = vrot.lane.b32.xlu0 %v1162_v35, %s6164_s30  ;;  %v5688_v44 = vld [vmem:[%s9095_s1 + $0x88] sm:$0xff]  ;;  %v5555_v34 = vld [vmem:[%s6293_s16 + $0x118] sm:$0xff]  ;;  %v5608_v35 = vld [vmem:[%s6259_s29 + $0x30] sm:$0xff] }
  0x3b   : > { %1841 = vmatpush.bf16.msrb.mxu3 %v5673_v45  ;;  %v5718_v45 = vld [vmem:[%s9095_s1 + $0x50] sm:$0xff] }
  0x3c   : > { %4725 = vmatmul.msk.bf16.gmra.mxu1 %vm383_vm2, %v5620_v47  ;;  %4727 = vmatmul.msk.bf16.gmra.mxu2 %vm383_vm2, %v5622_v48  ;;  %v1164_v47 = vld [vmem:[%s6293_s16 + $0x70] sm:$0xff]  ;;  %v5209_v48 = vld [vmem:[%s6293_s16 + $0x88] sm:$0xff] }
  0x3d   : > { %770 = vmatpush.bf16.msrb.mxu2 %v5642_v46  ;;  %577 = vmatpush.bf16.msrb.mxu1 %v5612_v49  ;;  %v5703_v46 = vld [vmem:[%s9095_s1 + $0x18] sm:$0xff]  ;;  %v5208_v49 = vld [vmem:[%s6293_s16 + $0x80] sm:$0xff] }
  0x3e   : > { %4729 = vmatmul.msk.bf16.gmra.mxu3 %vm383_vm2, %v5624_v50  ;;  %1999 = vmatpush.bf16.msrb.mxu0 %v5657_v53  ;;  %v5604_v50 = vld [vmem:[%s6259_s29 + $0x10] sm:$0xff] }
  0x3f   : > { %1842 = vmatpush.bf16.msrb.mxu3 %v5672_v56  ;;  %4723 = vmatmul.msk.bf16.gmra.mxu0 %vm383_vm2, %v5618_v57  ;;  %v5649_v53 = vld [vmem:[%s6259_s29 + $0x50] sm:$0xff]  ;;  %v5211_v56 = vld [vmem:[%s6293_s16 + $0x98] sm:$0xff]  ;;  %v5733_v57 = vld [vmem:[%s9095_s1 + $0x88] sm:$0xff] }
  0x40   : > { %1204 = vrot.lane.b32.xlu2 %v1161_v41, %s6164_s30  ;;  %1208 = vrot.lane.b32.xlu1 %v1163_v42, %s6164_s30  ;;  %v5562_v41 = vld [vmem:[%s6293_s16 + $0x150] sm:$0xff] }
  0x41   : > { %771 = vmatpush.bf16.msrb.mxu2 %v5641_v58  ;;  %578 = vmatpush.bf16.msrb.mxu1 %v5611_v59  ;;  %v5213_v58 = vld [vmem:[%s6293_s16 + $0xa8] sm:$0xff]  ;;  %v5215_v59 = vld [vmem:[%s6293_s16 + $0xb8] sm:$0xff]  ;;  %v5653_v42 = vld [vmem:[%s6259_s29 + $0x70] sm:$0xff] }
  0x42   : > { %2000 = vmatpush.bf16.msrb.mxu0 %v5656_v2  ;;  %1212 = vrot.lane.b32.xlu0 %v1165_v43, %s6164_s30  ;;  %v5717_v2 = vld [vmem:[%s9095_s1 + $0x48] sm:$0xff]  ;;  %v5558_v43 = vld [vmem:[%s6293_s16 + $0x130] sm:$0xff] }
  0x43   : > { %1843 = vmatpush.bf16.msrb.mxu3 %v5671_v6  ;;  %v5218_v6 = vld [vmem:[%s6293_s16 + $0xd0] sm:$0xff] }
  0x45   : > { %772 = vmatpush.bf16.msrb.mxu2 %v5640_v7  ;;  %579 = vmatpush.bf16.msrb.mxu1 %v5610_v9  ;;  %v5217_v7 = vld [vmem:[%s6293_s16 + $0xc8] sm:$0xff]  ;;  %v5219_v9 = vld [vmem:[%s6293_s16 + $0xd8] sm:$0xff] }
  0x46   : > { %2001 = vmatpush.bf16.msrb.mxu0 %v5655_v14  ;;  %v5666_v14 = vld [vmem:[%s6259_s29 + $0x70] sm:$0xff] }
  0x47   : > { %1844 = vmatpush.bf16.msrb.mxu3 %v5670_v15  ;;  %v5651_v15 = vld [vmem:[%s6259_s29 + $0x60] sm:$0xff] }
  0x48   : > { %1210 = vrot.lane.b32.xlu2 %v1164_v47, %s6164_s30  ;;  %2606 = vrot.lane.b32.xlu1 %v5209_v48, %s6164_s30 }
  0x49   : > { %3261 = vmatpush.bf16.msra.mxu2 %v3258_v10  ;;  %2187 = vmatpush.bf16.msra.mxu1 %v2184_v12  ;;  %v5221_v10 = vld [vmem:[%s6293_s16 + $0xe8] sm:$0xff]  ;;  %v5606_v12 = vld [vmem:[%s6259_s29 + $0x20] sm:$0xff] }
  0x4a   : > { %3610 = vmatpush.bf16.msra.mxu0 %v3607_v16  ;;  %2604 = vrot.lane.b32.xlu0 %v5208_v49, %s6164_s30  ;;  %v5686_v16 = vld [vmem:[%s9095_s1 + $0x78] sm:$0xff] }
  0x4b   : > { %3418 = vmatpush.bf16.msra.mxu3 %v3415_v17  ;;  %v5716_v17 = vld [vmem:[%s9095_s1 + $0x40] sm:$0xff]  ;;  %v5563_v49 = vld [vmem:[%s6293_s16 + $0x158] sm:$0xff] }
  0x4c   : > { %4790 = vmatmul.msk.bf16.vlgmr.msrb.gmra.mxu1 %vm383_vm2, %v5602_v22  ;;  %4888 = vmatmul.msk.bf16.vlgmr.msrb.gmra.mxu2 %vm383_vm2, %v5632_v23  ;;  %v5607_v22 = vld [vmem:[%s6259_s29 + $0x28] sm:$0xff] }
  0x4d   : > { %3262 = vmatpush.bf16.msra.mxu2 %v5720_v18  ;;  %2188 = vmatpush.bf16.msra.mxu1 %v5690_v19  ;;  %v5701_v18 = vld [vmem:[%s9095_s1 + $0x8] sm:$0xff]  ;;  %v5222_v19 = vld [vmem:[%s6293_s16 + $0xf0] sm:$0xff] }
  0x4e   : > { %5018 = vmatmul.msk.bf16.vlgmr.msrb.gmra.mxu3 %vm383_vm2, %v5662_v24  ;;  %3611 = vmatpush.bf16.msra.mxu0 %v5735_v26  ;;  %v5637_v23 = vld [vmem:[%s6259_s29 + $0x48] sm:$0xff]  ;;  %v5554_v24 = vld [vmem:[%s6293_s16 + $0x110] sm:$0xff]  ;;  %v5552_v26 = vld [vmem:[%s6293_s16 + $0x100] sm:$0xff] }
  0x4f   : > { %3419 = vmatpush.bf16.msra.mxu3 %v5705_v5  ;;  %5086 = vmatmul.msk.bf16.vlgmr.msrb.gmra.mxu0 %vm383_vm2, %v5647_v25  ;;  %v5731_v5 = vld [vmem:[%s9095_s1 + $0x78] sm:$0xff]  ;;  %v5556_v25 = vld [vmem:[%s6293_s16 + $0x120] sm:$0xff] }
  0x50   : > { %2608 = vrot.lane.b32.xlu2 %v5210_v54, %s6164_s30  ;;  %2612 = vrot.lane.b32.xlu1 %v5212_v55, %s6164_s30 }
  0x51   : > { %2189 = vmatpush.bf16.msra.mxu1 %v5689_v30  ;;  %3263 = vmatpush.bf16.msra.mxu2 %v5719_v31  ;;  %v5715_v30 = vld [vmem:[%s9095_s1 + $0x38] sm:$0xff]  ;;  %v5700_v31 = vld [vmem:[%s9095_s1] sm:$0xff] }
  0x52   : > { %3612 = vmatpush.bf16.msra.mxu0 %v5734_v40  ;;  %2610 = vrot.lane.b32.xlu0 %v5211_v56, %s6164_s30  ;;  %v5668_v40 = vld [vmem:[%s6259_s29 + $0x80] sm:$0xff] }
  0x53   : > { %3420 = vmatpush.bf16.msra.mxu3 %v5704_v32  ;;  %v5557_v32 = vld [vmem:[%s6293_s16 + $0x128] sm:$0xff] }
  0x55   : > { %2190 = vmatpush.bf16.msra.mxu1 %v5688_v44  ;;  %3264 = vmatpush.bf16.msra.mxu2 %v5718_v45 }
  0x56   : > { %3613 = vmatpush.bf16.msra.mxu0 %v5733_v57  ;;  %v5609_v57 = vld [vmem:[%s6259_s29 + $0x38] sm:$0xff] }
  0x57   : > { %3421 = vmatpush.bf16.msra.mxu3 %v5703_v46 }
  0x58   : > { %2614 = vrot.lane.b32.xlu2 %v5213_v58, %s6164_s30  ;;  %2618 = vrot.lane.b32.xlu1 %v5215_v59, %s6164_s30  ;;  %v5639_v58 = vld [vmem:[%s6259_s29 + $0x58] sm:$0xff] }
  0x59   : > { %2191 = vmatpush.bf16.msra.mxu1 %v5687_v1  ;;  %3265 = vmatpush.bf16.msra.mxu2 %v5717_v2 }
  0x5a   : > { %2616 = vrot.lane.b32.xlu0 %v5214_v60, %s6164_s30  ;;  %3614 = vmatpush.bf16.msra.mxu0 %v5732_v8  ;;  %v5669_v60 = vld [vmem:[%s6259_s29 + $0x88] sm:$0xff]  ;;  %v5567_v8 = vld [vmem:[%s6293_s16 + $0x178] sm:$0xff] }
  0x5b   : > { %3422 = vmatpush.bf16.msra.mxu3 %v5702_v3 }
  0x5c   : > { %4791 = vmatmul.msk.bf16.gmra.mxu1 %vm383_vm2, %v5603_v36  ;;  %4889 = vmatmul.msk.bf16.gmra.mxu2 %vm383_vm2, %v5633_v37  ;;  %v5638_v36 = vld [vmem:[%s6259_s29 + $0x50] sm:$0xff] }
  0x5d   : > { %2192 = vmatpush.bf16.msra.mxu1 %v5686_v16  ;;  %3266 = vmatpush.bf16.msra.mxu2 %v5716_v17  ;;  %v5730_v37 = vld [vmem:[%s9095_s1 + $0x70] sm:$0xff]  ;;  %v5692_v16 = vld [vmem:[%s6259_s29 + $0x80] sm:$0xff] }
  0x5e   : > { %5019 = vmatmul.msk.bf16.gmra.mxu3 %vm383_vm2, %v5663_v38  ;;  %3615 = vmatpush.bf16.msra.mxu0 %v5731_v5  ;;  %v5560_v38 = vld [vmem:[%s6293_s16 + $0x140] sm:$0xff] }
  0x5f   : > { %5087 = vmatmul.msk.bf16.gmra.mxu0 %vm383_vm2, %v5648_v39  ;;  %3423 = vmatpush.bf16.msra.mxu3 %v5701_v18 }
  0x60   : > { %2620 = vrot.lane.b32.xlu2 %v5216_v4, %s6164_s30  ;;  %2624 = vrot.lane.b32.xlu1 %v5218_v6, %s6164_s30 }
  0x61   : > { %2193 = vmatpush.bf16.msra.mxu1 %v5685_v29  ;;  %3267 = vmatpush.bf16.msra.mxu2 %v5715_v30 }
  0x62   : > { %2622 = vrot.lane.b32.xlu0 %v5217_v7, %s6164_s30  ;;  %3616 = vmatpush.bf16.msra.mxu0 %v5730_v37 }
  0x63   : > { %3424 = vmatpush.bf16.msra.mxu3 %v5700_v31 }
  0x68   : > { %2626 = vrot.lane.b32.xlu2 %v5219_v9, %s6164_s30  ;;  %2630 = vrot.lane.b32.xlu1 %v5221_v10, %s6164_s30 }
  0x6a   : > { %2628 = vrot.lane.b32.xlu0 %v5220_v11, %s6164_s30 }
  0x6c   : > { %4792 = vmatmul.msk.bf16.gmra.mxu1 %vm383_vm2, %v5604_v50  ;;  %4890 = vmatmul.msk.bf16.gmra.mxu2 %vm383_vm2, %v5634_v51  ;;  %v5565_v50 = vld [vmem:[%s6293_s16 + $0x168] sm:$0xff] }
  0x6d   : > { %v5561_v51 = vld [vmem:[%s6293_s16 + $0x148] sm:$0xff] }
  0x6e   : > { %5020 = vmatmul.msk.bf16.gmra.mxu3 %vm383_vm2, %v5664_v52 }
  0x6f   : > { %5088 = vmatmul.msk.bf16.gmra.mxu0 %vm383_vm2, %v5649_v53 }
  0x70   : > { %2632 = vrot.lane.b32.xlu2 %v5222_v19, %s6164_s30  ;;  %4029 = vrot.lane.b32.xlu1 %v5553_v20, %s6164_s30  ;;  %v5722_v19 = vld [vmem:[%s6259_s29 + $0xa0] sm:$0xff] }
  0x72   : > { %2634 = vrot.lane.b32.xlu0 %v5223_v21, %s6164_s30 }
  0x78   : > { %4031 = vrot.lane.b32.xlu2 %v5554_v24, %s6164_s30  ;;  %4035 = vrot.lane.b32.xlu1 %v5556_v25, %s6164_s30 }
  0x7a   : > { %4027 = vrot.lane.b32.xlu0 %v5552_v26, %s6164_s30  ;;  %v6618_v54 = vpop.permute.xlu2 %1190 }
  0x7c   : > { %4793 = vmatmul.msk.bf16.gmra.mxu1 %vm383_vm2, %v5605_v61  ;;  %4891 = vmatmul.msk.bf16.gmra.mxu2 %vm383_vm2, %v5635_v62  ;;  %v5566_v61 = vld [vmem:[%s6293_s16 + $0x170] sm:$0xff] }
  0x7e   : > { %5021 = vmatmul.msk.bf16.gmra.mxu3 %vm383_vm2, %v5665_v63  ;;  %v5654_v63 = vld [vmem:[%s6259_s29 + $0x78] sm:$0xff] }
  0x7f   : > { %5089 = vmatmul.msk.bf16.gmra.mxu0 %vm383_vm2, %v5650_v0  ;;  %v5564_v0 = vld [vmem:[%s6293_s16 + $0x160] sm:$0xff] }
  0x80   : > { %4037 = vrot.lane.b32.xlu2 %v5557_v32, %s6164_s30  ;;  %4041 = vrot.lane.b32.xlu1 %v5559_v33, %s6164_s30 }
  0x82   : > { %4033 = vrot.lane.b32.xlu0 %v5555_v34, %s6164_s30 }
  0x88   : > { %4043 = vrot.lane.b32.xlu2 %v5560_v38, %s6164_s30  ;;  %4047 = vrot.lane.b32.xlu1 %v5562_v41, %s6164_s30  ;;  %v5693_v41 = vld [vmem:[%s6259_s29 + $0x88] sm:$0xff] }
  0x89   : > { %v6607_v47 = vpop.permute.xlu0 %1182 }
  0x8a   : > { %4039 = vrot.lane.b32.xlu0 %v5558_v43, %s6164_s30  ;;  %v6647_v6 = vpop.permute.xlu2 %1192 }
  0x8c   : > { %4794 = vmatmul.msk.bf16.gmra.mxu1 %vm383_vm2, %v5606_v12  ;;  %4892 = vmatmul.msk.bf16.gmra.mxu2 %vm383_vm2, %v5636_v13  ;;  %v5677_v13 = vld [vmem:[%s6259_s29 + $0x60] sm:$0xff] }
  0x8e   : > { %5022 = vmatmul.msk.bf16.gmra.mxu3 %vm383_vm2, %v5666_v14  ;;  %v5707_v14 = vld [vmem:[%s6259_s29 + $0x90] sm:$0xff] }
  0x8f   : > { %5090 = vmatmul.msk.bf16.gmra.mxu0 %vm383_vm2, %v5651_v15 }
  0x90   : > { %4049 = vrot.lane.b32.xlu2 %v5563_v49, %s6164_s30  ;;  %4053 = vrot.lane.b32.xlu1 %v5565_v50, %s6164_s30 }
  0x91   : > { %v6616_v53 = vpop.permute.xlu1 %1186  ;;  %v6631_v62 = vpop.permute.xlu0 %1184 }
  0x92   : > { %4045 = vrot.lane.b32.xlu0 %v5561_v51, %s6164_s30  ;;  %v6664_v18 = vpop.permute.xlu2 %1198 }
  0x93   : > { %9145 = vst [vmem:[#allocation4_spill] sm:$0xff] %v6664_v18 }
  0x98   : > { %4055 = vrot.lane.b32.xlu2 %v5566_v61, %s6164_s30 }
  0x99   : > { %v6643_v3 = vpop.permute.xlu1 %1188  ;;  %v6652_v10 = vpop.permute.xlu0 %1194 }
  0x9a   : > { %4051 = vrot.lane.b32.xlu0 %v5564_v0, %s6164_s30  ;;  %9143 = vst [vmem:[#allocation2_spill] sm:$0xff] %v6652_v10  ;;  %v6680_v29 = vpop.permute.xlu2 %1204 }
  0x9b   : > { %9148 = vst [vmem:[#allocation7_spill] sm:$0xff] %v6680_v29 }
  0x9c   : > { %4795 = vmatmul.msk.bf16.gmra.mxu1 %vm383_vm2, %v5607_v22  ;;  %4893 = vmatmul.msk.bf16.gmra.mxu2 %vm383_vm2, %v5637_v23 }
  0x9e   : > { %5023 = vmatmul.msk.bf16.gmra.mxu3 %vm383_vm2, %v5667_v27 }
  0x9f   : > { %5091 = vmatmul.msk.bf16.gmra.mxu0 %vm383_vm2, %v5652_v28 }
  0xa2   : > { %4057 = vrot.lane.b32.xlu0 %v5567_v8, %s6164_s30  ;;  %v6662_v17 = vpop.permute.xlu1 %1196  ;;  %v6699_v50 = vpop.permute.xlu2 %1210 }
  0xa3   : > { %9144 = vst [vmem:[#allocation3_spill] sm:$0xff] %v6662_v17 }
  0xa4   : > { %v6670_v5 = vpop.permute.xlu0 %1200  ;;  %9151 = vst [vmem:[#allocation10_spill] sm:$0xff] %v6699_v50 }
  0xa5   : > { %9146 = vst [vmem:[#allocation5_spill] sm:$0xff] %v6670_v5 }
  0xa9   : > { %v6590_v39 = vpop.f32.mrf.mxu1 }
  0xaa   : > { %v6678_v27 = vpop.permute.xlu1 %1202 }
  0xab   : > { %9147 = vst [vmem:[#allocation6_spill] sm:$0xff] %v6678_v27 }
  0xac   : > { %4796 = vmatmul.msk.bf16.gmra.mxu1 %vm383_vm2, %v5608_v35  ;;  %4894 = vmatmul.msk.bf16.gmra.mxu2 %vm383_vm2, %v5638_v36  ;;  %v424_v44 = vpop.f32.mrf.mxu0  ;;  %v5678_v35 = vld [vmem:[%s6259_s29 + $0x68] sm:$0xff]  ;;  %v5708_v36 = vld [vmem:[%s6259_s29 + $0x98] sm:$0xff]  ;;  %v6686_v37 = vpop.permute.xlu0 %1206 }
  0xad   : > { %9149 = vst [vmem:[#allocation8_spill] sm:$0xff] %v6686_v37 }
  0xae   : > { %5024 = vmatmul.msk.bf16.gmra.mxu3 %vm383_vm2, %v5668_v40 }
  0xaf   : > { %v6602_v45 = vpop.f32.mrf.mxu2  ;;  %5092 = vmatmul.msk.bf16.gmra.mxu0 %vm383_vm2, %v5653_v42  ;;  %v5723_v42 = vld [vmem:[%s6259_s29 + $0xa8] sm:$0xff] }
  0xb1   : > { %v6605_v46 = vpop.f32.mrf.mxu3  ;;  %v6609_v48 = vpop.f32.mrf.mxu1 }
  0xb4   : > { %v426_v52 = vpop.f32.mrf.mxu0 }
  0xb7   : > { %v6621_v55 = vpop.f32.mrf.mxu2 }
  0xb9   : > { %v6623_v56 = vpop.f32.mrf.mxu3  ;;  %v6627_v59 = vpop.f32.mrf.mxu1 }
  0xbc   : > { %4797 = vmatmul.msk.bf16.gmra.mxu1 %vm383_vm2, %v5609_v57  ;;  %4895 = vmatmul.msk.bf16.gmra.mxu2 %vm383_vm2, %v5639_v58  ;;  %v429_v1 = vpop.f32.mrf.mxu0 }
  0xbe   : > { %5025 = vmatmul.msk.bf16.gmra.mxu3 %vm383_vm2, %v5669_v60 }
  0xbf   : > { %v6640_v2 = vpop.f32.mrf.mxu2  ;;  %5093 = vmatmul.msk.bf16.gmra.mxu0 %vm383_vm2, %v5654_v63  ;;  %v6708_v63 = vpop.permute.xlu0 %1212 }
  0xc0   : > { %9152 = vst [vmem:[#allocation11_spill] sm:$0xff] %v6708_v63 }
  0xc1   : > { %v6645_v4 = vpop.f32.mrf.mxu3  ;;  %v6649_v7 = vpop.f32.mrf.mxu1 }
  0xc4   : > { %v431_v9 = vpop.f32.mrf.mxu0 }
  0xc7   : > { %v6655_v11 = vpop.f32.mrf.mxu2 }
  0xc9   : > { %v6657_v12 = vpop.f32.mrf.mxu3  ;;  %v581_v15 = vpop.f32.mrf.mxu1 }
  0xca   : > { %v582_v21 = vadd.f32 %v581_v15, %v424_v44  ;;  %v6697_v44 = vpop.permute.xlu1 %1208 }
  0xcb   : > { %9150 = vst [vmem:[#allocation9_spill] sm:$0xff] %v6697_v44 }
  0xcc   : > { %5184 = vmatmul.msk.bf16.vlgmr.msra.gmra.mxu1 %vm383_vm2, %v5677_v13  ;;  %5362 = vmatmul.msk.bf16.vlgmr.msra.gmra.mxu2 %vm383_vm2, %v5707_v14  ;;  %v2003_v20 = vpop.f32.mrf.mxu0 }
  0xce   : > { %5430 = vmatmul.msk.bf16.vlgmr.msra.gmra.mxu3 %vm383_vm2, %v5692_v16 }
  0xcf   : > { %v774_v22 = vpop.f32.mrf.mxu2  ;;  %5528 = vmatmul.msk.bf16.vlgmr.msra.gmra.mxu0 %vm383_vm2, %v5722_v19  ;;  %v6714_v19 = vpop.permute.xlu2 %2608 }
  0xd0   : > { %v6673_v23 = vadd.f32 %v774_v22, %v582_v21  ;;  %9154 = vst [vmem:[#allocation13_spill] sm:$0xff] %v6714_v19  ;;  %v5709_v21 = vld [vmem:[%s6259_s29 + $0xa0] sm:$0xff]  ;;  %v5699_v19 = vld [vmem:[%s6259_s29 + $0xb8] sm:$0xff] }
  0xd1   : > { %v1846_v24 = vpop.f32.mrf.mxu3  ;;  %v583_v26 = vpop.f32.mrf.mxu1 }
  0xd2   : > { %v6675_v25 = vadd.f32 %v2003_v20, %v1846_v24  ;;  %5771 = vtanh.f32 %v6673_v23  ;;  %v584_v30 = vadd.f32 %v583_v26, %v426_v52  ;;  %v6710_v13 = vpop.permute.xlu1 %2606  ;;  %v5679_v20 = vld [vmem:[%s6259_s29 + $0x70] sm:$0xff] }
  0xd3   : > { %9153 = vst [vmem:[#allocation12_spill] sm:$0xff] %v6710_v13  ;;  %v5694_v26 = vld [vmem:[%s6259_s29 + $0x90] sm:$0xff] }
  0xd4   : > { %v2005_v28 = vpop.f32.mrf.mxu0 }
  0xd7   : > { %v776_v31 = vpop.f32.mrf.mxu2 }
  0xd8   : > { %v5772_v32 = vpop.eup %5771  ;;  %v6682_v33 = vadd.f32 %v776_v31, %v584_v30  ;;  %v6726_v30 = vpop.permute.xlu0 %2604 }
  0xd9   : > { %v1848_v34 = vpop.f32.mrf.mxu3  ;;  %v586_v40 = vpop.f32.mrf.mxu1  ;;  %1262 = vrot.lane.b32.xlu1 %v5772_v32, %s6164_s30  ;;  %9155 = vst [vmem:[#allocation14_spill] sm:$0xff] %v6726_v30 }
  0xda   : > { %v6688_v38 = vadd.f32 %v2005_v28, %v1848_v34  ;;  %5773 = vtanh.f32 %v6682_v33  ;;  %v587_v49 = vadd.f32 %v586_v40, %v429_v1 }
  0xdc   : > { %5185 = vmatmul.msk.bf16.gmra.mxu1 %vm383_vm2, %v5678_v35  ;;  %5363 = vmatmul.msk.bf16.gmra.mxu2 %vm383_vm2, %v5708_v36  ;;  %v2008_v43 = vpop.f32.mrf.mxu0 }
  0xde   : > { %5431 = vmatmul.msk.bf16.gmra.mxu3 %vm383_vm2, %v5693_v41 }
  0xdf   : > { %v779_v51 = vpop.f32.mrf.mxu2  ;;  %5529 = vmatmul.msk.bf16.gmra.mxu0 %vm383_vm2, %v5723_v42  ;;  %v6736_v42 = vpop.permute.xlu1 %2612 }
  0xe0   : > { %v5774_v52 = vpop.eup %5773  ;;  %v6702_v57 = vadd.f32 %v779_v51, %v587_v49  ;;  %9156 = vst [vmem:[#allocation15_spill] sm:$0xff] %v6736_v42  ;;  %v6742_v51 = vpop.permute.xlu0 %2610 }
  0xe1   : > { %v1851_v58 = vpop.f32.mrf.mxu3  ;;  %v588_v61 = vpop.f32.mrf.mxu1  ;;  %1264 = vrot.lane.b32.xlu2 %v5774_v52, %s6164_s30  ;;  %9158 = vst [vmem:[#allocation17_spill] sm:$0xff] %v6742_v51  ;;  %v5714_v51 = vld [vmem:[%s6259_s29 + $0xc8] sm:$0xff] }
  0xe2   : > { %v6704_v60 = vadd.f32 %v2008_v43, %v1851_v58  ;;  %5775 = vtanh.f32 %v6702_v57  ;;  %v589_v1 = vadd.f32 %v588_v61, %v431_v9  ;;  %v5724_v9 = vld [vmem:[%s6259_s29 + $0xb0] sm:$0xff] }
  0xe4   : > { %v2010_v0 = vpop.f32.mrf.mxu0 }
  0xe7   : > { %v781_v8 = vpop.f32.mrf.mxu2 }
  0xe8   : > { %v5776_v14 = vpop.eup %5775  ;;  %v6712_v15 = vadd.f32 %v781_v8, %v589_v1  ;;  %v5680_v1 = vld [vmem:[%s6259_s29 + $0x78] sm:$0xff]  ;;  %v5710_v8 = vld [vmem:[%s6259_s29 + $0xa8] sm:$0xff] }
  0xe9   : > { %v1853_v16 = vpop.f32.mrf.mxu3  ;;  %v591_v24 = vpop.f32.mrf.mxu1  ;;  %1266 = vrot.lane.b32.xlu0 %v5776_v14, %s6164_s30 }
  0xea   : > { %v6718_v22 = vadd.f32 %v2010_v0, %v1853_v16  ;;  %5777 = vtanh.f32 %v6712_v15  ;;  %v592_v31 = vadd.f32 %v591_v24, %v6590_v39  ;;  %v6739_v39 = vpop.permute.xlu2 %2614  ;;  %v6754_v24 = vpop.permute.xlu1 %2618 }
  0xeb   : > { %9157 = vst [vmem:[#allocation16_spill] sm:$0xff] %v6739_v39 }
  0xec   : > { %5186 = vmatmul.msk.bf16.gmra.mxu1 %vm383_vm2, %v5679_v20  ;;  %5364 = vmatmul.msk.bf16.gmra.mxu2 %vm383_vm2, %v5709_v21  ;;  %v2013_v28 = vpop.f32.mrf.mxu0  ;;  %v5695_v20 = vld [vmem:[%s6259_s29 + $0x98] sm:$0xff]  ;;  %9159 = vst [vmem:[#allocation18_spill] sm:$0xff] %v6754_v24 }
  0xed   : > { %v5725_v21 = vld [vmem:[%s6259_s29 + $0xb8] sm:$0xff] }
  0xee   : > { %5432 = vmatmul.msk.bf16.gmra.mxu3 %vm383_vm2, %v5694_v26 }
  0xef   : > { %v784_v32 = vpop.f32.mrf.mxu2  ;;  %5530 = vmatmul.msk.bf16.gmra.mxu0 %vm383_vm2, %v5724_v9 }
  0xf0   : > { %v5778_v34 = vpop.eup %5777  ;;  %v6731_v35 = vadd.f32 %v784_v32, %v592_v31 }
  0xf1   : > { %v1856_v36 = vpop.f32.mrf.mxu3  ;;  %v593_v41 = vpop.f32.mrf.mxu1  ;;  %1268 = vrot.lane.b32.xlu1 %v5778_v34, %s6164_s30 }
  0xf2   : > { %v6733_v40 = vadd.f32 %v2013_v28, %v1856_v36  ;;  %5779 = vtanh.f32 %v6731_v35  ;;  %v594_v49 = vadd.f32 %v593_v41, %v6609_v48  ;;  %v6756_v48 = vpop.permute.xlu2 %2620  ;;  %v6765_v36 = vpop.permute.xlu0 %2616 }
  0xf3   : > { %9160 = vst [vmem:[#allocation19_spill] sm:$0xff] %v6756_v48 }
  0xf4   : > { %v2015_v43 = vpop.f32.mrf.mxu0  ;;  %9161 = vst [vmem:[#allocation20_spill] sm:$0xff] %v6765_v36 }
  0xf7   : > { %v786_v52 = vpop.f32.mrf.mxu2 }
  0xf8   : > { %v5780_v58 = vpop.eup %5779  ;;  %v6744_v61 = vadd.f32 %v786_v52, %v594_v49  ;;  %v6771_v49 = vpop.permute.xlu1 %2624 }
  0xf9   : > { %v1858_v0 = vpop.f32.mrf.mxu3  ;;  %v596_v16 = vpop.f32.mrf.mxu1  ;;  %1270 = vrot.lane.b32.xlu2 %v5780_v58, %s6164_s30  ;;  %9162 = vst [vmem:[#allocation21_spill] sm:$0xff] %v6771_v49 }
  0xfa   : > { %v6748_v14 = vadd.f32 %v2015_v43, %v1858_v0  ;;  %5781 = vtanh.f32 %v6744_v61  ;;  %v597_v9 = vadd.f32 %v596_v16, %v6627_v59  ;;  %v6774_v58 = vpop.permute.xlu2 %2626 }
  0xfb   : > { %9163 = vst [vmem:[#allocation22_spill] sm:$0xff] %v6774_v58 }
  0xfc   : > { %5187 = vmatmul.msk.bf16.gmra.mxu1 %vm383_vm2, %v5680_v1  ;;  %5365 = vmatmul.msk.bf16.gmra.mxu2 %vm383_vm2, %v5710_v8  ;;  %v2018_v26 = vpop.f32.mrf.mxu0 }
  0xfe   : > { %5433 = vmatmul.msk.bf16.gmra.mxu3 %vm383_vm2, %v5695_v20  ;;  %v5681_v20 = vld [vmem:[%s6259_s29 + $0x80] sm:$0xff] }
  0xff   : > { %v789_v28 = vpop.f32.mrf.mxu2  ;;  %5531 = vmatmul.msk.bf16.gmra.mxu0 %vm383_vm2, %v5725_v21  ;;  %v5711_v21 = vld [vmem:[%s6259_s29 + $0xb0] sm:$0xff] }
 0x100   : > { %v5782_v31 = vpop.eup %5781  ;;  %v6763_v32 = vadd.f32 %v789_v28, %v597_v9  ;;  %v5696_v28 = vld [vmem:[%s6259_s29 + $0xa0] sm:$0xff] }
 0x101   : > { %v1861_v34 = vpop.f32.mrf.mxu3  ;;  %v598_v43 = vpop.f32.mrf.mxu1  ;;  %1272 = vrot.lane.b32.xlu0 %v5782_v31, %s6164_s30 }
 0x102   : > { %v6767_v41 = vadd.f32 %v2018_v26, %v1861_v34  ;;  %5783 = vtanh.f32 %v6763_v32  ;;  %v599_v52 = vadd.f32 %v598_v43, %v6649_v7  ;;  %v6785_v31 = vpop.permute.xlu0 %2622  ;;  %v5726_v7 = vld [vmem:[%s6259_s29 + $0xc0] sm:$0xff] }
 0x103   : > { %9164 = vst [vmem:[#allocation23_spill] sm:$0xff] %v6785_v31 }
 0x104   : > { %v2020_v59 = vpop.f32.mrf.mxu0 }
 0x107   : > { %v791_v0 = vpop.f32.mrf.mxu2 }
 0x108   : > { %v5784_v1 = vpop.eup %5783  ;;  %v6776_v8 = vadd.f32 %v791_v0, %v599_v52  ;;  %v6793_v52 = vpop.permute.xlu1 %2630 }
 0x109   : > { %v1863_v16 = vpop.f32.mrf.mxu3  ;;  %v601_v9 = vpop.f32.mrf.mxu1  ;;  %1274 = vrot.lane.b32.xlu1 %v5784_v1, %s6164_s30  ;;  %9165 = vst [vmem:[#allocation24_spill] sm:$0xff] %v6793_v52 }
 0x10a   : > { %v6780_v26 = vadd.f32 %v2020_v59, %v1863_v16  ;;  %5785 = vtanh.f32 %v6776_v8  ;;  %v602_v43 = vadd.f32 %v601_v9, %v6602_v45  ;;  %v6795_v1 = vpop.permute.xlu2 %2632  ;;  %v6803_v9 = vpop.permute.xlu0 %2628 }
 0x10b   : > { %9166 = vst [vmem:[#allocation25_spill] sm:$0xff] %v6795_v1 }
 0x10c   : > { %5188 = vmatmul.msk.bf16.gmra.mxu1 %vm383_vm2, %v5681_v20  ;;  %5366 = vmatmul.msk.bf16.gmra.mxu2 %vm383_vm2, %v5711_v21  ;;  %v2023_v34 = vpop.f32.mrf.mxu0  ;;  %9167 = vst [vmem:[#allocation26_spill] sm:$0xff] %v6803_v9  ;;  %v4897_v9 = vmul.f32 -1.442695, %v6682_v33 }
 0x10e   : > { %5434 = vmatmul.msk.bf16.gmra.mxu3 %vm383_vm2, %v5696_v28 }
 0x10f   : > { %v794_v59 = vpop.f32.mrf.mxu2  ;;  %5532 = vmatmul.msk.bf16.gmra.mxu0 %vm383_vm2, %v5726_v7 }
 0x110   : > { %v5786_v0 = vpop.eup %5785  ;;  %v6797_v16 = vadd.f32 %v794_v59, %v602_v43  ;;  %v5682_v59 = vld [vmem:[%s6259_s29 + $0x88] sm:$0xff]  ;;  %v6814_v31 = vpop.permute.xlu1 %4029 }
 0x111   : > { %v1866_v20 = vpop.f32.mrf.mxu3  ;;  %v603_v21 = vpop.f32.mrf.mxu1  ;;  %1276 = vrot.lane.b32.xlu2 %v5786_v0, %s6164_s30  ;;  %v5697_v0 = vld [vmem:[%s6259_s29 + $0xa8] sm:$0xff]  ;;  %9168 = vst [vmem:[#allocation27_spill] sm:$0xff] %v6814_v31 }
 0x112   : > { %v6799_v58 = vadd.f32 %v2023_v34, %v1866_v20  ;;  %5787 = vtanh.f32 %v6797_v16  ;;  %v604_v28 = vadd.f32 %v603_v21, %v6621_v55  ;;  %v5712_v34 = vld [vmem:[%s6259_s29 + $0xb8] sm:$0xff]  ;;  %v6816_v48 = vpop.permute.xlu2 %4031  ;;  %v5727_v55 = vld [vmem:[%s6259_s29 + $0xc8] sm:$0xff] }
 0x113   : > { %9169 = vst [vmem:[#allocation28_spill] sm:$0xff] %v6816_v48  ;;  %v5684_v48 = vld [vmem:[%s6259_s29 + $0x98] sm:$0xff] }
 0x114   : > { %v2025_v45 = vpop.f32.mrf.mxu0 }
 0x117   : > { %v796_v7 = vpop.f32.mrf.mxu2 }
 0x118   : > { %v5788_v52 = vpop.eup %5787  ;;  %v6806_v1 = vadd.f32 %v796_v7, %v604_v28  ;;  %v4896_v28 = vmul.f32 -1.442695, %v6673_v23 }
 0x119   : > { %v1868_v43 = vpop.f32.mrf.mxu3  ;;  %v606_v49 = vpop.f32.mrf.mxu1  ;;  %1278 = vrot.lane.b32.xlu0 %v5788_v52, %s6164_s30 }
 0x11a   : > { %v6810_v20 = vadd.f32 %v2025_v45, %v1868_v43  ;;  %5789 = vtanh.f32 %v6806_v1  ;;  %v607_v45 = vadd.f32 %v606_v49, %v6640_v2  ;;  %v6825_v52 = vpop.permute.xlu0 %2634  ;;  %v6835_v2 = vpop.permute.xlu1 %4035 }
 0x11b   : > { %9170 = vst [vmem:[#allocation29_spill] sm:$0xff] %v6825_v52  ;;  %5791 = vpow2.f32 %v4896_v28  ;;  %v6837_v49 = vpop.permute.xlu2 %4037  ;;  %v5713_v52 = vld [vmem:[%s6259_s29 + $0xc0] sm:$0xff] }
 0x11c   : > { %5189 = vmatmul.msk.bf16.gmra.mxu1 %vm383_vm2, %v5682_v59  ;;  %5367 = vmatmul.msk.bf16.gmra.mxu2 %vm383_vm2, %v5712_v34  ;;  %v2028_v21 = vpop.f32.mrf.mxu0  ;;  %9171 = vst [vmem:[#allocation30_spill] sm:$0xff] %v6835_v2 }
 0x11d   : > { %9172 = vst [vmem:[#allocation31_spill] sm:$0xff] %v6837_v49 }
 0x11e   : > { %5435 = vmatmul.msk.bf16.gmra.mxu3 %vm383_vm2, %v5697_v0 }
 0x11f   : > { %v799_v7 = vpop.f32.mrf.mxu2  ;;  %5533 = vmatmul.msk.bf16.gmra.mxu0 %vm383_vm2, %v5727_v55 }
 0x120   : > { %v5790_v43 = vpop.eup %5789  ;;  %v6829_v24 = vadd.f32 %v799_v7, %v607_v45 }
 0x121   : > { %v1871_v59 = vpop.f32.mrf.mxu3  ;;  %v608_v23 = vpop.f32.mrf.mxu1  ;;  %1280 = vrot.lane.b32.xlu1 %v5790_v43, %s6164_s30  ;;  %v5683_v43 = vld [vmem:[%s6259_s29 + $0x90] sm:$0xff] }
 0x122   : > { %v6831_v34 = vadd.f32 %v2028_v21, %v1871_v59  ;;  %5793 = vtanh.f32 %v6829_v24  ;;  %v609_v0 = vadd.f32 %v608_v23, %v6655_v11  ;;  %v5792_v55 = vpop.eup %5791  ;;  %v6842_v59 = vpop.permute.xlu0 %4027  ;;  %v5728_v23 = vld [vmem:[%s6259_s29 + $0xd0] sm:$0xff] }
 0x123   : > { %5795 = vpow2.f32 %v4897_v9  ;;  %9173 = vst [vmem:[#allocation32_spill] sm:$0xff] %v6842_v59  ;;  %v5698_v9 = vld [vmem:[%s6259_s29 + $0xb0] sm:$0xff]  ;;  %v6851_v11 = vadd.f32 1.0, %v5792_v55 }
 0x124   : > { %v2030_v33 = vpop.f32.mrf.mxu0 }
 0x125   : > { %vm899_vm4 = vweird.f32 %v6851_v11 }
 0x127   : > { %v801_v28 = vpop.f32.mrf.mxu2 }
 0x128   : > { %v5794_v21 = vpop.eup %5793  ;;  %v6840_v45 = vadd.f32 %v801_v28, %v609_v0 }
 0x129   : > { %v1873_v7 = vpop.f32.mrf.mxu3  ;;  %v611_v2 = vpop.f32.mrf.mxu1  ;;  %1282 = vrot.lane.b32.xlu2 %v5794_v21, %s6164_s30 }
 0x12a   : > { %v6846_v36 = vadd.f32 %v2030_v33, %v1873_v7  ;;  %v5796_v49 = vpop.eup %5795  ;;  %5797 = vtanh.f32 %v6840_v45  ;;  %v6859_v33 = vpop.permute.xlu1 %4041  ;;  %v612_v21 = vadd.f32 %v611_v2, %v6605_v46 }
 0x12b   : > { %v6856_v28 = vadd.f32 1.0, %v5796_v49  ;;  %9174 = vst [vmem:[#allocation33_spill] sm:$0xff] %v6859_v33  ;;  %v6861_v7 = vpop.permute.xlu2 %4043  ;;  %5799 = vrcp.f32 %v6851_v11  ;;  %v6873_v46 = vpop.permute.xlu0 %4033  ;;  %v4898_v33 = vmul.f32 -1.442695, %v6702_v57 }
 0x12c   : > { %5190 = vmatmul.msk.bf16.gmra.mxu1 %vm383_vm2, %v5683_v43  ;;  %5368 = vmatmul.msk.bf16.gmra.mxu2 %vm383_vm2, %v5713_v52  ;;  %v2033_v0 = vpop.f32.mrf.mxu0  ;;  %9175 = vst [vmem:[#allocation34_spill] sm:$0xff] %v6861_v7 }
 0x12d   : > { %5801 = vrcp.f32 %v6856_v28  ;;  %9176 = vst [vmem:[#allocation35_spill] sm:$0xff] %v6873_v46  ;;  %vm914_vm7 = vweird.f32 %v6856_v28 }
 0x12e   : > { %5436 = vmatmul.msk.bf16.gmra.mxu3 %vm383_vm2, %v5698_v9 }
 0x12f   : > { %v804_v55 = vpop.f32.mrf.mxu2  ;;  %5534 = vmatmul.msk.bf16.gmra.mxu0 %vm383_vm2, %v5728_v23 }
 0x130   : > { %v5798_v39 = vpop.eup %5797  ;;  %v6866_v43 = vadd.f32 %v804_v55, %v612_v21 }
 0x131   : > { %v1876_v52 = vpop.f32.mrf.mxu3  ;;  %v613_v9 = vpop.f32.mrf.mxu1  ;;  %1284 = vrot.lane.b32.xlu0 %v5798_v39, %s6164_s30 }
 0x132   : > { %v6869_v49 = vadd.f32 %v2033_v0, %v1876_v52  ;;  %5803 = vtanh.f32 %v6866_v43  ;;  %v6875_v7 = vpop.eup %5799  ;;  %v614_v23 = vadd.f32 %v613_v9, %v6623_v56  ;;  %v6880_v0 = vpop.permute.xlu1 %4047 }
 0x133   : > { %v6878_v21 = vpop.eup %5801  ;;  %9177 = vst [vmem:[#allocation36_spill] sm:$0xff] %v6880_v0  ;;  %v6883_v39 = vpop.permute.xlu2 %4049  ;;  %v895_v31 = vmul.f32 %v6875_v7, %v6851_v11  ;;  %vm900_vm3 = vweird.f32 %v6875_v7 }
 0x134   : > { %v2035_v2 = vpop.f32.mrf.mxu0  ;;  %9178 = vst [vmem:[#allocation37_spill] sm:$0xff] %v6883_v39  ;;  %v910_v57 = vmul.f32 %v6878_v21, %v6856_v28  ;;  %v5729_v39 = vld [vmem:[%s6259_s29 + $0xd8] sm:$0xff]  ;;  %vm915_vm5 = vweird.f32 %v6878_v21  ;;  %vm6932_vm6 = vmor %vm899_vm4, %vm900_vm3  ;;  %s6165_s29 = smov 96  }
 0x135   : > { %vm916_vm8 = vmor %vm914_vm7, %vm915_vm5 }
 0x136   : > { %v911_v0 = vsub.f32 1.0, %v910_v57 }
 0x137   : > { %v806_v55 = vpop.f32.mrf.mxu2 }
 0x138   : > { %v5804_v52 = vpop.eup %5803  ;;  %v6885_v42 = vadd.f32 %v806_v55, %v614_v23  ;;  %v4899_v23 = vmul.f32 -1.442695, %v6712_v15  ;;  %v6900_v55 = vpop.permute.xlu0 %4039 }
 0x139   : > { %v1878_v46 = vpop.f32.mrf.mxu3  ;;  %v616_v9 = vpop.f32.mrf.mxu1  ;;  %1286 = vrot.lane.b32.xlu1 %v5804_v52, %s6164_s30  ;;  %9179 = vst [vmem:[#allocation38_spill] sm:$0xff] %v6900_v55 }
 0x13a   : > { %v6891_v56 = vadd.f32 %v2035_v2, %v1878_v46  ;;  %5805 = vtanh.f32 %v6885_v42  ;;  %v896_v2 = vsub.f32 1.0, %v895_v31  ;;  %v617_v52 = vadd.f32 %v616_v9, %v6645_v4  ;;  %v6913_v31 = vpop.permute.xlu1 %4053 }
 0x13b   : > { %5807 = vpow2.f32 %v4898_v33  ;;  %9180 = vst [vmem:[#allocation39_spill] sm:$0xff] %v6913_v31  ;;  %v4900_v4 = vmul.f32 -1.442695, %v6731_v35  ;;  %v6916_v9 = vpop.permute.xlu2 %4055  ;;  %v918_v31 = vand.u32 2147483647, %v6856_v28 }
 0x13c   : > { %5191 = vmatmul.msk.bf16.gmra.mxu1 %vm383_vm2, %v5684_v48  ;;  %5369 = vmatmul.msk.bf16.gmra.mxu2 %vm383_vm2, %v5714_v51  ;;  %v2038_v46 = vpop.f32.mrf.mxu0  ;;  %5809 = vpow2.f32 %v4899_v23  ;;  %v897_v55 = vmul.f32 %v6875_v7, %v896_v2  ;;  %9181 = vst [vmem:[#allocation40_spill] sm:$0xff] %v6916_v9 }
 0x13d   : > { %vm919_vm10 = vcmp.eq.f32.partialorder %v918_v31, 8.507059e+37  ;;  %v4901_v31 = vmul.f32 -1.442695, %v6744_v61 }
 0x13e   : > { %5437 = vmatmul.msk.bf16.gmra.mxu3 %vm383_vm2, %v5699_v19  ;;  %v898_v23 = vadd.f32 %v6875_v7, %v897_v55 }
 0x13f   : > { %v809_v13 = vpop.f32.mrf.mxu2  ;;  %5535 = vmatmul.msk.bf16.gmra.mxu0 %vm383_vm2, %v5729_v39  ;;  %v905_v39 = vand.u32 2147483648, %v6851_v11 }
 0x140   : > { %v5806_v59 = vpop.eup %5805  ;;  %v6907_v33 = vadd.f32 %v809_v13, %v617_v52  ;;  %v912_v13 = vmul.f32 %v6878_v21, %v911_v0  ;;  %v6926_v35 = vpop.permute.xlu0 %4045  ;;  %v903_v52 = vand.u32 2147483647, %v6851_v11  ;;  %v902_v11 = vsel %vm6932_vm6, %v6875_v7, %v898_v23 }
 0x141   : > { %v1881_v15 = vpop.f32.mrf.mxu3  ;;  %v618_v51 = vpop.f32.mrf.mxu1  ;;  %1288 = vrot.lane.b32.xlu2 %v5806_v59, %s6164_s30  ;;  %9182 = vst [vmem:[#allocation41_spill] sm:$0xff] %v6926_v35 }
 0x142   : > { %v6910_v48 = vadd.f32 %v2038_v46, %v1881_v15  ;;  %v5808_v19 = vpop.eup %5807  ;;  %5811 = vtanh.f32 %v6907_v33  ;;  %v619_v2 = vadd.f32 %v618_v51, %v6657_v12  ;;  %v913_v0 = vadd.f32 %v6878_v21, %v912_v13 }
 0x143   : > { %v6923_v46 = vadd.f32 1.0, %v5808_v19  ;;  %v5810_v59 = vpop.eup %5809  ;;  %5813 = vpow2.f32 %v4900_v4  ;;  %v906_v19 = vor.u32 1.1754944e-38, %v905_v39  ;;  %v920_v12 = vand.u32 2147483648, %v6856_v28 }
 0x144   : > { %v2040_v57 = vpop.f32.mrf.mxu0  ;;  %v6944_v13 = vadd.f32 1.0, %v5810_v59  ;;  %vm904_vm9 = vcmp.eq.f32.partialorder %v903_v52, 8.507059e+37 }
 0x145   : > { %5815 = vrcp.f32 %v6923_v46  ;;  %v6954_v23 = vsel %vm904_vm9, %v906_v19, %v902_v11  ;;  %v921_v55 = vor.u32 1.1754944e-38, %v920_v12  ;;  %vm929_vm12 = vweird.f32 %v6923_v46 }
 0x146   : > { %9185 = vst [vmem:[#allocation42_spill] sm:$0xff] %v6954_v23  ;;  %v933_v44 = vand.u32 2147483647, %v6923_v46  ;;  %vm944_vm15 = vweird.f32 %v6944_v13 }
 0x147   : > { %v811_v15 = vpop.f32.mrf.mxu2 }
 0x148   : > { %v5812_v9 = vpop.eup %5811  ;;  %v6938_v51 = vadd.f32 %v811_v15, %v619_v2  ;;  %v917_v2 = vsel %vm916_vm8, %v6878_v21, %v913_v0  ;;  %v1265_v15 = vpop.permute.xlu2 %1264  ;;  %vm934_vm0 = vcmp.eq.f32.partialorder %v933_v44, 8.507059e+37 }
 0x149   : > { %v1883_v4 = vpop.f32.mrf.mxu3  ;;  %v2195_v39 = vpop.f32.mrf.mxu1  ;;  %1290 = vrot.lane.b32.xlu0 %v5812_v9, %s6164_s30  ;;  %v6958_v9 = vsel %vm919_vm10, %v921_v55, %v917_v2 }
 0x14a   : > { %v6947_v35 = vadd.f32 %v2040_v57, %v1883_v4  ;;  %5817 = vtanh.f32 %v6938_v51  ;;  %v5814_v59 = vpop.eup %5813  ;;  %9186 = vst [vmem:[#allocation43_spill] sm:$0xff] %v6958_v9  ;;  %v6961_v4 = vadd.f32 %v2195_v39, %v6675_v25  ;;  %v1311_v0 = vmul.f32 %v1265_v15, %v6958_v9  ;;  %v6969_v11 = vpop.permute.xlu0 %4051 }
 0x14b   : > { %v1263_v7 = vpop.permute.xlu1 %1262  ;;  %5819 = vrcp.f32 %v6944_v13  ;;  %v6964_v21 = vpop.eup %5815  ;;  %v6966_v52 = vadd.f32 1.0, %v5814_v59  ;;  %9187 = vst [vmem:[#allocation44_spill] sm:$0xff] %v6969_v11  ;;  %v4902_v15 = vmul.f32 -1.442695, %v6763_v32 }
 0x14c   : > { %v1310_v28 = vmul.f32 %v1263_v7, %v6954_v23  ;;  %v3618_v57 = vpop.f32.mrf.mxu0  ;;  %5821 = vtanh.f32 %v6961_v4  ;;  %v925_v61 = vmul.f32 %v6964_v21, %v6923_v46  ;;  %vm930_vm11 = vweird.f32 %v6964_v21 }
 0x14d   : > { %5823 = vrcp.f32 %v6966_v52  ;;  %vm7019_vm13 = vmor %vm929_vm12, %vm930_vm11  ;;  %vm959_vm4 = vweird.f32 %v6966_v52 }
 0x14e   : > { %1342 = vrot.lane.b32.xlu2 %v1310_v28, %s6164_s30 }
 0x14f   : > { %v3269_v19 = vpop.f32.mrf.mxu2 }
 0x150   : > { %v5818_v12 = vpop.eup %5817 }
 0x151   : > { %v3426_v7 = vpop.f32.mrf.mxu3  ;;  %v2197_v2 = vpop.f32.mrf.mxu1  ;;  %1344 = vrot.lane.b32.xlu0 %v1311_v0, %s6164_s30  ;;  %1292 = vrot.lane.b32.xlu1 %v5818_v12, %s6164_s30 }
 0x152   : > { %v3427_v25 = vadd.f32 %v3426_v7, %v3269_v19  ;;  %v6976_v39 = vadd.f32 %v2197_v2, %v6688_v38  ;;  %v6978_v59 = vpop.eup %5819  ;;  %v926_v19 = vsub.f32 1.0, %v925_v61 }
 0x153   : > { %v940_v0 = vmul.f32 %v6978_v59, %v6944_v13  ;;  %v5822_v12 = vpop.eup %5821  ;;  %vm945_vm14 = vweird.f32 %v6978_v59 }
 0x154   : > { %5825 = vtanh.f32 %v6976_v39  ;;  %v3620_v55 = vpop.f32.mrf.mxu0  ;;  %v6985_v28 = vadd.f32 %v3618_v57, %v3427_v25  ;;  %v6990_v32 = vpop.eup %5823  ;;  %v4903_v57 = vmul.f32 -1.442695, %v6776_v8  ;;  %v927_v50 = vmul.f32 %v6964_v21, %v926_v19  ;;  %vm7040_vm1 = vmor %vm944_vm15, %vm945_vm14 }
 0x155   : > { %5827 = vpow2.f32 %v4901_v31  ;;  %v6994_v31 = vpop.permute.xlu0 %4057  ;;  %v955_v8 = vmul.f32 %v6990_v32, %v6966_v52  ;;  %v935_v19 = vand.u32 2147483648, %v6923_v46  ;;  %vm960_vm3 = vweird.f32 %v6990_v32 }
 0x156   : > { %5829 = vpow2.f32 %v4902_v15  ;;  %9188 = vst [vmem:[#allocation45_spill] sm:$0xff] %v6994_v31  ;;  %v941_v15 = vsub.f32 1.0, %v940_v0  ;;  %vm961_vm5 = vmor %vm959_vm4, %vm960_vm3 }
 0x157   : > { %v3271_v38 = vpop.f32.mrf.mxu2  ;;  %5831 = vtanh.f32 %v6985_v28  ;;  %v956_v31 = vsub.f32 1.0, %v955_v8  ;;  %v936_v29 = vor.u32 1.1754944e-38, %v935_v19 }
 0x159   : > { %v3428_v7 = vpop.f32.mrf.mxu3  ;;  %v2200_v11 = vpop.f32.mrf.mxu1  ;;  %2684 = vrot.lane.b32.xlu1 %v5822_v12, %s6164_s30 }
 0x15a   : > { %v3429_v2 = vadd.f32 %v3428_v7, %v3271_v38  ;;  %v5826_v30 = vpop.eup %5825  ;;  %v6997_v25 = vadd.f32 %v2200_v11, %v6704_v60  ;;  %v942_v11 = vmul.f32 %v6978_v59, %v941_v15 }
 0x15b   : > { %v5828_v61 = vpop.eup %5827  ;;  %2686 = vrot.lane.b32.xlu2 %v5826_v30, %s6164_s30 }
 0x15c   : > { %v6999_v63 = vadd.f32 %v3620_v55, %v3429_v2  ;;  %5833 = vtanh.f32 %v6997_v25  ;;  %v3623_v38 = vpop.f32.mrf.mxu0  ;;  %v5830_v12 = vpop.eup %5829  ;;  %v7007_v60 = vadd.f32 1.0, %v5828_v61  ;;  %v928_v55 = vadd.f32 %v6964_v21, %v927_v50 }
 0x15d   : > { %v5832_v7 = vpop.eup %5831  ;;  %v7012_v0 = vadd.f32 1.0, %v5830_v12  ;;  %v943_v15 = vadd.f32 %v6978_v59, %v942_v11  ;;  %v948_v11 = vand.u32 2147483647, %v6944_v13 }
 0x15e   : > { %5835 = vtanh.f32 %v6999_v63  ;;  %v932_v46 = vsel %vm7019_vm13, %v6964_v21, %v928_v55  ;;  %v957_v21 = vmul.f32 %v6990_v32, %v956_v31  ;;  %vm974_vm8 = vweird.f32 %v7007_v60 }
 0x15f   : > { %5837 = vpow2.f32 %v4903_v57  ;;  %v3274_v30 = vpop.f32.mrf.mxu2  ;;  %v7044_v55 = vsel %vm934_vm0, %v936_v29, %v932_v46  ;;  %vm949_vm2 = vcmp.eq.f32.partialorder %v948_v11, 8.507059e+37  ;;  %v4904_v29 = vmul.f32 -1.442695, %v6797_v16 }
 0x160   : > { %5839 = vrcp.f32 %v7007_v60  ;;  %v965_v11 = vand.u32 2147483648, %v6966_v52  ;;  %vm989_vm11 = vweird.f32 %v7012_v0 }
 0x161   : > { %v3431_v2 = vpop.f32.mrf.mxu3  ;;  %v2202_v37 = vpop.f32.mrf.mxu1  ;;  %4107 = vrot.lane.b32.xlu1 %v5832_v7, %s6164_s30  ;;  %v950_v7 = vand.u32 2147483648, %v6944_v13  ;;  %5841 = vrcp.f32 %v7012_v0  ;;  %v947_v13 = vsel %vm7040_vm1, %v6978_v59, %v943_v15 }
 0x162   : > { %v3432_v61 = vadd.f32 %v3431_v2, %v3274_v30  ;;  %v5834_v57 = vpop.eup %5833  ;;  %v1267_v2 = vpop.permute.xlu0 %1266  ;;  %v7047_v19 = vadd.f32 %v2202_v37, %v6718_v22  ;;  %v958_v37 = vadd.f32 %v6990_v32, %v957_v21 }
 0x163   : > { %2688 = vrot.lane.b32.xlu0 %v5834_v57, %s6164_s30  ;;  %v1312_v44 = vmul.f32 %v1267_v2, %v7044_v55  ;;  %v951_v31 = vor.u32 1.1754944e-38, %v950_v7  ;;  %v1269_v57 = vpop.permute.xlu1 %1268  ;;  %v4905_v2 = vmul.f32 -1.442695, %v6806_v1 }
 0x164   : > { %v5836_v12 = vpop.eup %5835  ;;  %v7028_v8 = vadd.f32 %v3623_v38, %v3432_v61  ;;  %v3625_v27 = vpop.f32.mrf.mxu0  ;;  %v963_v38 = vand.u32 2147483647, %v6966_v52  ;;  %v962_v1 = vsel %vm961_vm5, %v6990_v32, %v958_v37  ;;  %v966_v52 = vor.u32 1.1754944e-38, %v965_v11 }
 0x165   : > { %v5838_v30 = vpop.eup %5837  ;;  %4109 = vrot.lane.b32.xlu2 %v5836_v12, %s6164_s30  ;;  %v7060_v22 = vsel %vm949_vm2, %v951_v31, %v947_v13 }
 0x166   : > { %5843 = vtanh.f32 %v7028_v8  ;;  %v7052_v61 = vadd.f32 1.0, %v5838_v30  ;;  %v7055_v12 = vpop.eup %5839  ;;  %v1313_v46 = vmul.f32 %v1269_v57, %v7060_v22  ;;  %vm964_vm6 = vcmp.eq.f32.partialorder %v963_v38, 8.507059e+37 }
 0x167   : > { %v3276_v50 = vpop.f32.mrf.mxu2  ;;  %v7063_v15 = vpop.eup %5841  ;;  %5845 = vtanh.f32 %v7047_v19  ;;  %v970_v21 = vmul.f32 %v7055_v12, %v7007_v60  ;;  %vm975_vm7 = vweird.f32 %v7055_v12 }
 0x168   : > { %5847 = vrcp.f32 %v7052_v61  ;;  %vm7119_vm9 = vmor %vm974_vm8, %vm975_vm7  ;;  %vm990_vm10 = vweird.f32 %v7063_v15  ;;  %vm1004_vm0 = vweird.f32 %v7052_v61 }
 0x169   : > { %v3433_v5 = vpop.f32.mrf.mxu3  ;;  %v2205_v59 = vpop.f32.mrf.mxu1  ;;  %1346 = vrot.lane.b32.xlu1 %v1312_v44, %s6164_s30  ;;  %v971_v57 = vsub.f32 1.0, %v970_v21  ;;  %vm7140_vm13 = vmor %vm989_vm11, %vm990_vm10 }
 0x16a   : > { %v3434_v7 = vadd.f32 %v3433_v5, %v3276_v50  ;;  %v7068_v30 = vadd.f32 %v2205_v59, %v6733_v40  ;;  %v985_v40 = vmul.f32 %v7063_v15, %v7012_v0  ;;  %v1271_v44 = vpop.permute.xlu2 %1270 }
 0x16b   : > { %v972_v21 = vmul.f32 %v7055_v12, %v971_v57 }
 0x16c   : > { %v5844_v16 = vpop.eup %5843  ;;  %5849 = vtanh.f32 %v7068_v30  ;;  %v3628_v5 = vpop.f32.mrf.mxu0  ;;  %v7085_v13 = vadd.f32 %v3625_v27, %v3434_v7  ;;  %v986_v17 = vsub.f32 1.0, %v985_v40  ;;  %v4906_v27 = vmul.f32 -1.442695, %v6829_v24 }
 0x16d   : > { %4111 = vrot.lane.b32.xlu0 %v5844_v16, %s6164_s30  ;;  %1348 = vrot.lane.b32.xlu2 %v1313_v46, %s6164_s30  ;;  %5851 = vpow2.f32 %v4904_v29  ;;  %v5846_v50 = vpop.eup %5845  ;;  %v7089_v29 = vsel %vm964_vm6, %v966_v52, %v962_v1 }
 0x16e   : > { %5853 = vpow2.f32 %v4905_v2  ;;  %v7087_v46 = vpop.eup %5847  ;;  %v1314_v37 = vmul.f32 %v1271_v44, %v7089_v29 }
 0x16f   : > { %v3279_v31 = vpop.f32.mrf.mxu2  ;;  %5855 = vtanh.f32 %v7085_v13  ;;  %v1000_v40 = vmul.f32 %v7087_v46, %v7052_v61  ;;  %vm1005_vm15 = vweird.f32 %v7087_v46 }
 0x170   : > { %vm1006_vm1 = vmor %vm1004_vm0, %vm1005_vm15 }
 0x171   : > { %v3436_v59 = vpop.f32.mrf.mxu3  ;;  %v2207_v18 = vpop.f32.mrf.mxu1  ;;  %2690 = vrot.lane.b32.xlu1 %v5846_v50, %s6164_s30  ;;  %v1001_v50 = vsub.f32 1.0, %v1000_v40 }
 0x172   : > { %v3437_v16 = vadd.f32 %v3436_v59, %v3279_v31  ;;  %v5850_v32 = vpop.eup %5849  ;;  %v7096_v7 = vadd.f32 %v2207_v18, %v6748_v14  ;;  %v987_v14 = vmul.f32 %v7063_v15, %v986_v17  ;;  %v980_v31 = vand.u32 2147483648, %v7007_v60 }
 0x173   : > { %v5852_v2 = vpop.eup %5851  ;;  %v978_v59 = vand.u32 2147483647, %v7007_v60 }
 0x174   : > { %v7098_v11 = vadd.f32 %v3628_v5, %v3437_v16  ;;  %5857 = vtanh.f32 %v7096_v7  ;;  %v3630_v38 = vpop.f32.mrf.mxu0  ;;  %v5854_v24 = vpop.eup %5853  ;;  %v7107_v18 = vadd.f32 1.0, %v5852_v2  ;;  %v973_v5 = vadd.f32 %v7055_v12, %v972_v21 }
 0x175   : > { %1350 = vrot.lane.b32.xlu0 %v1314_v37, %s6164_s30  ;;  %2692 = vrot.lane.b32.xlu2 %v5850_v32, %s6164_s30  ;;  %v5856_v52 = vpop.eup %5855  ;;  %v7112_v44 = vadd.f32 1.0, %v5854_v24  ;;  %v988_v37 = vadd.f32 %v7063_v15, %v987_v14  ;;  %v995_v24 = vand.u32 2147483648, %v7012_v0  ;;  %v993_v14 = vand.u32 2147483647, %v7012_v0 }
 0x176   : > { %5859 = vtanh.f32 %v7098_v11  ;;  %v977_v60 = vsel %vm7119_vm9, %v7055_v12, %v973_v5  ;;  %v1002_v12 = vmul.f32 %v7087_v46, %v1001_v50  ;;  %vm979_vm12 = vcmp.eq.f32.partialorder %v978_v59, 8.507059e+37 }
 0x177   : > { %5861 = vpow2.f32 %v4906_v27  ;;  %v3281_v1 = vpop.f32.mrf.mxu2  ;;  %v992_v0 = vsel %vm7140_vm13, %v7063_v15, %v988_v37  ;;  %v996_v59 = vor.u32 1.1754944e-38, %v995_v24  ;;  %vm994_vm14 = vcmp.eq.f32.partialorder %v993_v14, 8.507059e+37 }
 0x178   : > { %5863 = vrcp.f32 %v7107_v18  ;;  %v1010_v14 = vand.u32 2147483648, %v7052_v61  ;;  %vm1019_vm4 = vweird.f32 %v7107_v18  ;;  %vm1034_vm7 = vweird.f32 %v7112_v44 }
 0x179   : > { %v3438_v57 = vpop.f32.mrf.mxu3  ;;  %v2210_v32 = vpop.f32.mrf.mxu1  ;;  %4113 = vrot.lane.b32.xlu1 %v5856_v52, %s6164_s30  ;;  %5865 = vrcp.f32 %v7112_v44 }
 0x17a   : > { %v3439_v16 = vadd.f32 %v3438_v57, %v3281_v1  ;;  %v5858_v17 = vpop.eup %5857  ;;  %v981_v1 = vor.u32 1.1754944e-38, %v980_v31  ;;  %v1273_v52 = vpop.permute.xlu0 %1272  ;;  %v7147_v31 = vadd.f32 %v2210_v32, %v6767_v41  ;;  %v1003_v41 = vadd.f32 %v7087_v46, %v1002_v12 }
 0x17b   : > { %v7160_v32 = vsel %vm994_vm14, %v996_v59, %v992_v0 }
 0x17c   : > { %v5860_v2 = vpop.eup %5859  ;;  %v7128_v21 = vadd.f32 %v3630_v38, %v3439_v16  ;;  %v3633_v57 = vpop.f32.mrf.mxu0  ;;  %v7144_v5 = vsel %vm979_vm12, %v981_v1, %v977_v60  ;;  %v4907_v60 = vmul.f32 -1.442695, %v6840_v45  ;;  %9198 = vst [vmem:[#allocation47_spill] sm:$0xff] %v7160_v32  ;;  %v1008_v38 = vand.u32 2147483647, %v7052_v61 }
 0x17d   : > { %v5862_v40 = vpop.eup %5861  ;;  %2694 = vrot.lane.b32.xlu0 %v5858_v17, %s6164_s30  ;;  %4115 = vrot.lane.b32.xlu2 %v5860_v2, %s6164_s30  ;;  %9197 = vst [vmem:[#allocation46_spill] sm:$0xff] %v7144_v5  ;;  %v1315_v50 = vmul.f32 %v1273_v52, %v7144_v5  ;;  %v1275_v17 = vpop.permute.xlu1 %1274  ;;  %v4908_v52 = vmul.f32 -1.442695, %v6866_v43  ;;  %v1011_v61 = vor.u32 1.1754944e-38, %v1010_v14 }
 0x17e   : > { %5867 = vtanh.f32 %v7128_v21  ;;  %v7152_v16 = vadd.f32 1.0, %v5862_v40  ;;  %v7155_v2 = vpop.eup %5863  ;;  %v1316_v24 = vmul.f32 %v1275_v17, %v7160_v32  ;;  %vm1009_vm2 = vcmp.eq.f32.partialorder %v1008_v38, 8.507059e+37 }
 0x17f   : > { %v3284_v27 = vpop.f32.mrf.mxu2  ;;  %v7163_v37 = vpop.eup %5865  ;;  %5869 = vtanh.f32 %v7147_v31  ;;  %v1015_v12 = vmul.f32 %v7155_v2, %v7107_v18  ;;  %vm1020_vm3 = vweird.f32 %v7155_v2 }
 0x180   : > { %5871 = vrcp.f32 %v7152_v16  ;;  %v1030_v0 = vmul.f32 %v7163_v37, %v7112_v44  ;;  %vm7219_vm5 = vmor %vm1019_vm4, %vm1020_vm3  ;;  %vm1035_vm6 = vweird.f32 %v7163_v37  ;;  %vm1049_vm12 = vweird.f32 %v7152_v16 }
 0x181   : > { %v3441_v10 = vpop.f32.mrf.mxu3  ;;  %v2212_v15 = vpop.f32.mrf.mxu1  ;;  %1352 = vrot.lane.b32.xlu1 %v1315_v50, %s6164_s30  ;;  %v1016_v17 = vsub.f32 1.0, %v1015_v12  ;;  %vm7240_vm9 = vmor %vm1034_vm7, %vm1035_vm6 }
 0x182   : > { %v3442_v40 = vadd.f32 %v3441_v10, %v3284_v27  ;;  %v7168_v1 = vadd.f32 %v2212_v15, %v6780_v26  ;;  %v1007_v26 = vsel %vm1006_vm1, %v7087_v46, %v1003_v41  ;;  %v1277_v50 = vpop.permute.xlu2 %1276  ;;  %v1031_v14 = vsub.f32 1.0, %v1030_v0 }
 0x183   : > { %v1017_v32 = vmul.f32 %v7155_v2, %v1016_v17 }
 0x184   : > { %v5868_v45 = vpop.eup %5867  ;;  %5873 = vtanh.f32 %v7168_v1  ;;  %v3635_v10 = vpop.f32.mrf.mxu0  ;;  %v7183_v43 = vadd.f32 %v3633_v57, %v3442_v40  ;;  %v4909_v40 = vmul.f32 -1.442695, %v6885_v42 }
 0x185   : > { %4117 = vrot.lane.b32.xlu0 %v5868_v45, %s6164_s30  ;;  %1354 = vrot.lane.b32.xlu2 %v1316_v24, %s6164_s30  ;;  %5875 = vpow2.f32 %v4907_v60  ;;  %v5870_v27 = vpop.eup %5869  ;;  %v7190_v24 = vsel %vm1009_vm2, %v1011_v61, %v1007_v26 }
 0x186   : > { %5877 = vpow2.f32 %v4908_v52  ;;  %v7188_v15 = vpop.eup %5871  ;;  %9199 = vst [vmem:[#allocation48_spill] sm:$0xff] %v7190_v24  ;;  %v1317_v45 = vmul.f32 %v1277_v50, %v7190_v24  ;;  %v1018_v50 = vadd.f32 %v7155_v2, %v1017_v32 }
 0x187   : > { %v3286_v59 = vpop.f32.mrf.mxu2  ;;  %5879 = vtanh.f32 %v7183_v43  ;;  %v1045_v42 = vmul.f32 %v7188_v15, %v7152_v16  ;;  %vm1050_vm11 = vweird.f32 %v7188_v15 }
 0x188   : > { %vm1051_vm13 = vmor %vm1049_vm12, %vm1050_vm11 }
 0x189   : > { %v3443_v60 = vpop.f32.mrf.mxu3  ;;  %v2215_v57 = vpop.f32.mrf.mxu1  ;;  %2696 = vrot.lane.b32.xlu1 %v5870_v27, %s6164_s30  ;;  %v1025_v27 = vand.u32 2147483648, %v7107_v18 }
 0x18a   : > { %v3444_v46 = vadd.f32 %v3443_v60, %v3286_v59  ;;  %v5874_v41 = vpop.eup %5873  ;;  %v7196_v52 = vadd.f32 %v2215_v57, %v6799_v58  ;;  %v1023_v57 = vand.u32 2147483647, %v7107_v18  ;;  %v1022_v18 = vsel %vm7219_vm5, %v7155_v2, %v1018_v50 }
 0x18b   : > { %v5876_v12 = vpop.eup %5875 }
 0x18c   : > { %v7198_v38 = vadd.f32 %v3635_v10, %v3444_v46  ;;  %5881 = vtanh.f32 %v7196_v52  ;;  %v3638_v26 = vpop.f32.mrf.mxu0  ;;  %v5878_v61 = vpop.eup %5877  ;;  %v7207_v0 = vadd.f32 1.0, %v5876_v12  ;;  %v1032_v10 = vmul.f32 %v7163_v37, %v1031_v14 }
 0x18d   : > { %1356 = vrot.lane.b32.xlu0 %v1317_v45, %s6164_s30  ;;  %2698 = vrot.lane.b32.xlu2 %v5874_v41, %s6164_s30  ;;  %v5880_v58 = vpop.eup %5879  ;;  %v7212_v17 = vadd.f32 1.0, %v5878_v61  ;;  %v1046_v46 = vsub.f32 1.0, %v1045_v42  ;;  %v1040_v42 = vand.u32 2147483648, %v7112_v44  ;;  %vm1024_vm8 = vcmp.eq.f32.partialorder %v1023_v57, 8.507059e+37 }
 0x18e   : > { %5883 = vtanh.f32 %v7198_v38  ;;  %v1033_v14 = vadd.f32 %v7163_v37, %v1032_v10  ;;  %v1038_v10 = vand.u32 2147483647, %v7112_v44  ;;  %vm1064_vm0 = vweird.f32 %v7207_v0 }
 0x18f   : > { %5885 = vpow2.f32 %v4909_v40  ;;  %v3289_v59 = vpop.f32.mrf.mxu2  ;;  %v1047_v2 = vmul.f32 %v7188_v15, %v1046_v46  ;;  %v1041_v57 = vor.u32 1.1754944e-38, %v1040_v42  ;;  %vm1079_vm3 = vweird.f32 %v7212_v17 }
 0x190   : > { %5887 = vrcp.f32 %v7207_v0  ;;  %v1037_v44 = vsel %vm7240_vm9, %v7163_v37, %v1033_v14  ;;  %vm1039_vm10 = vcmp.eq.f32.partialorder %v1038_v10, 8.507059e+37  ;;  %v1055_v10 = vand.u32 2147483648, %v7152_v16 }
 0x191   : > { %v3446_v60 = vpop.f32.mrf.mxu3  ;;  %v2217_v45 = vpop.f32.mrf.mxu1  ;;  %4119 = vrot.lane.b32.xlu1 %v5880_v58, %s6164_s30  ;;  %5889 = vrcp.f32 %v7212_v17 }
 0x192   : > { %v3447_v41 = vadd.f32 %v3446_v60, %v3289_v59  ;;  %v5882_v40 = vpop.eup %5881  ;;  %v1026_v59 = vor.u32 1.1754944e-38, %v1025_v27  ;;  %v1279_v60 = vpop.permute.xlu0 %1278  ;;  %v7247_v27 = vadd.f32 %v2217_v45, %v6810_v20  ;;  %v1048_v20 = vadd.f32 %v7188_v15, %v1047_v2 }
 0x193   : > { %v7260_v45 = vsel %vm1039_vm10, %v1041_v57, %v1037_v44 }
 0x194   : > { %v5884_v12 = vpop.eup %5883  ;;  %v7228_v61 = vadd.f32 %v3638_v26, %v3447_v41  ;;  %v3640_v24 = vpop.f32.mrf.mxu0  ;;  %v7244_v50 = vsel %vm1024_vm8, %v1026_v59, %v1022_v18  ;;  %v4910_v18 = vmul.f32 -1.442695, %v6907_v33  ;;  %9206 = vst [vmem:[#allocation51_spill] sm:$0xff] %v7260_v45  ;;  %v1053_v26 = vand.u32 2147483647, %v7152_v16 }
 0x195   : > { %v5886_v58 = vpop.eup %5885  ;;  %2700 = vrot.lane.b32.xlu0 %v5882_v40, %s6164_s30  ;;  %4121 = vrot.lane.b32.xlu2 %v5884_v12, %s6164_s30  ;;  %9205 = vst [vmem:[#allocation50_spill] sm:$0xff] %v7244_v50  ;;  %v1318_v46 = vmul.f32 %v1279_v60, %v7244_v50  ;;  %v1281_v40 = vpop.permute.xlu1 %1280  ;;  %v4911_v60 = vmul.f32 -1.442695, %v6938_v51  ;;  %v1056_v16 = vor.u32 1.1754944e-38, %v1055_v10 }
 0x196   : > { %9202 = vst [vmem:[#allocation49_spill] sm:$0xff] %v7228_v61  ;;  %5891 = vtanh.f32 %v7228_v61  ;;  %v7252_v41 = vadd.f32 1.0, %v5886_v58  ;;  %v7255_v12 = vpop.eup %5887  ;;  %v1319_v42 = vmul.f32 %v1281_v40, %v7260_v45  ;;  %v1283_v51 = vpop.permute.xlu2 %1282  ;;  %vm1054_vm14 = vcmp.eq.f32.partialorder %v1053_v26, 8.507059e+37 }
 0x197   : > { %v3291_v32 = vpop.f32.mrf.mxu2  ;;  %v7263_v14 = vpop.eup %5889  ;;  %5893 = vtanh.f32 %v7247_v27  ;;  %v1060_v2 = vmul.f32 %v7255_v12, %v7207_v0  ;;  %v5192_v26 = vmul.f32 -1.442695, %v6961_v4  ;;  %vm1065_vm15 = vweird.f32 %v7255_v12 }
 0x198   : > { %5895 = vrcp.f32 %v7252_v41  ;;  %vm7324_vm1 = vmor %vm1064_vm0, %vm1065_vm15  ;;  %vm1080_vm2 = vweird.f32 %v7263_v14  ;;  %vm1094_vm8 = vweird.f32 %v7252_v41 }
 0x199   : > { %v3448_v61 = vpop.f32.mrf.mxu3  ;;  %v2220_v37 = vpop.f32.mrf.mxu1  ;;  %1358 = vrot.lane.b32.xlu1 %v1318_v46, %s6164_s30  ;;  %v1075_v46 = vmul.f32 %v7263_v14, %v7212_v17  ;;  %v1061_v40 = vsub.f32 1.0, %v1060_v2  ;;  %vm7347_vm5 = vmor %vm1079_vm3, %vm1080_vm2 }
 0x19a   : > { %v3449_v58 = vadd.f32 %v3448_v61, %v3291_v32  ;;  %v7268_v59 = vadd.f32 %v2220_v37, %v6831_v34  ;;  %v1052_v61 = vsel %vm1051_vm13, %v7188_v15, %v1048_v20 }
 0x19b   : > { %v1062_v2 = vmul.f32 %v7255_v12, %v1061_v40 }
 0x19c   : > { %v5892_v33 = vpop.eup %5891  ;;  %5897 = vtanh.f32 %v7268_v59  ;;  %v3643_v34 = vpop.f32.mrf.mxu0  ;;  %v7283_v44 = vadd.f32 %v3640_v24, %v3449_v58  ;;  %v1076_v58 = vsub.f32 1.0, %v1075_v46 }
 0x19d   : > { %4123 = vrot.lane.b32.xlu0 %v5892_v33, %s6164_s30  ;;  %1360 = vrot.lane.b32.xlu2 %v1319_v42, %s6164_s30  ;;  %5899 = vpow2.f32 %v4910_v18  ;;  %v5894_v32 = vpop.eup %5893  ;;  %v7289_v18 = vsel %vm1054_vm14, %v1056_v16, %v1052_v61  ;;  %v1063_v4 = vadd.f32 %v7255_v12, %v1062_v2  ;;  %v5193_v2 = vmul.f32 -1.442695, %v6976_v39 }
 0x19e   : > { %5901 = vpow2.f32 %v4911_v60  ;;  %v7287_v42 = vpop.eup %5895  ;;  %9207 = vst [vmem:[#allocation52_spill] sm:$0xff] %v7289_v18  ;;  %v1320_v24 = vmul.f32 %v1283_v51, %v7289_v18  ;;  %v1077_v46 = vmul.f32 %v7263_v14, %v1076_v58 }
 0x19f   : > { %v3294_v57 = vpop.f32.mrf.mxu2  ;;  %5903 = vtanh.f32 %v7283_v44  ;;  %v1090_v61 = vmul.f32 %v7287_v42, %v7252_v41  ;;  %vm1095_vm7 = vweird.f32 %v7287_v42 }
 0x1a0   : > { %vm1096_vm9 = vmor %vm1094_vm8, %vm1095_vm7 }
 0x1a1   : > { %v3451_v37 = vpop.f32.mrf.mxu3  ;;  %v2222_v45 = vpop.f32.mrf.mxu1  ;;  %2702 = vrot.lane.b32.xlu1 %v5894_v32, %s6164_s30  ;;  %v1070_v32 = vand.u32 2147483648, %v7207_v0 }
 0x1a2   : > { %v3452_v33 = vadd.f32 %v3451_v37, %v3294_v57  ;;  %v5898_v15 = vpop.eup %5897  ;;  %v7295_v20 = vadd.f32 %v2222_v45, %v6846_v36  ;;  %v7306_v36 = vpop.permute.xlu2 %1288 }
 0x1a3   : > { %v5900_v60 = vpop.eup %5899  ;;  %v1071_v39 = vor.u32 1.1754944e-38, %v1070_v32 }
 0x1a4   : > { %9208 = vst [vmem:[#allocation53_spill] sm:$0xff] %v7295_v20  ;;  %v7297_v10 = vadd.f32 %v3643_v34, %v3452_v33  ;;  %5905 = vtanh.f32 %v7295_v20  ;;  %v5902_v51 = vpop.eup %5901  ;;  %v7309_v45 = vadd.f32 1.0, %v5900_v60  ;;  %v3645_v34 = vpop.f32.mrf.mxu0  ;;  %v1091_v33 = vsub.f32 1.0, %v1090_v61 }
 0x1a5   : > { %1362 = vrot.lane.b32.xlu0 %v1320_v24, %s6164_s30  ;;  %2704 = vrot.lane.b32.xlu2 %v5898_v15, %s6164_s30  ;;  %v5904_v57 = vpop.eup %5903  ;;  %v7314_v40 = vadd.f32 1.0, %v5902_v51  ;;  %v1068_v15 = vand.u32 2147483647, %v7207_v0  ;;  %v1078_v51 = vadd.f32 %v7263_v14, %v1077_v46  ;;  %v1067_v61 = vsel %vm7324_vm1, %v7255_v12, %v1063_v4 }
 0x1a6   : > { %5907 = vtanh.f32 %v7297_v10  ;;  %v1083_v46 = vand.u32 2147483647, %v7212_v17  ;;  %v1092_v18 = vmul.f32 %v7287_v42, %v1091_v33  ;;  %vm1109_vm12 = vweird.f32 %v7309_v45 }
 0x1a7   : > { %v3296_v16 = vpop.f32.mrf.mxu2  ;;  %5909 = vpow2.f32 %v5192_v26  ;;  %vm1069_vm4 = vcmp.eq.f32.partialorder %v1068_v15, 8.507059e+37  ;;  %v1082_v33 = vsel %vm7347_vm5, %v7263_v14, %v1078_v51  ;;  %vm1124_vm15 = vweird.f32 %v7314_v40 }
 0x1a8   : > { %5911 = vrcp.f32 %v7309_v45  ;;  %v7351_v32 = vsel %vm1069_vm4, %v1071_v39, %v1067_v61  ;;  %vm1084_vm6 = vcmp.eq.f32.partialorder %v1083_v46, 8.507059e+37  ;;  %v1093_v61 = vadd.f32 %v7287_v42, %v1092_v18 }
 0x1a9   : > { %v3453_v37 = vpop.f32.mrf.mxu3  ;;  %v2225_v60 = vpop.f32.mrf.mxu1  ;;  %4125 = vrot.lane.b32.xlu1 %v5904_v57, %s6164_s30  ;;  %v1085_v57 = vand.u32 2147483648, %v7212_v17  ;;  %5913 = vrcp.f32 %v7314_v40  ;;  %9214 = vst [vmem:[#allocation55_spill] sm:$0xff] %v7351_v32  ;;  %v5536_v18 = vmul.f32 -1.442695, %v6985_v28  ;;  %v1100_v46 = vand.u32 2147483648, %v7252_v41 }
 0x1aa   : > { %v3454_v24 = vadd.f32 %v3453_v37, %v3296_v16  ;;  %v5906_v58 = vpop.eup %5905  ;;  %v1285_v37 = vpop.permute.xlu0 %1284  ;;  %v7354_v17 = vadd.f32 %v2225_v60, %v6869_v49  ;;  %v1097_v28 = vsel %vm1096_vm9, %v7287_v42, %v1093_v61 }
 0x1ab   : > { %v7343_v12 = vpop.permute.xlu2 %1342  ;;  %v1321_v15 = vmul.f32 %v1285_v37, %v7351_v32 }
 0x1ac   : > { %v5908_v0 = vpop.eup %5907  ;;  %v7333_v16 = vadd.f32 %v3645_v34, %v3454_v24  ;;  %v1086_v24 = vor.u32 1.1754944e-38, %v1085_v57  ;;  %v3648_v20 = vpop.f32.mrf.mxu0 }
 0x1ad   : > { %2706 = vrot.lane.b32.xlu0 %v5906_v58, %s6164_s30  ;;  %4127 = vrot.lane.b32.xlu2 %v5908_v0, %s6164_s30  ;;  %v5910_v4 = vpop.eup %5909  ;;  %v1287_v58 = vpop.permute.xlu1 %1286 }
 0x1ae   : > { %9211 = vst [vmem:[#allocation54_spill] sm:$0xff] %v7333_v16  ;;  %5915 = vtanh.f32 %v7333_v16  ;;  %v7360_v0 = vpop.eup %5911  ;;  %v7366_v49 = vsel %vm1084_vm6, %v1086_v24, %v1082_v33  ;;  %v1098_v33 = vand.u32 2147483647, %v7252_v41  ;;  %v1101_v24 = vor.u32 1.1754944e-38, %v1100_v46 }
 0x1af   : > { %5917 = vpow2.f32 %v5193_v2  ;;  %v3299_v26 = vpop.f32.mrf.mxu2  ;;  %v7362_v2 = vadd.f32 1.0, %v5910_v4  ;;  %9215 = vst [vmem:[#allocation56_spill] sm:$0xff] %v7366_v49  ;;  %v7369_v14 = vpop.eup %5913  ;;  %v1322_v51 = vmul.f32 %v1287_v58, %v7366_v49  ;;  %v1105_v34 = vmul.f32 %v7360_v0, %v7309_v45 }
 0x1b0   : > { %5919 = vtanh.f32 %v7354_v17  ;;  %v1120_v41 = vmul.f32 %v7369_v14, %v7314_v40  ;;  %vm1099_vm10 = vcmp.eq.f32.partialorder %v1098_v33, 8.507059e+37  ;;  %vm1110_vm11 = vweird.f32 %v7360_v0 }
 0x1b1   : > { %v3456_v16 = vpop.f32.mrf.mxu3  ;;  %v2227_v60 = vpop.f32.mrf.mxu1  ;;  %1364 = vrot.lane.b32.xlu1 %v1321_v15, %s6164_s30  ;;  %vm7438_vm13 = vmor %vm1109_vm12, %vm1110_vm11  ;;  %vm1125_vm14 = vweird.f32 %v7369_v14  ;;  %vm2320_vm4 = vweird.f32 %v7362_v2 }
 0x1b2   : > { %v3457_v57 = vadd.f32 %v3456_v16, %v3299_v26  ;;  %v7374_v39 = vadd.f32 %v2227_v60, %v6891_v56  ;;  %v1106_v26 = vsub.f32 1.0, %v1105_v34  ;;  %v1121_v46 = vsub.f32 1.0, %v1120_v41  ;;  %vm7457_vm1 = vmor %vm1124_vm15, %vm1125_vm14 }
 0x1b3   : > { %v1230_v41 = vmul.f32 %v6607_v47, %v6954_v23 }
 0x1b4   : > { %v5916_v37 = vpop.eup %5915  ;;  %5921 = vtanh.f32 %v7374_v39  ;;  %v7391_v16 = vadd.f32 %v3648_v20, %v3457_v57  ;;  %v3650_v57 = vpop.f32.mrf.mxu0  ;;  %v1107_v33 = vmul.f32 %v7360_v0, %v1106_v26 }
 0x1b5   : > { %v5918_v4 = vpop.eup %5917  ;;  %4129 = vrot.lane.b32.xlu0 %v5916_v37, %s6164_s30  ;;  %1366 = vrot.lane.b32.xlu2 %v1322_v51, %s6164_s30  ;;  %5923 = vrcp.f32 %v7362_v2  ;;  %v7388_v56 = vpop.permute.xlu2 %2686  ;;  %v7398_v37 = vsel %vm1099_vm10, %v1101_v24, %v1097_v28  ;;  %v5537_v28 = vmul.f32 -1.442695, %v6999_v63  ;;  %v7433_v47 = vadd.f32 %v7343_v12, %v1230_v41 }
 0x1b6   : > { %5925 = vpow2.f32 %v5536_v18  ;;  %v7395_v15 = vadd.f32 1.0, %v5918_v4  ;;  %v5920_v60 = vpop.eup %5919  ;;  %9216 = vst [vmem:[#allocation57_spill] sm:$0xff] %v7398_v37  ;;  %v1323_v61 = vmul.f32 %v7306_v36, %v7398_v37  ;;  %v1108_v26 = vadd.f32 %v7360_v0, %v1107_v33 }
 0x1b7   : > { %v3301_v58 = vpop.f32.mrf.mxu2  ;;  %5927 = vtanh.f32 %v7391_v16  ;;  %v1130_v41 = vand.u32 2147483648, %v7314_v40  ;;  %v5195_v37 = vmul.f32 -1.442695, %v7047_v19 }
 0x1b8   : > { %5929 = vrcp.f32 %v7395_v15  ;;  %vm2335_vm8 = vweird.f32 %v7395_v15 }
 0x1b9   : > { %v3458_v51 = vpop.f32.mrf.mxu3  ;;  %v2230_v42 = vpop.f32.mrf.mxu1  ;;  %2708 = vrot.lane.b32.xlu1 %v5920_v60, %s6164_s30  ;;  %v1115_v60 = vand.u32 2147483648, %v7309_v45 }
 0x1ba   : > { %v3459_v49 = vadd.f32 %v3458_v51, %v3301_v58  ;;  %v5922_v20 = vpop.eup %5921  ;;  %v7404_v18 = vadd.f32 %v2230_v42, %v6910_v48  ;;  %v5194_v58 = vmul.f32 -1.442695, %v6997_v25 }
 0x1bb   : > { %v7406_v34 = vpop.eup %5923 }
 0x1bc   : > { %v7409_v4 = vadd.f32 %v3650_v57, %v3459_v49  ;;  %5931 = vtanh.f32 %v7404_v18  ;;  %v5926_v36 = vpop.eup %5925  ;;  %v1122_v49 = vmul.f32 %v7369_v14, %v1121_v46  ;;  %v2316_v63 = vmul.f32 %v7406_v34, %v7362_v2 }
 0x1bd   : > { %1368 = vrot.lane.b32.xlu0 %v1323_v61, %s6164_s30  ;;  %2710 = vrot.lane.b32.xlu2 %v5922_v20, %s6164_s30  ;;  %v5928_v48 = vpop.eup %5927  ;;  %v7428_v51 = vadd.f32 1.0, %v5926_v36  ;;  %v1113_v20 = vand.u32 2147483647, %v7309_v45  ;;  %v1112_v45 = vsel %vm7438_vm13, %v7360_v0, %v1108_v26  ;;  %v1116_v36 = vor.u32 1.1754944e-38, %v1115_v60  ;;  %v3653_v60 = vpop.f32.mrf.mxu0 }
 0x1be   : > { %5933 = vtanh.f32 %v7409_v4  ;;  %v7430_v42 = vpop.eup %5929  ;;  %v1123_v33 = vadd.f32 %v7369_v14, %v1122_v49  ;;  %v1128_v49 = vand.u32 2147483647, %v7314_v40  ;;  %vm2321_vm3 = vweird.f32 %v7406_v34 }
 0x1bf   : > { %v7419_v24 = vpop.permute.xlu2 %4109  ;;  %5935 = vpow2.f32 %v5537_v28  ;;  %v3304_v57 = vpop.f32.mrf.mxu2  ;;  %v2317_v28 = vsub.f32 1.0, %v2316_v63  ;;  %vm1114_vm0 = vcmp.eq.f32.partialorder %v1113_v20, 8.507059e+37  ;;  %v2331_v19 = vmul.f32 %v7430_v42, %v7395_v15  ;;  %vm7494_vm5 = vmor %vm2320_vm4, %vm2321_vm3 }
 0x1c0   : > { %5937 = vpow2.f32 %v5194_v58  ;;  %v7463_v26 = vsel %vm1114_vm0, %v1116_v36, %v1112_v45  ;;  %v1127_v40 = vsel %vm7457_vm1, %v7369_v14, %v1123_v33  ;;  %vm1129_vm2 = vcmp.eq.f32.partialorder %v1128_v49, 8.507059e+37 }
 0x1c1   : > { %4131 = vrot.lane.b32.xlu1 %v5928_v48, %s6164_s30  ;;  %v3461_v46 = vpop.f32.mrf.mxu3  ;;  %v1291_v48 = vpop.permute.xlu0 %1290  ;;  %5939 = vrcp.f32 %v7428_v51  ;;  %v2318_v20 = vmul.f32 %v7406_v34, %v2317_v28  ;;  %v2332_v14 = vsub.f32 1.0, %v2331_v19  ;;  %v2324_v63 = vand.u32 2147483647, %v7362_v2 }
 0x1c2   : > { %v5932_v25 = vpop.eup %5931  ;;  %5941 = vtanh.f32 %v7433_v47  ;;  %v3462_v0 = vadd.f32 %v3461_v46, %v3304_v57  ;;  %v1324_v61 = vmul.f32 %v1291_v48, %v7463_v26  ;;  %v1131_v57 = vor.u32 1.1754944e-38, %v1130_v41  ;;  %v2232_v48 = vpop.f32.mrf.mxu1 }
 0x1c3   : > { %v1293_v23 = vpop.permute.xlu1 %1292  ;;  %5943 = vpow2.f32 %v5195_v37  ;;  %v2319_v28 = vadd.f32 %v7406_v34, %v2318_v20  ;;  %v2326_v41 = vand.u32 2147483648, %v7362_v2  ;;  %vm2325_vm6 = vcmp.eq.f32.partialorder %v2324_v63, 8.507059e+37 }
 0x1c4   : > { %v5934_v12 = vpop.eup %5933  ;;  %v7474_v32 = vadd.f32 %v3653_v60, %v3462_v0  ;;  %v7476_v45 = vsel %vm1129_vm2, %v1131_v57, %v1127_v40  ;;  %v5196_v0 = vmul.f32 -1.442695, %v7068_v30  ;;  %v2333_v30 = vmul.f32 %v7430_v42, %v2332_v14 }
 0x1c5   : > { %2712 = vrot.lane.b32.xlu0 %v5932_v25, %s6164_s30  ;;  %4133 = vrot.lane.b32.xlu2 %v5934_v12, %s6164_s30  ;;  %v5936_v58 = vpop.eup %5935  ;;  %9221 = vst [vmem:[#allocation58_spill] sm:$0xff] %v7476_v45  ;;  %v1325_v33 = vmul.f32 %v1293_v23, %v7476_v45  ;;  %v7500_v40 = vadd.f32 %v2232_v48, %v6947_v35  ;;  %v2327_v57 = vor.u32 1.1754944e-38, %v2326_v41  ;;  %vm2336_vm7 = vweird.f32 %v7430_v42 }
 0x1c6   : > { %v5938_v46 = vpop.eup %5937  ;;  %v7472_v12 = vadd.f32 1.0, %v5936_v58  ;;  %5945 = vtanh.f32 %v7474_v32  ;;  %v2323_v2 = vsel %vm7494_vm5, %v7406_v34, %v2319_v28  ;;  %v2334_v34 = vadd.f32 %v7430_v42, %v2333_v30  ;;  %vm2337_vm9 = vmor %vm2335_vm8, %vm2336_vm7 }
 0x1c7   : > { %v7468_v25 = vpop.permute.xlu2 %1348  ;;  %v7479_v36 = vpop.eup %5939  ;;  %v7492_v23 = vadd.f32 1.0, %v5938_v46  ;;  %v5538_v46 = vmul.f32 -1.442695, %v7028_v8  ;;  %v7514_v35 = vsel %vm2325_vm6, %v2327_v57, %v2323_v2  ;;  %v5539_v48 = vmul.f32 -1.442695, %v7085_v13 }
 0x1c8   : > { %v5942_v37 = vpop.eup %5941  ;;  %5947 = vrcp.f32 %v7472_v12  ;;  %9224 = vst [vmem:[#allocation59_spill] sm:$0xff] %v7514_v35  ;;  %v2341_v41 = vand.u32 2147483648, %v7395_v15  ;;  %v1231_v63 = vmul.f32 %v6631_v62, %v6958_v9  ;;  %v2338_v19 = vsel %vm2337_vm9, %v7430_v42, %v2334_v34 }
 0x1c9   : > { %1370 = vrot.lane.b32.xlu1 %v1324_v61, %s6164_s30  ;;  %v1345_v58 = vpop.permute.xlu0 %1344  ;;  %v5944_v60 = vpop.eup %5943  ;;  %v3739_v61 = vmul.f32 %v7479_v36, %v7428_v51  ;;  %5949 = vpow2.f32 %v5196_v0  ;;  %vm3743_vm11 = vweird.f32 %v7428_v51  ;;  %vm3744_vm12 = vweird.f32 %v7479_v36 }
 0x1ca   : > { %5951 = vrcp.f32 %v7492_v23  ;;  %v7511_v14 = vadd.f32 1.0, %v5944_v60  ;;  %v1391_v60 = vadd.f32 %v1345_v58, %v1231_v63  ;;  %v3463_v42 = vpop.f32.mrf.mxu3  ;;  %v3749_v63 = vand.u32 2147483648, %v7428_v51  ;;  %vm7572_vm13 = vmor %vm3743_vm11, %vm3744_vm12 }
 0x1cb   : > { %v2685_v49 = vpop.permute.xlu1 %2684  ;;  %5953 = vtanh.f32 %v7500_v40  ;;  %v3740_v28 = vsub.f32 1.0, %v3739_v61  ;;  %v2342_v61 = vor.u32 1.1754944e-38, %v2341_v41  ;;  %v5197_v9 = vmul.f32 -1.442695, %v7096_v7 }
 0x1cc   : > { %v2732_v8 = vmul.f32 %v2685_v49, %v7514_v35  ;;  %5955 = vpow2.f32 %v5538_v46  ;;  %vm3758_vm0 = vweird.f32 %v7472_v12  ;;  %vm2350_vm4 = vweird.f32 %v7492_v23 }
 0x1cd   : > { %1372 = vrot.lane.b32.xlu2 %v1325_v33, %s6164_s30  ;;  %1438 = vrot.lane.b32.xlu0 %v5942_v37, %s6164_s30  ;;  %v5946_v33 = vpop.eup %5945  ;;  %5957 = vrcp.f32 %v7511_v14  ;;  %v3741_v62 = vmul.f32 %v7479_v36, %v3740_v28  ;;  %vm2365_vm7 = vweird.f32 %v7511_v14 }
 0x1ce   : > { %v7521_v37 = vpop.eup %5947  ;;  %5959 = vpow2.f32 %v5539_v48 }
 0x1cf   : > { %v7505_v20 = vpop.permute.xlu2 %2692  ;;  %v5950_v49 = vpop.eup %5949  ;;  %5961 = vtanh.f32 %v1391_v60  ;;  %v3742_v48 = vadd.f32 %v7479_v36, %v3741_v62  ;;  %vm3759_vm15 = vweird.f32 %v7521_v37 }
 0x1d0   : > { %v7544_v2 = vpop.eup %5951  ;;  %v7546_v46 = vadd.f32 1.0, %v5950_v49  ;;  %v3655_v62 = vpop.f32.mrf.mxu0  ;;  %vm7616_vm1 = vmor %vm3758_vm0, %vm3759_vm15 }
 0x1d1   : > { %1518 = vrot.lane.b32.xlu1 %v7433_v47, %s6165_s29  ;;  %v2339_v47 = vand.u32 2147483647, %v7395_v15  ;;  %v3754_v15 = vmul.f32 %v7521_v37, %v7472_v12  ;;  %v5954_v57 = vpop.eup %5953  ;;  %v2346_v49 = vmul.f32 %v7544_v2, %v7492_v23  ;;  %vm2351_vm2 = vweird.f32 %v7544_v2 }
 0x1d2   : > { %v5956_v58 = vpop.eup %5955  ;;  %5963 = vrcp.f32 %v7546_v46  ;;  %vm7653_vm5 = vmor %vm2350_vm4, %vm2351_vm2  ;;  %vm2380_vm12 = vweird.f32 %v7546_v46 }
 0x1d3   : > { %v7525_v0 = vpop.permute.xlu1 %4107  ;;  %vm2340_vm10 = vcmp.eq.f32.partialorder %v2339_v47, 8.507059e+37  ;;  %v3755_v28 = vsub.f32 1.0, %v3754_v15  ;;  %v7556_v41 = vpop.eup %5957  ;;  %v5540_v47 = vmul.f32 -1.442695, %v7098_v11  ;;  %v7565_v15 = vadd.f32 1.0, %v5956_v58 }
 0x1d4   : > { %v2347_v35 = vsub.f32 1.0, %v2346_v49  ;;  %v3764_v49 = vand.u32 2147483648, %v7472_v12  ;;  %vm2366_vm6 = vweird.f32 %v7556_v41 }
 0x1d5   : > { %2764 = vrot.lane.b32.xlu2 %v2732_v8, %s6164_s30  ;;  %4135 = vrot.lane.b32.xlu0 %v5946_v33, %s6164_s30  ;;  %v7536_v13 = vpop.permute.xlu0 %2688  ;;  %v7548_v33 = vsel %vm2340_vm10, %v2342_v61, %v2338_v19  ;;  %v3306_v8 = vpop.f32.mrf.mxu2  ;;  %5965 = vpow2.f32 %v5540_v47  ;;  %vm7678_vm9 = vmor %vm2365_vm7, %vm2366_vm6 }
 0x1d6   : > { %9225 = vst [vmem:[#allocation60_spill] sm:$0xff] %v7548_v33  ;;  %v2733_v34 = vmul.f32 %v7388_v56, %v7548_v33  ;;  %v3464_v61 = vadd.f32 %v3463_v42, %v3306_v8  ;;  %v5960_v56 = vpop.eup %5959  ;;  %v3756_v8 = vmul.f32 %v7521_v37, %v3755_v28  ;;  %v1232_v42 = vmul.f32 %v6616_v53, %v7044_v55 }
 0x1d7   : > { %v7542_v30 = vpop.permute.xlu2 %4115  ;;  %v3750_v33 = vor.u32 1.1754944e-38, %v3749_v63  ;;  %v5962_v28 = vpop.eup %5961  ;;  %v7589_v45 = vadd.f32 1.0, %v5960_v56  ;;  %5967 = vrcp.f32 %v7565_v15 }
 0x1d8   : > { %v7591_v11 = vadd.f32 %v3655_v62, %v3464_v61  ;;  %v7602_v63 = vpop.eup %5963  ;;  %v2348_v61 = vmul.f32 %v7544_v2, %v2347_v35 }
 0x1d9   : > { %2714 = vrot.lane.b32.xlu1 %v5954_v57, %s6164_s30  ;;  %v3747_v57 = vand.u32 2147483647, %v7428_v51  ;;  %v2361_v51 = vmul.f32 %v7556_v41, %v7511_v14  ;;  %v2376_v35 = vmul.f32 %v7602_v63, %v7546_v46  ;;  %vm2381_vm11 = vweird.f32 %v7602_v63 }
 0x1da   : > { %5969 = vtanh.f32 %v7591_v11 }
 0x1db   : > { %v1347_v19 = vpop.permute.xlu1 %1346  ;;  %vm3748_vm14 = vcmp.eq.f32.partialorder %v3747_v57, 8.507059e+37  ;;  %v2362_v47 = vsub.f32 1.0, %v2361_v51  ;;  %5971 = vpow2.f32 %v5197_v9  ;;  %v3762_v57 = vand.u32 2147483647, %v7472_v12 }
 0x1dc   : > { %5973 = vrcp.f32 %v7589_v45  ;;  %v2349_v51 = vadd.f32 %v7544_v2, %v2348_v61 }
 0x1dd   : > { %1520 = vrot.lane.b32.xlu2 %v1391_v60, %s6165_s29  ;;  %2766 = vrot.lane.b32.xlu0 %v2733_v34, %s6164_s30  ;;  %v3746_v60 = vsel %vm7572_vm13, %v7479_v36, %v3742_v48  ;;  %v1392_v36 = vadd.f32 %v1347_v19, %v1232_v42  ;;  %v3757_v48 = vadd.f32 %v7521_v37, %v3756_v8  ;;  %v5198_v19 = vmul.f32 -1.442695, %v7147_v31  ;;  %vm7721_vm13 = vmor %vm2380_vm12, %vm2381_vm11 }
 0x1de   : > { %v7595_v53 = vsel %vm3748_vm14, %v3750_v33, %v3746_v60  ;;  %v2363_v12 = vmul.f32 %v7556_v41, %v2362_v47  ;;  %v3765_v60 = vor.u32 1.1754944e-38, %v3764_v49  ;;  %v1233_v42 = vmul.f32 %v6643_v3, %v7060_v22 }
 0x1df   : > { %v7582_v58 = vpop.permute.xlu0 %4111  ;;  %v7584_v34 = vpop.permute.xlu2 %1354  ;;  %9228 = vst [vmem:[#allocation61_spill] sm:$0xff] %v7595_v53  ;;  %v4155_v7 = vmul.f32 %v7525_v0, %v7595_v53  ;;  %5975 = vtanh.f32 %v1392_v36  ;;  %v3761_v31 = vsel %vm7616_vm1, %v7521_v37, %v3757_v48  ;;  %vm3763_vm3 = vcmp.eq.f32.partialorder %v3762_v57, 8.507059e+37 }
 0x1e0   : > { %v5966_v0 = vpop.eup %5965  ;;  %5977 = vpow2.f32 %v5198_v19  ;;  %v7642_v47 = vadd.f32 %v7468_v25, %v1233_v42  ;;  %v2354_v3 = vand.u32 2147483647, %v7492_v23  ;;  %v2377_v19 = vsub.f32 1.0, %v2376_v35 }
 0x1e1   : > { %1440 = vrot.lane.b32.xlu1 %v5962_v28, %s6164_s30  ;;  %v7630_v8 = vpop.eup %5967  ;;  %v7636_v28 = vadd.f32 1.0, %v5966_v0  ;;  %v2364_v25 = vadd.f32 %v7556_v41, %v2363_v12  ;;  %v2353_v9 = vsel %vm7653_vm5, %v7544_v2, %v2349_v51  ;;  %v2369_v12 = vand.u32 2147483647, %v7511_v14 }
 0x1e2   : > { %v5970_v37 = vpop.eup %5969  ;;  %vm2355_vm8 = vcmp.eq.f32.partialorder %v2354_v3, 8.507059e+37  ;;  %v2378_v51 = vmul.f32 %v7602_v63, %v2377_v19  ;;  %v5541_v19 = vmul.f32 -1.442695, %v7128_v21  ;;  %vm3773_vm14 = vweird.f32 %v7565_v15 }
 0x1e3   : > { %v7606_v33 = vpop.permute.xlu1 %2690  ;;  %v5972_v48 = vpop.eup %5971  ;;  %5979 = vrcp.f32 %v7636_v28  ;;  %vm2370_vm10 = vcmp.eq.f32.partialorder %v2369_v12, 8.507059e+37  ;;  %vm3774_vm15 = vweird.f32 %v7630_v8  ;;  %vm3803_vm6 = vweird.f32 %v7636_v28 }
 0x1e4   : > { %v7647_v49 = vpop.eup %5973  ;;  %5981 = vtanh.f32 %v7642_v47  ;;  %vm7753_vm1 = vmor %vm3773_vm14, %vm3774_vm15 }
 0x1e5   : > { %4187 = vrot.lane.b32.xlu2 %v4155_v7, %s6164_s30  ;;  %1522 = vrot.lane.b32.xlu0 %v1392_v36, %s6165_s29  ;;  %v2356_v36 = vand.u32 2147483648, %v7492_v23  ;;  %v7639_v7 = vsel %vm3763_vm3, %v3765_v60, %v3761_v31  ;;  %v5976_v0 = vpop.eup %5975  ;;  %v5199_v23 = vmul.f32 -1.442695, %v7168_v1  ;;  %v2371_v31 = vand.u32 2147483648, %v7511_v14 }
 0x1e6   : > { %v4156_v61 = vmul.f32 %v7419_v24, %v7639_v7  ;;  %v3769_v24 = vmul.f32 %v7630_v8, %v7565_v15  ;;  %v7673_v1 = vadd.f32 1.0, %v5972_v48  ;;  %v5978_v42 = vpop.eup %5977  ;;  %v2368_v14 = vsel %vm7678_vm9, %v7556_v41, %v2364_v25 }
 0x1e7   : > { %v7626_v56 = vpop.permute.xlu0 %1350  ;;  %v7628_v62 = vpop.permute.xlu2 %2698  ;;  %v2357_v60 = vor.u32 1.1754944e-38, %v2356_v36  ;;  %v3784_v36 = vmul.f32 %v7647_v49, %v7589_v45  ;;  %5983 = vpow2.f32 %v5199_v23  ;;  %v2386_v41 = vand.u32 2147483648, %v7546_v46 }
 0x1e8   : > { %v3770_v57 = vsub.f32 1.0, %v3769_v24  ;;  %5985 = vrcp.f32 %v7673_v1  ;;  %vm3789_vm2 = vweird.f32 %v7647_v49  ;;  %vm3788_vm3 = vweird.f32 %v7589_v45 }
 0x1e9   : > { %4137 = vrot.lane.b32.xlu1 %v5970_v37, %s6164_s30  ;;  %v7683_v37 = vsel %vm2355_vm8, %v2357_v60, %v2353_v9  ;;  %v7697_v9 = vadd.f32 1.0, %v5978_v42  ;;  %v7704_v60 = vpop.eup %5979  ;;  %v3785_v23 = vsub.f32 1.0, %v3784_v36  ;;  %5987 = vpow2.f32 %v5541_v19  ;;  %vm7780_vm5 = vmor %vm3788_vm3, %vm3789_vm2 }
 0x1ea   : > { %v5982_v24 = vpop.eup %5981  ;;  %v3771_v12 = vmul.f32 %v7630_v8, %v3770_v57  ;;  %v2384_v42 = vand.u32 2147483647, %v7546_v46  ;;  %vm3804_vm7 = vweird.f32 %v7704_v60  ;;  %vm2395_vm12 = vweird.f32 %v7673_v1 }
 0x1eb   : > { %v7666_v35 = vpop.permute.xlu1 %4113  ;;  %5989 = vrcp.f32 %v7697_v9  ;;  %v3786_v36 = vmul.f32 %v7647_v49, %v3785_v23  ;;  %vm7825_vm9 = vmor %vm3803_vm6, %vm3804_vm7  ;;  %vm2410_vm15 = vweird.f32 %v7697_v9 }
 0x1ec   : > { %vm2385_vm0 = vcmp.eq.f32.partialorder %v2384_v42, 8.507059e+37 }
 0x1ed   : > { %1442 = vrot.lane.b32.xlu2 %v5976_v0, %s6164_s30  ;;  %4189 = vrot.lane.b32.xlu0 %v4156_v61, %s6164_s30  ;;  %v2734_v61 = vmul.f32 %v7536_v13, %v7683_v37  ;;  %v2372_v0 = vor.u32 1.1754944e-38, %v2371_v31  ;;  %v2379_v13 = vadd.f32 %v7602_v63, %v2378_v51  ;;  %v5542_v31 = vmul.f32 -1.442695, %v7183_v43  ;;  %v5984_v51 = vpop.eup %5983 }
 0x1ee   : > { %v7738_v19 = vpop.eup %5985 }
 0x1ef   : > { %v7690_v48 = vpop.permute.xlu0 %2694  ;;  %v7692_v3 = vpop.permute.xlu2 %4121  ;;  %v7701_v25 = vsel %vm2370_vm10, %v2372_v0, %v2368_v14  ;;  %v2383_v46 = vsel %vm7721_vm13, %v7602_v63, %v2379_v13  ;;  %v2387_v14 = vor.u32 1.1754944e-38, %v2386_v41  ;;  %5991 = vpow2.f32 %v5542_v31 }
 0x1f0   : > { %v2735_v21 = vmul.f32 %v7606_v33, %v7701_v25  ;;  %v3799_v33 = vmul.f32 %v7704_v60, %v7636_v28  ;;  %v3772_v0 = vadd.f32 %v7630_v8, %v3771_v12  ;;  %v3779_v63 = vand.u32 2147483648, %v7565_v15  ;;  %v5988_v12 = vpop.eup %5987 }
 0x1f1   : > { %2768 = vrot.lane.b32.xlu1 %v2734_v61, %s6164_s30  ;;  %v1234_v41 = vmul.f32 %v6618_v54, %v7089_v29  ;;  %v5543_v13 = vmul.f32 -1.442695, %v7198_v38  ;;  %v7746_v23 = vsel %vm2385_vm0, %v2387_v14, %v2383_v46  ;;  %v3777_v31 = vand.u32 2147483647, %v7565_v15  ;;  %v7760_v43 = vpop.eup %5989 }
 0x1f2   : > { %v3787_v38 = vadd.f32 %v7647_v49, %v3786_v36  ;;  %v3776_v15 = vsel %vm7753_vm1, %v7630_v8, %v3772_v0  ;;  %v3792_v46 = vand.u32 2147483647, %v7589_v45  ;;  %v7775_v8 = vadd.f32 1.0, %v5988_v12 }
 0x1f3   : > { %v7712_v2 = vpop.permute.xlu1 %1352  ;;  %v1394_v54 = vadd.f32 %v7626_v56, %v1234_v41  ;;  %v3780_v56 = vor.u32 1.1754944e-38, %v3779_v63  ;;  %vm3778_vm4 = vcmp.eq.f32.partialorder %v3777_v31, 8.507059e+37  ;;  %v1235_v63 = vmul.f32 %v6647_v6, %v7144_v5 }
 0x1f4   : > { %v3791_v41 = vsel %vm7780_vm5, %v7647_v49, %v3787_v38  ;;  %vm3793_vm8 = vcmp.eq.f32.partialorder %v3792_v46, 8.507059e+37  ;;  %v3807_v46 = vand.u32 2147483647, %v7636_v28  ;;  %vm2396_vm11 = vweird.f32 %v7738_v19 }
 0x1f5   : > { %2770 = vrot.lane.b32.xlu2 %v2735_v21, %s6164_s30  ;;  %1444 = vrot.lane.b32.xlu0 %v5982_v24, %s6164_s30  ;;  %v7740_v21 = vadd.f32 1.0, %v5984_v51  ;;  %v3800_v24 = vsub.f32 1.0, %v3799_v33  ;;  %v2736_v51 = vmul.f32 %v7505_v20, %v7746_v23  ;;  %v2391_v20 = vmul.f32 %v7738_v19, %v7673_v1  ;;  %v5992_v14 = vpop.eup %5991  ;;  %vm7862_vm13 = vmor %vm2395_vm12, %vm2396_vm11 }
 0x1f6   : > { %vm3808_vm10 = vcmp.eq.f32.partialorder %v3807_v46, 8.507059e+37  ;;  %vm2411_vm14 = vweird.f32 %v7760_v43 }
 0x1f7   : > { %v7731_v61 = vpop.permute.xlu0 %4117  ;;  %v7733_v57 = vpop.permute.xlu2 %1360  ;;  %5993 = vrcp.f32 %v7740_v21  ;;  %v3801_v36 = vmul.f32 %v7704_v60, %v3800_v24  ;;  %v2406_v24 = vmul.f32 %v7760_v43, %v7697_v9  ;;  %vm7886_vm1 = vmor %vm2410_vm15, %vm2411_vm14 }
 0x1f8   : > { %5995 = vpow2.f32 %v5543_v13  ;;  %v2392_v13 = vsub.f32 1.0, %v2391_v20 }
 0x1f9   : > { %1524 = vrot.lane.b32.xlu1 %v7642_v47, %s6165_s29  ;;  %v3794_v47 = vand.u32 2147483648, %v7589_v45  ;;  %v7786_v45 = vsel %vm3778_vm4, %v3780_v56, %v3776_v15  ;;  %v7800_v15 = vadd.f32 1.0, %v5992_v14  ;;  %5997 = vrcp.f32 %v7775_v8 }
 0x1fa   : > { %v4157_v42 = vmul.f32 %v7582_v58, %v7786_v45  ;;  %v3802_v49 = vadd.f32 %v7704_v60, %v3801_v36  ;;  %5999 = vtanh.f32 %v1394_v54  ;;  %v2407_v56 = vsub.f32 1.0, %v2406_v24  ;;  %v9244_v24 = vld [vmem:[#allocation2_spill] sm:$0xff] }
 0x1fb   : > { %v7768_v33 = vpop.permute.xlu1 %2696  ;;  %v3795_v6 = vor.u32 1.1754944e-38, %v3794_v47  ;;  %v3809_v47 = vand.u32 2147483648, %v7636_v28  ;;  %v2393_v14 = vmul.f32 %v7738_v19, %v2392_v13  ;;  %vm2425_vm4 = vweird.f32 %v7740_v21 }
 0x1fd   : > { %1526 = vrot.lane.b32.xlu2 %v1394_v54, %s6165_s29  ;;  %2772 = vrot.lane.b32.xlu0 %v2736_v51, %s6164_s30  ;;  %v5200_v51 = vmul.f32 -1.442695, %v7196_v52  ;;  %v7806_v38 = vsel %vm3793_vm8, %v3795_v6, %v3791_v41  ;;  %v1395_v52 = vadd.f32 %v7712_v2, %v1235_v63  ;;  %v7810_v58 = vpop.eup %5993  ;;  %v5201_v2 = vmul.f32 -1.442695, %v7247_v27  ;;  %v9243_v41 = vld [vmem:[#allocation47_spill] sm:$0xff] }
 0x1fe   : > { %v4158_v20 = vmul.f32 %v7666_v35, %v7806_v38  ;;  %v5996_v0 = vpop.eup %5995  ;;  %v3806_v35 = vsel %vm7825_vm9, %v7704_v60, %v3802_v49  ;;  %v2421_v63 = vmul.f32 %v7810_v58, %v7740_v21  ;;  %v3810_v27 = vor.u32 1.1754944e-38, %v3809_v47 }
 0x1ff   : > { %v7793_v31 = vpop.permute.xlu0 %1356  ;;  %v7795_v12 = vpop.permute.xlu2 %2704  ;;  %6001 = vpow2.f32 %v5200_v51  ;;  %v1236_v28 = vmul.f32 %v9244_v24, %v9243_v41  ;;  %v2408_v51 = vmul.f32 %v7760_v43, %v2407_v56  ;;  %v2394_v60 = vadd.f32 %v7738_v19, %v2393_v14 }
 0x200   : > { %6003 = vrcp.f32 %v7800_v15  ;;  %v7843_v13 = vpop.eup %5997  ;;  %v2401_v47 = vand.u32 2147483648, %v7673_v1  ;;  %v2422_v24 = vsub.f32 1.0, %v2421_v63  ;;  %vm2426_vm3 = vweird.f32 %v7810_v58 }
 0x201   : > { %4191 = vrot.lane.b32.xlu1 %v4157_v42, %s6164_s30  ;;  %6005 = vtanh.f32 %v1395_v52  ;;  %v6000_v49 = vpop.eup %5999  ;;  %v7853_v54 = vadd.f32 %v7584_v34, %v1236_v28  ;;  %v3814_v63 = vmul.f32 %v7843_v13, %v7775_v8  ;;  %v5202_v28 = vmul.f32 -1.442695, %v7268_v59  ;;  %vm7925_vm5 = vmor %vm2425_vm4, %vm2426_vm3 }
 0x202   : > { %6007 = vpow2.f32 %v5201_v2  ;;  %vm3819_vm7 = vweird.f32 %v7843_v13  ;;  %vm3818_vm8 = vweird.f32 %v7775_v8  ;;  %vm3833_vm9 = vweird.f32 %v7800_v15 }
 0x203   : > { %v7817_v36 = vpop.permute.xlu1 %4119  ;;  %v3815_v41 = vsub.f32 1.0, %v3814_v63 }
 0x205   : > { %4193 = vrot.lane.b32.xlu2 %v4158_v20, %s6164_s30  ;;  %1528 = vrot.lane.b32.xlu0 %v1395_v52, %s6165_s29  ;;  %v7845_v20 = vadd.f32 1.0, %v5996_v0  ;;  %v7849_v52 = vsel %vm3808_vm10, %v3810_v27, %v3806_v35  ;;  %v6002_v56 = vpop.eup %6001  ;;  %v2399_v0 = vand.u32 2147483647, %v7673_v1  ;;  %v2409_v35 = vadd.f32 %v7760_v43, %v2408_v51  ;;  %vm7961_vm10 = vmor %vm3818_vm8, %vm3819_vm7 }
 0x206   : > { %9245 = vst [vmem:[#allocation2_spill] sm:$0xff] %v7849_v52  ;;  %v7858_v46 = vpop.eup %6003  ;;  %v4159_v14 = vmul.f32 %v7542_v30, %v7849_v52  ;;  %v2398_v1 = vsel %vm7862_vm13, %v7738_v19, %v2394_v60  ;;  %v2416_v30 = vand.u32 2147483648, %v7697_v9  ;;  %v2414_v51 = vand.u32 2147483647, %v7697_v9 }
 0x207   : > { %v7839_v42 = vpop.permute.xlu0 %2700  ;;  %v7841_v6 = vpop.permute.xlu2 %4127  ;;  %6009 = vrcp.f32 %v7845_v20  ;;  %v2423_v19 = vmul.f32 %v7810_v58, %v2422_v24  ;;  %vm2400_vm0 = vcmp.eq.f32.partialorder %v2399_v0, 8.507059e+37  ;;  %v2413_v9 = vsel %vm7886_vm1, %v7760_v43, %v2409_v35 }
 0x208   : > { %v6006_v34 = vpop.eup %6005  ;;  %6011 = vtanh.f32 %v7853_v54  ;;  %v2417_v5 = vor.u32 1.1754944e-38, %v2416_v30  ;;  %vm2415_vm2 = vcmp.eq.f32.partialorder %v2414_v51, 8.507059e+37  ;;  %v5545_v51 = vmul.f32 -1.442695, %v7283_v44 }
 0x209   : > { %1446 = vrot.lane.b32.xlu1 %v6000_v49, %s6164_s30  ;;  %v2402_v49 = vor.u32 1.1754944e-38, %v2401_v47  ;;  %v6008_v59 = vpop.eup %6007  ;;  %v7890_v47 = vadd.f32 1.0, %v6002_v56  ;;  %v9250_v56 = vld [vmem:[#allocation49_spill] sm:$0xff]  ;;  %6013 = vpow2.f32 %v5202_v28  ;;  %v2424_v43 = vadd.f32 %v7810_v58, %v2423_v19 }
 0x20a   : > { %v5544_v52 = vmul.f32 -1.442695, %v9250_v56  ;;  %v7912_v35 = vsel %vm2415_vm2, %v2417_v5, %v2413_v9  ;;  %v2429_v19 = vand.u32 2147483647, %v7740_v21  ;;  %v3816_v5 = vmul.f32 %v7843_v13, %v3815_v41  ;;  %v9255_v9 = vld [vmem:[#allocation3_spill] sm:$0xff] }
 0x20b   : > { %v7875_v27 = vpop.permute.xlu1 %1358  ;;  %v7892_v2 = vsel %vm2400_vm0, %v2402_v49, %v2398_v1  ;;  %v7908_v49 = vadd.f32 1.0, %v6008_v59  ;;  %9251 = vst [vmem:[#allocation49_spill] sm:$0xff] %v7912_v35  ;;  %6015 = vrcp.f32 %v7890_v47  ;;  %v2738_v63 = vmul.f32 %v7768_v33, %v7912_v35 }
 0x20c   : > { %6017 = vpow2.f32 %v5544_v52  ;;  %v2428_v44 = vsel %vm7925_vm5, %v7810_v58, %v2424_v43  ;;  %v9254_v52 = vld [vmem:[#allocation48_spill] sm:$0xff]  ;;  %vm2430_vm6 = vcmp.eq.f32.partialorder %v2429_v19, 8.507059e+37  ;;  %v5546_v59 = vmul.f32 -1.442695, %v7297_v10 }
 0x20d   : > { %1448 = vrot.lane.b32.xlu2 %v6006_v34, %s6164_s30  ;;  %4195 = vrot.lane.b32.xlu0 %v4159_v14, %s6164_s30  ;;  %v3829_v14 = vmul.f32 %v7858_v46, %v7800_v15  ;;  %v2737_v34 = vmul.f32 %v7690_v48, %v7892_v2  ;;  %v7906_v1 = vpop.eup %6009  ;;  %v2431_v48 = vand.u32 2147483648, %v7740_v21  ;;  %6019 = vrcp.f32 %v7908_v49 }
 0x20e   : > { %v6012_v28 = vpop.eup %6011  ;;  %v3844_v33 = vmul.f32 %v7906_v1, %v7845_v20  ;;  %6021 = vpow2.f32 %v5545_v51  ;;  %v3822_v51 = vand.u32 2147483647, %v7775_v8  ;;  %vm3834_vm11 = vweird.f32 %v7858_v46 }
 0x20f   : > { %v7899_v24 = vpop.permute.xlu0 %4123  ;;  %v7901_v0 = vpop.permute.xlu2 %1366  ;;  %v3830_v30 = vsub.f32 1.0, %v3829_v14  ;;  %v2432_v41 = vor.u32 1.1754944e-38, %v2431_v48  ;;  %v1237_v14 = vmul.f32 %v9255_v9, %v9254_v52  ;;  %v3824_v48 = vand.u32 2147483648, %v7775_v8  ;;  %vm7991_vm13 = vmor %vm3833_vm9, %vm3834_vm11 }
 0x210   : > { %v6014_v21 = vpop.eup %6013  ;;  %v3845_v43 = vsub.f32 1.0, %v3844_v33  ;;  %vm3823_vm12 = vcmp.eq.f32.partialorder %v3822_v51, 8.507059e+37  ;;  %vm3849_vm15 = vweird.f32 %v7906_v1  ;;  %vm3848_vm0 = vweird.f32 %v7845_v20 }
 0x211   : > { %2774 = vrot.lane.b32.xlu1 %v2737_v34, %s6164_s30  ;;  %v3831_v34 = vmul.f32 %v7858_v46, %v3830_v30  ;;  %v7948_v58 = vsel %vm2430_vm6, %v2432_v41, %v2428_v44  ;;  %v7952_v30 = vadd.f32 1.0, %v6014_v21  ;;  %v1397_v44 = vadd.f32 %v7793_v31, %v1237_v14  ;;  %v9259_v14 = vld [vmem:[#allocation4_spill] sm:$0xff]  ;;  %vm8034_vm1 = vmor %vm3848_vm0, %vm3849_vm15 }
 0x212   : > { %9256 = vst [vmem:[#allocation3_spill] sm:$0xff] %v7948_v58  ;;  %v3825_v9 = vor.u32 1.1754944e-38, %v3824_v48  ;;  %v3837_v31 = vand.u32 2147483647, %v7800_v15  ;;  %vm2440_vm4 = vweird.f32 %v7890_v47  ;;  %vm2455_vm7 = vweird.f32 %v7908_v49 }
 0x213   : > { %v7923_v60 = vpop.permute.xlu1 %2702  ;;  %v3832_v21 = vadd.f32 %v7858_v46, %v3831_v34  ;;  %v1238_v34 = vmul.f32 %v9259_v14, %v7244_v50  ;;  %6023 = vrcp.f32 %v7952_v30  ;;  %v9262_v14 = vld [vmem:[#allocation53_spill] sm:$0xff] }
 0x214   : > { %6025 = vpow2.f32 %v5546_v59  ;;  %vm3838_vm14 = vcmp.eq.f32.partialorder %v3837_v31, 8.507059e+37 }
 0x215   : > { %2776 = vrot.lane.b32.xlu2 %v2738_v63, %s6164_s30  ;;  %1450 = vrot.lane.b32.xlu0 %v6012_v28, %s6164_s30  ;;  %v3817_v63 = vadd.f32 %v7843_v13, %v3816_v5  ;;  %v7946_v28 = vpop.eup %6015  ;;  %v2739_v5 = vmul.f32 %v7628_v62, %v7948_v58 }
 0x216   : > { %v6018_v19 = vpop.eup %6017  ;;  %v2436_v62 = vmul.f32 %v7946_v28, %v7890_v47  ;;  %vm2441_vm2 = vweird.f32 %v7946_v28 }
 0x217   : > { %v7940_v56 = vpop.permute.xlu0 %1362  ;;  %v7942_v35 = vpop.permute.xlu2 %2710  ;;  %v3821_v8 = vsel %vm7961_vm10, %v7843_v13, %v3817_v63  ;;  %v7983_v33 = vadd.f32 1.0, %v6018_v19  ;;  %v3846_v13 = vmul.f32 %v7906_v1, %v3845_v43  ;;  %v3836_v19 = vsel %vm7991_vm13, %v7858_v46, %v3832_v21  ;;  %vm8069_vm5 = vmor %vm2440_vm4, %vm2441_vm2 }
 0x218   : > { %v7968_v10 = vpop.eup %6019  ;;  %v7995_v48 = vsel %vm3823_vm12, %v3825_v9, %v3821_v8  ;;  %v2437_v59 = vsub.f32 1.0, %v2436_v62  ;;  %v1398_v21 = vadd.f32 %v7875_v27, %v1238_v34  ;;  %v3854_v62 = vand.u32 2147483648, %v7845_v20  ;;  %v9267_v34 = vld [vmem:[#allocation5_spill] sm:$0xff] }
 0x219   : > { %1530 = vrot.lane.b32.xlu1 %v7853_v54, %s6165_s29  ;;  %v3839_v54 = vand.u32 2147483648, %v7800_v15  ;;  %v6022_v58 = vpop.eup %6021  ;;  %v5203_v15 = vmul.f32 -1.442695, %v9262_v14  ;;  %v4160_v50 = vmul.f32 %v7731_v61, %v7995_v48  ;;  %6027 = vrcp.f32 %v7983_v33 }
 0x21a   : > { %v8009_v8 = vadd.f32 1.0, %v6022_v58  ;;  %v3847_v9 = vadd.f32 %v7906_v1, %v3846_v13  ;;  %6029 = vtanh.f32 %v1397_v44  ;;  %v8020_v58 = vpop.eup %6023  ;;  %v2438_v31 = vmul.f32 %v7946_v28, %v2437_v59 }
 0x21b   : > { %v7976_v41 = vpop.permute.xlu1 %4125  ;;  %v3840_v52 = vor.u32 1.1754944e-38, %v3839_v54  ;;  %6031 = vpow2.f32 %v5203_v15  ;;  %v6026_v63 = vpop.eup %6025  ;;  %v3852_v27 = vand.u32 2147483647, %v7845_v20  ;;  %v2466_v20 = vmul.f32 %v8020_v58, %v7952_v30 }
 0x21c   : > { %6033 = vrcp.f32 %v8009_v8  ;;  %v8052_v59 = vadd.f32 1.0, %v6026_v63  ;;  %v2444_v63 = vand.u32 2147483647, %v7890_v47  ;;  %vm2456_vm6 = vweird.f32 %v7968_v10 }
 0x21d   : > { %1532 = vrot.lane.b32.xlu2 %v1397_v44, %s6165_s29  ;;  %2778 = vrot.lane.b32.xlu0 %v2739_v5, %s6164_s30  ;;  %v2451_v5 = vmul.f32 %v7968_v10, %v7908_v49  ;;  %v8013_v46 = vsel %vm3838_vm14, %v3840_v52, %v3836_v19  ;;  %6035 = vtanh.f32 %v1398_v21  ;;  %v3851_v44 = vsel %vm8034_vm1, %v7906_v1, %v3847_v9  ;;  %vm8094_vm9 = vmor %vm2455_vm7, %vm2456_vm6 }
 0x21e   : > { %9263 = vst [vmem:[#allocation4_spill] sm:$0xff] %v8013_v46  ;;  %v4161_v61 = vmul.f32 %v7817_v36, %v8013_v46  ;;  %vm3853_vm3 = vcmp.eq.f32.partialorder %v3852_v27, 8.507059e+37  ;;  %v2446_v9 = vand.u32 2147483648, %v7890_v47  ;;  %vm2445_vm8 = vcmp.eq.f32.partialorder %v2444_v63, 8.507059e+37 }
 0x21f   : > { %v8002_v43 = vpop.permute.xlu0 %2706  ;;  %v8004_v51 = vpop.permute.xlu2 %4133  ;;  %v2452_v54 = vsub.f32 1.0, %v2451_v5  ;;  %vm2471_vm11 = vweird.f32 %v8020_v58  ;;  %vm2470_vm12 = vweird.f32 %v7952_v30  ;;  %vm1566_vm13 = vcmask 261120  }
 0x220   : > { %v8050_v15 = vpop.eup %6027  ;;  %vm8143_vm14 = vmor %vm2470_vm12, %vm2471_vm11  ;;  %vm3863_vm15 = vweird.f32 %v7983_v33  ;;  %vm3878_vm4 = vweird.f32 %v8009_v8 }
 0x221   : > { %4197 = vrot.lane.b32.xlu1 %v4160_v50, %s6164_s30  ;;  %v5204_v50 = vmul.f32 -1.442695, %v7354_v17  ;;  %v9266_v17 = vld [vmem:[#allocation51_spill] sm:$0xff]  ;;  %v2453_v19 = vmul.f32 %v7968_v10, %v2452_v54  ;;  %v6030_v1 = vpop.eup %6029  ;;  %vm3864_vm0 = vweird.f32 %v8050_v15 }
 0x222   : > { %v1239_v13 = vmul.f32 %v9267_v34, %v9266_v17  ;;  %v6032_v36 = vpop.eup %6031  ;;  %vm8174_vm2 = vmor %vm3863_vm15, %vm3864_vm0 }
 0x223   : > { %v8024_v52 = vpop.permute.xlu1 %1364  ;;  %6037 = vpow2.f32 %v5204_v50  ;;  %v2467_v50 = vsub.f32 1.0, %v2466_v20  ;;  %v8089_v27 = vadd.f32 1.0, %v6032_v36 }
 0x224   : > { %v8060_v34 = vadd.f32 %v7733_v57, %v1239_v13  ;;  %6039 = vrcp.f32 %v8052_v59  ;;  %v3859_v13 = vmul.f32 %v8050_v15, %v7983_v33 }
 0x225   : > { %4199 = vrot.lane.b32.xlu2 %v4161_v61, %s6164_s30  ;;  %1534 = vrot.lane.b32.xlu0 %v1398_v21, %s6165_s29  ;;  %v3855_v21 = vor.u32 1.1754944e-38, %v3854_v62  ;;  %v2439_v61 = vadd.f32 %v7946_v28, %v2438_v31  ;;  %v8065_v62 = vpop.eup %6033 }
 0x226   : > { %v6036_v57 = vpop.eup %6035  ;;  %6041 = vtanh.f32 %v8060_v34  ;;  %v3874_v36 = vmul.f32 %v8065_v62, %v8009_v8  ;;  %v3860_v46 = vsub.f32 1.0, %v3859_v13 }
 0x227   : > { %v8046_v5 = vpop.permute.xlu0 %4129  ;;  %v8048_v14 = vpop.permute.xlu2 %1372  ;;  %v8057_v54 = vsel %vm3853_vm3, %v3855_v21, %v3851_v44  ;;  %v2454_v44 = vadd.f32 %v7968_v10, %v2453_v19  ;;  %v2443_v47 = vsel %vm8069_vm5, %v7946_v28, %v2439_v61  ;;  %v5205_v21 = vmul.f32 -1.442695, %v7374_v39 }
 0x228   : > { %9268 = vst [vmem:[#allocation53_spill] sm:$0xff] %v8057_v54  ;;  %v4162_v31 = vmul.f32 %v7692_v3, %v8057_v54  ;;  %v2461_v3 = vand.u32 2147483648, %v7908_v49  ;;  %v2459_v19 = vand.u32 2147483647, %v7908_v49  ;;  %v2468_v61 = vmul.f32 %v8020_v58, %v2467_v50 }
 0x229   : > { %1452 = vrot.lane.b32.xlu1 %v6030_v1, %s6164_s30  ;;  %v2447_v1 = vor.u32 1.1754944e-38, %v2446_v9  ;;  %v6038_v39 = vpop.eup %6037  ;;  %v2458_v49 = vsel %vm8094_vm9, %v7968_v10, %v2454_v44  ;;  %6043 = vpow2.f32 %v5205_v21  ;;  %v2476_v44 = vand.u32 2147483648, %v7952_v30 }
 0x22a   : > { %v2462_v50 = vor.u32 1.1754944e-38, %v2461_v3  ;;  %vm2460_vm10 = vcmp.eq.f32.partialorder %v2459_v19, 8.507059e+37  ;;  %6045 = vrcp.f32 %v8089_v27  ;;  %v8116_v10 = vadd.f32 1.0, %v6038_v39 }
 0x22b   : > { %v8082_v20 = vpop.permute.xlu1 %2708  ;;  %v8099_v9 = vsel %vm2445_vm8, %v2447_v1, %v2443_v47  ;;  %v8113_v47 = vpop.eup %6039  ;;  %v2469_v28 = vadd.f32 %v8020_v58, %v2468_v61  ;;  %v3875_v13 = vsub.f32 1.0, %v3874_v36  ;;  %v5548_v21 = vmul.f32 -1.442695, %v7391_v16 }
 0x22c   : > { %v2740_v54 = vmul.f32 %v7839_v42, %v8099_v9  ;;  %v8119_v1 = vsel %vm2460_vm10, %v2462_v50, %v2458_v49  ;;  %v6042_v3 = vpop.eup %6041  ;;  %v3861_v19 = vmul.f32 %v8050_v15, %v3860_v46  ;;  %vm3879_vm3 = vweird.f32 %v8065_v62 }
 0x22d   : > { %1454 = vrot.lane.b32.xlu2 %v6036_v57, %s6164_s30  ;;  %4201 = vrot.lane.b32.xlu0 %v4162_v31, %s6164_s30  ;;  %v9273_v57 = vld [vmem:[#allocation54_spill] sm:$0xff]  ;;  %9274 = vst [vmem:[#allocation5_spill] sm:$0xff] %v8119_v1  ;;  %v2741_v42 = vmul.f32 %v7923_v60, %v8119_v1  ;;  %v3889_v60 = vmul.f32 %v8113_v47, %v8052_v59  ;;  %vm8202_vm6 = vmor %vm3878_vm4, %vm3879_vm3  ;;  %vm3893_vm8 = vweird.f32 %v8052_v59  ;;  %vm3894_vm9 = vweird.f32 %v8113_v47 }
 0x22e   : > { %v5547_v17 = vmul.f32 -1.442695, %v9273_v57  ;;  %v2473_v46 = vsel %vm8143_vm14, %v8020_v58, %v2469_v28  ;;  %v3876_v61 = vmul.f32 %v8065_v62, %v3875_v13  ;;  %v3862_v50 = vadd.f32 %v8050_v15, %v3861_v19  ;;  %v9278_v28 = vld [vmem:[#allocation6_spill] sm:$0xff]  ;;  %vm8248_vm10 = vmor %vm3893_vm8, %vm3894_vm9 }
 0x22f   : > { %v8106_v31 = vpop.permute.xlu0 %1368  ;;  %v8108_v63 = vpop.permute.xlu2 %2764  ;;  %v3869_v58 = vand.u32 2147483648, %v7983_v33  ;;  %v3867_v19 = vand.u32 2147483647, %v7983_v33  ;;  %v5549_v33 = vmul.f32 -1.442695, %v7409_v4  ;;  %vm2485_vm14 = vweird.f32 %v8089_v27 }
 0x230   : > { %6047 = vpow2.f32 %v5547_v17  ;;  %v2477_v17 = vor.u32 1.1754944e-38, %v2476_v44  ;;  %v9277_v44 = vld [vmem:[#allocation52_spill] sm:$0xff] }
 0x231   : > { %2780 = vrot.lane.b32.xlu1 %v2740_v54, %s6164_s30  ;;  %v2474_v54 = vand.u32 2147483647, %v7952_v30  ;;  %6049 = vrcp.f32 %v8116_v10  ;;  %v6044_v30 = vpop.eup %6043  ;;  %vm3868_vm5 = vcmp.eq.f32.partialorder %v3867_v19, 8.507059e+37 }
 0x232   : > { %v8155_v57 = vpop.eup %6045  ;;  %6051 = vpow2.f32 %v5548_v21  ;;  %v3890_v21 = vsub.f32 1.0, %v3889_v60 }
 0x233   : > { %v8128_v39 = vpop.permute.xlu1 %4131  ;;  %vm2475_vm1 = vcmp.eq.f32.partialorder %v2474_v54, 8.507059e+37  ;;  %v2481_v60 = vmul.f32 %v8155_v57, %v8089_v27  ;;  %vm2486_vm11 = vweird.f32 %v8155_v57 }
 0x234   : > { %v8167_v16 = vsel %vm2475_vm1, %v2477_v17, %v2473_v46  ;;  %vm8284_vm15 = vmor %vm2485_vm14, %vm2486_vm11  ;;  %vm2500_vm1 = vweird.f32 %v8116_v10 }
 0x235   : > { %2782 = vrot.lane.b32.xlu2 %v2741_v42, %s6164_s30  ;;  %1456 = vrot.lane.b32.xlu0 %v6042_v3, %s6164_s30  ;;  %v1240_v42 = vmul.f32 %v9278_v28, %v9277_v44  ;;  %v8165_v3 = vadd.f32 1.0, %v6044_v30  ;;  %9279 = vst [vmem:[#allocation54_spill] sm:$0xff] %v8167_v16  ;;  %v3877_v30 = vadd.f32 %v8065_v62, %v3876_v61  ;;  %v3870_v61 = vor.u32 1.1754944e-38, %v3869_v58  ;;  %v9284_v58 = vld [vmem:[#allocation55_spill] sm:$0xff] }
 0x236   : > { %v6048_v13 = vpop.eup %6047 }
 0x237   : > { %v8153_v49 = vpop.permute.xlu0 %2712  ;;  %v1521_v36 = vpop.permute.xlu2 %1520  ;;  %v1400_v28 = vadd.f32 %v7940_v56, %v1240_v42  ;;  %v8192_v56 = vadd.f32 1.0, %v6048_v13  ;;  %v3882_v42 = vand.u32 2147483647, %v8009_v8  ;;  %6053 = vrcp.f32 %v8165_v3  ;;  %v9285_v13 = vld [vmem:[#allocation7_spill] sm:$0xff] }
 0x238   : > { %1568 = vst.msk [vmem:[%s8138_s17 + $0x8] sm:$0xff] %vm1566_vm13, %v1521_v36  ;;  %v2742_v36 = vmul.f32 %v7795_v12, %v8167_v16  ;;  %v8181_v46 = vpop.eup %6049  ;;  %v3884_v12 = vand.u32 2147483648, %v8009_v8  ;;  %v1241_v54 = vmul.f32 %v9285_v13, %v9284_v58  ;;  %v3891_v8 = vmul.f32 %v8113_v47, %v3890_v21 }
 0x239   : > { %1536 = vrot.lane.b32.xlu1 %v8060_v34, %s6165_s29  ;;  %v3866_v34 = vsel %vm8174_vm2, %v8050_v15, %v3862_v50  ;;  %v6052_v4 = vpop.eup %6051  ;;  %v5206_v15 = vmul.f32 -1.442695, %v7404_v18  ;;  %v2496_v18 = vmul.f32 %v8181_v46, %v8116_v10  ;;  %6055 = vpow2.f32 %v5549_v33  ;;  %v9289_v50 = vld [vmem:[#allocation8_spill] sm:$0xff] }
 0x23a   : > { %v8209_v16 = vsel %vm3868_vm5, %v3870_v61, %v3866_v34  ;;  %v3885_v13 = vor.u32 1.1754944e-38, %v3884_v12  ;;  %v2482_v58 = vsub.f32 1.0, %v2481_v60  ;;  %6057 = vrcp.f32 %v8192_v56 }
 0x23b   : > { %v8190_v17 = vpop.permute.xlu1 %1370  ;;  %v4163_v1 = vmul.f32 %v7899_v24, %v8209_v16  ;;  %v8223_v21 = vadd.f32 1.0, %v6052_v4  ;;  %vm3883_vm7 = vcmp.eq.f32.partialorder %v3882_v42, 8.507059e+37  ;;  %v3892_v24 = vadd.f32 %v8113_v47, %v3891_v8 }
 0x23c   : > { %6059 = vtanh.f32 %v1400_v28  ;;  %v2497_v34 = vsub.f32 1.0, %v2496_v18  ;;  %v3899_v60 = vand.u32 2147483648, %v8052_v59  ;;  %v2483_v61 = vmul.f32 %v8155_v57, %v2482_v58 }
 0x23d   : > { %1538 = vrot.lane.b32.xlu2 %v1400_v28, %s6165_s29  ;;  %2784 = vrot.lane.b32.xlu0 %v2742_v36, %s6164_s30  ;;  %v3881_v36 = vsel %vm8202_vm6, %v8065_v62, %v3877_v30  ;;  %v1401_v30 = vadd.f32 %v8024_v52, %v1241_v54  ;;  %v8234_v12 = vpop.eup %6053  ;;  %6061 = vpow2.f32 %v5206_v15  ;;  %v3897_v52 = vand.u32 2147483647, %v8052_v59  ;;  %v9288_v15 = vld [vmem:[#allocation56_spill] sm:$0xff] }
 0x23e   : > { %v8227_v62 = vsel %vm3883_vm7, %v3885_v13, %v3881_v36  ;;  %6063 = vrcp.f32 %v8223_v21  ;;  %v3896_v4 = vsel %vm8248_vm10, %v8113_v47, %v3892_v24  ;;  %v1242_v58 = vmul.f32 %v9289_v50, %v9288_v15 }
 0x23f   : > { %v8216_v19 = vpop.permute.xlu2 %4187  ;;  %v8218_v44 = vpop.permute.xlu0 %1438  ;;  %v4164_v33 = vmul.f32 %v7976_v41, %v8227_v62  ;;  %6065 = vtanh.f32 %v1401_v30  ;;  %v2511_v54 = vmul.f32 %v8234_v12, %v8165_v3  ;;  %v2498_v8 = vmul.f32 %v8181_v46, %v2497_v34 }
 0x240   : > { %v6056_v41 = vpop.eup %6055  ;;  %v5207_v18 = vmul.f32 -1.442695, %v7500_v40  ;;  %v3900_v13 = vor.u32 1.1754944e-38, %v3899_v60  ;;  %vm3898_vm12 = vcmp.eq.f32.partialorder %v3897_v52, 8.507059e+37  ;;  %v8275_v34 = vadd.f32 %v7901_v0, %v1242_v58 }
 0x241   : > { %4203 = vrot.lane.b32.xlu1 %v4163_v1, %s6164_s30  ;;  %v8252_v28 = vpop.eup %6057  ;;  %v8269_v24 = vadd.f32 1.0, %v6056_v41  ;;  %v2489_v40 = vand.u32 2147483647, %v8089_v27  ;;  %v2512_v52 = vsub.f32 1.0, %v2511_v54  ;;  %vm2501_vm0 = vweird.f32 %v8181_v46 }
 0x242   : > { %v6060_v47 = vpop.eup %6059  ;;  %v8272_v1 = vsel %vm3898_vm12, %v3900_v13, %v3896_v4  ;;  %v2499_v4 = vadd.f32 %v8181_v46, %v2498_v8  ;;  %6067 = vpow2.f32 %v5207_v18  ;;  %v3904_v50 = vmul.f32 %v8252_v28, %v8192_v56  ;;  %vm2502_vm3 = vmor %vm2500_vm1, %vm2501_vm0 }
 0x243   : > { %v1519_v42 = vpop.permute.xlu1 %1518  ;;  %6069 = vrcp.f32 %v8269_v24  ;;  %v2504_v8 = vand.u32 2147483647, %v8116_v10  ;;  %vm2490_vm2 = vcmp.eq.f32.partialorder %v2489_v40, 8.507059e+37  ;;  %vm2516_vm5 = vweird.f32 %v8234_v12 }
 0x244   : > { %1567 = vst.msk [vmem:[%s8138_s17] sm:$0xff] %vm1566_vm13, %v1519_v42  ;;  %v6062_v42 = vpop.eup %6061  ;;  %6071 = vtanh.f32 %v8275_v34  ;;  %v3905_v40 = vsub.f32 1.0, %v3904_v50  ;;  %v2521_v50 = vand.u32 2147483648, %v8165_v3  ;;  %vm2515_vm6 = vweird.f32 %v8165_v3 }
 0x245   : > { %4205 = vrot.lane.b32.xlu2 %v4164_v33, %s6164_s30  ;;  %1540 = vrot.lane.b32.xlu0 %v1401_v30, %s6165_s29  ;;  %v2484_v30 = vadd.f32 %v8155_v57, %v2483_v61  ;;  %v2491_v33 = vand.u32 2147483648, %v8089_v27  ;;  %v8280_v60 = vpop.eup %6063  ;;  %v4165_v61 = vmul.f32 %v7841_v6, %v8272_v1  ;;  %v2506_v6 = vand.u32 2147483648, %v8116_v10  ;;  %vm8338_vm7 = vmor %vm2515_vm6, %vm2516_vm5 }
 0x246   : > { %v6066_v0 = vpop.eup %6065  ;;  %v8303_v18 = vadd.f32 1.0, %v6062_v42  ;;  %v3919_v10 = vmul.f32 %v8280_v60, %v8223_v21  ;;  %vm2505_vm4 = vcmp.eq.f32.partialorder %v2504_v8, 8.507059e+37  ;;  %v2519_v8 = vand.u32 2147483647, %v8165_v3 }
 0x247   : > { %v8262_v59 = vpop.permute.xlu2 %1442  ;;  %v8264_v36 = vpop.permute.xlu0 %4135  ;;  %v2488_v27 = vsel %vm8284_vm15, %v8155_v57, %v2484_v30  ;;  %v2492_v54 = vor.u32 1.1754944e-38, %v2491_v33  ;;  %v2513_v57 = vmul.f32 %v8234_v12, %v2512_v52  ;;  %v2503_v30 = vsel %vm2502_vm3, %v8181_v46, %v2499_v4 }
 0x248   : > { %v6068_v41 = vpop.eup %6067  ;;  %6073 = vrcp.f32 %v8303_v18  ;;  %v2522_v15 = vor.u32 1.1754944e-38, %v2521_v50  ;;  %vm3909_vm8 = vweird.f32 %v8252_v28  ;;  %vm2520_vm9 = vcmp.eq.f32.partialorder %v2519_v8, 8.507059e+37 }
 0x249   : > { %1458 = vrot.lane.b32.xlu1 %v6060_v47, %s6164_s30  ;;  %v8309_v13 = vsel %vm2490_vm2, %v2492_v54, %v2488_v27  ;;  %v8324_v46 = vpop.eup %6069  ;;  %v2514_v4 = vadd.f32 %v8234_v12, %v2513_v57  ;;  %vm3908_vm10 = vweird.f32 %v8192_v56  ;;  %v3912_v50 = vand.u32 2147483647, %v8192_v56 }
 0x24a   : > { %v2743_v42 = vmul.f32 %v8002_v43, %v8309_v13  ;;  %v3920_v43 = vsub.f32 1.0, %v3919_v10  ;;  %v6072_v27 = vpop.eup %6071  ;;  %v5550_v10 = vmul.f32 -1.442695, %v7474_v32  ;;  %v3914_v32 = vand.u32 2147483648, %v8192_v56  ;;  %vm8372_vm12 = vmor %vm3908_vm10, %vm3909_vm8 }
 0x24b   : > { %v8296_v58 = vpop.permute.xlu1 %2714  ;;  %v2518_v3 = vsel %vm8338_vm7, %v8234_v12, %v2514_v4  ;;  %v9295_v12 = vld [vmem:[#allocation57_spill] sm:$0xff]  ;;  %vm3923_vm11 = vweird.f32 %v8223_v21  ;;  %vm3924_vm14 = vweird.f32 %v8280_v60  ;;  %vm3913_vm15 = vcmp.eq.f32.partialorder %v3912_v50, 8.507059e+37 }
 0x24c   : > { %6075 = vpow2.f32 %v5550_v10  ;;  %vm3925_vm0 = vmor %vm3923_vm11, %vm3924_vm14  ;;  %vm3939_vm2 = vweird.f32 %v8324_v46  ;;  %v3944_v8 = vand.u32 2147483648, %v8269_v24  ;;  %vm3938_vm3 = vweird.f32 %v8269_v24 }
 0x24d   : > { %1460 = vrot.lane.b32.xlu2 %v6066_v0, %s6164_s30  ;;  %4207 = vrot.lane.b32.xlu0 %v4165_v61, %s6164_s30  ;;  %v2507_v61 = vor.u32 1.1754944e-38, %v2506_v6  ;;  %v3906_v6 = vmul.f32 %v8252_v28, %v3905_v40  ;;  %vm2530_vm7 = vweird.f32 %v8303_v18 }
 0x24f   : > { %v8314_v47 = vpop.permute.xlu2 %2770  ;;  %v8316_v33 = vpop.permute.xlu0 %2766  ;;  %v8321_v52 = vsel %vm2505_vm4, %v2507_v61, %v2503_v30  ;;  %v8344_v30 = vadd.f32 1.0, %v6068_v41  ;;  %v9296_v41 = vld [vmem:[#allocation9_spill] sm:$0xff]  ;;  %vm8423_vm4 = vmor %vm3938_vm3, %vm3939_vm2 }
 0x250   : > { %9292 = vst [vmem:[#allocation6_spill] sm:$0xff] %v8321_v52  ;;  %v2744_v0 = vmul.f32 %v8082_v20, %v8321_v52  ;;  %v3934_v20 = vmul.f32 %v8324_v46, %v8269_v24  ;;  %v3907_v52 = vadd.f32 %v8252_v28, %v3906_v6  ;;  %v1243_v4 = vmul.f32 %v9296_v41, %v9295_v12 }
 0x251   : > { %2786 = vrot.lane.b32.xlu1 %v2743_v42, %s6164_s30  ;;  %v3921_v42 = vmul.f32 %v8280_v60, %v3920_v43  ;;  %v8364_v43 = vsel %vm2520_vm9, %v2522_v15, %v2518_v3  ;;  %v3915_v3 = vor.u32 1.1754944e-38, %v3914_v32  ;;  %6077 = vrcp.f32 %v8344_v30 }
 0x252   : > { %v2745_v6 = vmul.f32 %v7942_v35, %v8364_v43  ;;  %v1403_v57 = vadd.f32 %v8106_v31, %v1243_v4  ;;  %v3911_v56 = vsel %vm8372_vm12, %v8252_v28, %v3907_v52  ;;  %v9299_v4 = vld [vmem:[#allocation10_spill] sm:$0xff]  ;;  %vm2545_vm11 = vweird.f32 %v8344_v30 }
 0x253   : > { %v8332_v54 = vpop.permute.xlu1 %1440  ;;  %v3922_v15 = vadd.f32 %v8280_v60, %v3921_v42  ;;  %v8394_v28 = vsel %vm3913_vm15, %v3915_v3, %v3911_v56 }
 0x255   : > { %2788 = vrot.lane.b32.xlu2 %v2744_v0, %s6164_s30  ;;  %1462 = vrot.lane.b32.xlu0 %v6072_v27, %s6164_s30  ;;  %v8351_v0 = vpop.eup %6073  ;;  %v5551_v27 = vmul.f32 -1.442695, %v7591_v11  ;;  %v3935_v11 = vsub.f32 1.0, %v3934_v20  ;;  %v3929_v20 = vand.u32 2147483648, %v8223_v21  ;;  %v3926_v52 = vsel %vm3925_vm0, %v8280_v60, %v3922_v15 }
 0x256   : > { %v6076_v60 = vpop.eup %6075  ;;  %vm2531_vm5 = vweird.f32 %v8351_v0 }
 0x257   : > { %v1527_v40 = vpop.permute.xlu2 %1526  ;;  %v1523_v61 = vpop.permute.xlu0 %1522  ;;  %6079 = vpow2.f32 %v5551_v27  ;;  %v3936_v31 = vmul.f32 %v8324_v46, %v3935_v11  ;;  %v3930_v32 = vor.u32 1.1754944e-38, %v3929_v20  ;;  %v3942_v20 = vand.u32 2147483647, %v8269_v24  ;;  %vm2532_vm8 = vmor %vm2530_vm7, %vm2531_vm5 }
 0x258   : > { %1571 = vst.msk [vmem:[%s8138_s17 + $0x20] sm:$0xff] %vm1566_vm13, %v1527_v40  ;;  %v3927_v40 = vand.u32 2147483647, %v8223_v21  ;;  %v1244_v21 = vmul.f32 %v9299_v4, %v7463_v26  ;;  %6081 = vtanh.f32 %v1403_v57 }
 0x259   : > { %1569 = vst.msk [vmem:[%s8138_s17 + $0x10] sm:$0xff] %vm1566_vm13, %v1523_v61  ;;  %1542 = vrot.lane.b32.xlu1 %v8275_v34, %s6165_s29  ;;  %v2526_v34 = vmul.f32 %v8351_v0, %v8303_v18  ;;  %v4166_v61 = vmul.f32 %v8046_v5, %v8394_v28  ;;  %v3937_v50 = vadd.f32 %v8324_v46, %v3936_v31  ;;  %v3945_v31 = vor.u32 1.1754944e-38, %v3944_v8 }
 0x25a   : > { %vm3928_vm1 = vcmp.eq.f32.partialorder %v3927_v40, 8.507059e+37  ;;  %v1404_v11 = vadd.f32 %v8190_v17, %v1244_v21  ;;  %vm3943_vm6 = vcmp.eq.f32.partialorder %v3942_v20, 8.507059e+37 }
 0x25b   : > { %v8385_v35 = vpop.permute.xlu1 %4137  ;;  %v2527_v41 = vsub.f32 1.0, %v2526_v34  ;;  %v8405_v27 = vsel %vm3928_vm1, %v3930_v32, %v3926_v52  ;;  %v3941_v34 = vsel %vm8423_vm4, %v8324_v46, %v3937_v50  ;;  %v9302_v52 = vld [vmem:[#allocation58_spill] sm:$0xff]  ;;  %v2536_v46 = vand.u32 2147483648, %v8303_v18 }
 0x25c   : > { %v4167_v5 = vmul.f32 %v8128_v39, %v8405_v27  ;;  %6083 = vtanh.f32 %v1404_v11  ;;  %v8427_v39 = vadd.f32 1.0, %v6076_v60  ;;  %v2534_v50 = vand.u32 2147483647, %v8303_v18 }
 0x25d   : > { %1544 = vrot.lane.b32.xlu2 %v1403_v57, %s6165_s29  ;;  %2790 = vrot.lane.b32.xlu0 %v2745_v6, %s6164_s30  ;;  %v8413_v6 = vpop.eup %6077  ;;  %v2528_v15 = vmul.f32 %v8351_v0, %v2527_v41 }
 0x25e   : > { %v6080_v17 = vpop.eup %6079  ;;  %v2541_v3 = vmul.f32 %v8413_v6, %v8344_v30  ;;  %6085 = vrcp.f32 %v8427_v39  ;;  %vm2535_vm9 = vcmp.eq.f32.partialorder %v2534_v50, 8.507059e+37  ;;  %vm2546_vm10 = vweird.f32 %v8413_v6 }
 0x25f   : > { %v8397_v10 = vpop.permute.xlu2 %4193  ;;  %v8399_v42 = vpop.permute.xlu0 %4189  ;;  %v2529_v41 = vadd.f32 %v8351_v0, %v2528_v15  ;;  %v8442_v21 = vadd.f32 1.0, %v6080_v17  ;;  %vm2547_vm12 = vmor %vm2545_vm11, %vm2546_vm10  ;;  %vm3953_vm15 = vweird.f32 %v8427_v39 }
 0x260   : > { %v6082_v4 = vpop.eup %6081  ;;  %v2542_v8 = vsub.f32 1.0, %v2541_v3  ;;  %v9305_v3 = vld [vmem:[#allocation14_spill] sm:$0xff] }
 0x261   : > { %4209 = vrot.lane.b32.xlu1 %v4166_v61, %s6164_s30  ;;  %v9303_v61 = vld [vmem:[#allocation11_spill] sm:$0xff]  ;;  %v2533_v17 = vsel %vm2532_vm8, %v8351_v0, %v2529_v41  ;;  %6087 = vrcp.f32 %v8442_v21  ;;  %vm3968_vm2 = vweird.f32 %v8442_v21 }
 0x262   : > { %v1245_v32 = vmul.f32 %v9303_v61, %v9302_v52  ;;  %v6084_v15 = vpop.eup %6083  ;;  %v9304_v0 = vld [vmem:[#allocation59_spill] sm:$0xff] }
 0x263   : > { %v8417_v56 = vpop.permute.xlu1 %2768 }
 0x264   : > { %v1405_v60 = vadd.f32 %v8048_v14, %v1245_v32  ;;  %v2537_v14 = vor.u32 1.1754944e-38, %v2536_v46  ;;  %v8471_v32 = vpop.eup %6085  ;;  %v9306_v46 = vld [vmem:[#allocation42_spill] sm:$0xff] }
 0x265   : > { %4211 = vrot.lane.b32.xlu2 %v4167_v5, %s6164_s30  ;;  %1546 = vrot.lane.b32.xlu0 %v1404_v11, %s6165_s29  ;;  %v8445_v11 = vsel %vm3943_vm6, %v3945_v31, %v3941_v34  ;;  %v2652_v31 = vmul.f32 %v9305_v3, %v9304_v0  ;;  %v1486_v50 = vmul.f32 %v8218_v44, %v9306_v46  ;;  %vm3954_vm0 = vweird.f32 %v8471_v32 }
 0x266   : > { %v4168_v5 = vmul.f32 %v8004_v51, %v8445_v11  ;;  %6089 = vtanh.f32 %v1405_v60  ;;  %v8460_v18 = vsel %vm2535_vm9, %v2537_v14, %v2533_v17  ;;  %v2543_v51 = vmul.f32 %v8413_v6, %v2542_v8  ;;  %vm8519_vm1 = vmor %vm3953_vm15, %vm3954_vm0 }
 0x267   : > { %v8434_v40 = vpop.permute.xlu2 %1448  ;;  %v8436_v24 = vpop.permute.xlu0 %1444  ;;  %v2746_v61 = vmul.f32 %v8153_v49, %v8460_v18  ;;  %v2812_v41 = vadd.f32 %v8108_v63, %v2652_v31  ;;  %v2551_v49 = vand.u32 2147483648, %v8344_v30  ;;  %v2549_v63 = vand.u32 2147483647, %v8344_v30 }
 0x269   : > { %1464 = vrot.lane.b32.xlu1 %v6082_v4, %s6164_s30  ;;  %v8475_v4 = vpop.eup %6087  ;;  %6091 = vtanh.f32 %v2812_v41  ;;  %v2552_v31 = vor.u32 1.1754944e-38, %v2551_v49  ;;  %vm2550_vm14 = vcmp.eq.f32.partialorder %v2549_v63, 8.507059e+37  ;;  %v9307_v49 = vld [vmem:[#allocation32_spill] sm:$0xff] }
 0x26a   : > { %v4075_v63 = vmul.f32 %v9307_v49, %v7595_v53  ;;  %vm3969_vm3 = vweird.f32 %v8475_v4 }
 0x26b   : > { %v1525_v20 = vpop.permute.xlu1 %1524  ;;  %vm3970_vm5 = vmor %vm3968_vm2, %vm3969_vm3 }
 0x26c   : > { %1570 = vst.msk [vmem:[%s8138_s17 + $0x18] sm:$0xff] %vm1566_vm13, %v1525_v20  ;;  %v6090_v8 = vpop.eup %6089  ;;  %v3964_v20 = vmul.f32 %v8475_v4, %v8442_v21 }
 0x26d   : > { %1466 = vrot.lane.b32.xlu2 %v6084_v15, %s6164_s30  ;;  %4213 = vrot.lane.b32.xlu0 %v4168_v5, %s6164_s30  ;;  %v2544_v5 = vadd.f32 %v8413_v6, %v2543_v51  ;;  %v3949_v15 = vmul.f32 %v8471_v32, %v8427_v39 }
 0x26f   : > { %v8463_v57 = vpop.permute.xlu2 %2776  ;;  %v8465_v34 = vpop.permute.xlu0 %2772  ;;  %v2548_v44 = vsel %vm2547_vm12, %v8413_v6, %v2544_v5  ;;  %v3950_v3 = vsub.f32 1.0, %v3949_v15  ;;  %v3965_v6 = vsub.f32 1.0, %v3964_v20  ;;  %v3957_v20 = vand.u32 2147483647, %v8427_v39 }
 0x270   : > { %v8497_v30 = vsel %vm2550_vm14, %v2552_v31, %v2548_v44  ;;  %v6092_v46 = vpop.eup %6091 }
 0x271   : > { %2792 = vrot.lane.b32.xlu1 %v2746_v61, %s6164_s30  ;;  %v2747_v61 = vmul.f32 %v8296_v58, %v8497_v30  ;;  %vm3958_vm4 = vcmp.eq.f32.partialorder %v3957_v20, 8.507059e+37 }
 0x273   : > { %v8484_v17 = vpop.permute.xlu1 %4191 }
 0x275   : > { %1468 = vrot.lane.b32.xlu0 %v6090_v8, %s6164_s30  ;;  %1599 = vrot.lane.b32.xlu2 %v1486_v50, %s6166_s18  ;;  %v3951_v50 = vmul.f32 %v8471_v32, %v3950_v3  ;;  %v3959_v8 = vand.u32 2147483648, %v8427_v39  ;;  %v9311_v3 = vld [vmem:[#allocation12_spill] sm:$0xff] }
 0x277   : > { %v1533_v14 = vpop.permute.xlu2 %1532  ;;  %v1529_v51 = vpop.permute.xlu0 %1528  ;;  %v3952_v44 = vadd.f32 %v8471_v32, %v3951_v50  ;;  %v9312_v50 = vld [vmem:[#allocation43_spill] sm:$0xff] }
 0x278   : > { %1574 = vst.msk [vmem:[%s8138_s17 + $0x38] sm:$0xff] %vm1566_vm13, %v1533_v14  ;;  %v1487_v49 = vmul.f32 %v8332_v54, %v9312_v50 }
 0x279   : > { %1572 = vst.msk [vmem:[%s8138_s17 + $0x28] sm:$0xff] %vm1566_vm13, %v1529_v51  ;;  %1548 = vrot.lane.b32.xlu1 %v1405_v60, %s6165_s29  ;;  %v3966_v60 = vmul.f32 %v8475_v4, %v3965_v6  ;;  %v9310_v51 = vld [vmem:[#allocation60_spill] sm:$0xff]  ;;  %v3960_v6 = vor.u32 1.1754944e-38, %v3959_v8 }
 0x27a   : > { %v2653_v31 = vmul.f32 %v9311_v3, %v9310_v51  ;;  %v3972_v3 = vand.u32 2147483647, %v8442_v21  ;;  %v3956_v51 = vsel %vm8519_vm1, %v8471_v32, %v3952_v44 }
 0x27b   : > { %v8503_v5 = vpop.permute.xlu1 %1446  ;;  %v3967_v53 = vadd.f32 %v8475_v4, %v3966_v60  ;;  %v8542_v54 = vsel %vm3958_vm4, %v3960_v6, %v3956_v51  ;;  %v9314_v51 = vld [vmem:[#allocation27_spill] sm:$0xff] }
 0x27c   : > { %v2813_v39 = vadd.f32 %v8316_v33, %v2653_v31  ;;  %vm3973_vm6 = vcmp.eq.f32.partialorder %v3972_v3, 8.507059e+37  ;;  %v4169_v32 = vmul.f32 %v8264_v36, %v8542_v54  ;;  %v9313_v36 = vld [vmem:[#allocation13_spill] sm:$0xff] }
 0x27d   : > { %2860 = vrot.lane.b32.xlu0 %v6092_v46, %s6164_s30  ;;  %2794 = vrot.lane.b32.xlu2 %v2747_v61, %s6164_s30  ;;  %v4235_v61 = vadd.f32 %v8216_v19, %v4075_v63  ;;  %v3974_v46 = vand.u32 2147483648, %v8442_v21  ;;  %v2654_v14 = vmul.f32 %v9313_v36, %v7683_v37  ;;  %v9315_v3 = vld [vmem:[#allocation17_spill] sm:$0xff]  ;;  %v1488_v36 = vmul.f32 %v8262_v59, %v7044_v55  ;;  %v9317_v55 = vld [vmem:[#allocation35_spill] sm:$0xff] }
 0x27e   : > { %v4078_v59 = vmul.f32 %v9317_v55, %v7806_v38 }
 0x27f   : > { %v8511_v15 = vpop.permute.xlu2 %4199  ;;  %v8513_v58 = vpop.permute.xlu0 %4195  ;;  %6093 = vtanh.f32 %v4235_v61  ;;  %v3975_v33 = vor.u32 1.1754944e-38, %v3974_v46  ;;  %v2814_v31 = vadd.f32 %v8417_v56, %v2654_v14 }
 0x280   : > { %6095 = vtanh.f32 %v2813_v39 }
 0x281   : > { %2940 = vrot.lane.b32.xlu1 %v2812_v41, %s6165_s29  ;;  %v3971_v41 = vsel %vm3970_vm5, %v8475_v4, %v3967_v53  ;;  %6097 = vtanh.f32 %v2814_v31 }
 0x282   : > { %v8551_v60 = vsel %vm3973_vm6, %v3975_v33, %v3971_v41  ;;  %v2655_v33 = vmul.f32 %v9315_v3, %v7701_v25 }
 0x283   : > { %v8538_v19 = vpop.permute.xlu1 %2774  ;;  %v4170_v63 = vmul.f32 %v8385_v35, %v8551_v60  ;;  %v4076_v35 = vmul.f32 %v9314_v51, %v7639_v7 }
 0x285   : > { %1601 = vrot.lane.b32.xlu0 %v1487_v49, %s6166_s18  ;;  %2942 = vrot.lane.b32.xlu2 %v2813_v39, %s6165_s29  ;;  %v6094_v44 = vpop.eup %6093  ;;  %v4236_v6 = vadd.f32 %v8399_v42, %v4076_v35  ;;  %v2815_v42 = vadd.f32 %v8314_v47, %v2655_v33  ;;  %v1489_v47 = vmul.f32 %v8436_v24, %v7060_v22 }
 0x286   : > { %v6096_v56 = vpop.eup %6095  ;;  %v1490_v22 = vmul.f32 %v8503_v5, %v7089_v29 }
 0x287   : > { %v8545_v21 = vpop.permute.xlu2 %1454  ;;  %v8547_v8 = vpop.permute.xlu0 %1450  ;;  %6099 = vtanh.f32 %v2815_v42 }
 0x288   : > { %6101 = vtanh.f32 %v4236_v6 }
 0x289   : > { %4215 = vrot.lane.b32.xlu1 %v4169_v32, %s6164_s30  ;;  %v6098_v32 = vpop.eup %6097 }
 0x28b   : > { %v1531_v20 = vpop.permute.xlu1 %1530 }
 0x28c   : > { %1573 = vst.msk [vmem:[%s8138_s17 + $0x30] sm:$0xff] %vm1566_vm13, %v1531_v20 }
 0x28d   : > { %4283 = vrot.lane.b32.xlu0 %v6094_v44, %s6164_s30  ;;  %4217 = vrot.lane.b32.xlu2 %v4170_v63, %s6164_s30 }
 0x28f   : > { %v8560_v53 = vpop.permute.xlu2 %2782  ;;  %v8562_v4 = vpop.permute.xlu0 %2778 }
 0x291   : > { %4363 = vrot.lane.b32.xlu1 %v4235_v61, %s6165_s29  ;;  %v9316_v61 = vld [vmem:[#allocation28_spill] sm:$0xff] }
 0x292   : > { %v4077_v39 = vmul.f32 %v9316_v61, %v7786_v45 }
 0x293   : > { %v8571_v46 = vpop.permute.xlu1 %4197 }
 0x294   : > { %v4237_v41 = vadd.f32 %v8484_v17, %v4077_v39  ;;  %v6100_v17 = vpop.eup %6099 }
 0x295   : > { %2944 = vrot.lane.b32.xlu0 %v2814_v31, %s6165_s29  ;;  %4365 = vrot.lane.b32.xlu2 %v4236_v6, %s6165_s29  ;;  %v6102_v31 = vpop.eup %6101  ;;  %v4238_v6 = vadd.f32 %v8397_v10, %v4078_v59  ;;  %v9318_v10 = vld [vmem:[#allocation15_spill] sm:$0xff] }
 0x296   : > { %6103 = vtanh.f32 %v4237_v41  ;;  %v2656_v33 = vmul.f32 %v9318_v10, %v7746_v23 }
 0x297   : > { %v1539_v50 = vpop.permute.xlu2 %1538  ;;  %v1535_v49 = vpop.permute.xlu0 %1534  ;;  %6105 = vtanh.f32 %v4238_v6 }
 0x298   : > { %1577 = vst.msk [vmem:[%s8138_s17 + $0x50] sm:$0xff] %vm1566_vm13, %v1539_v50  ;;  %v2816_v29 = vadd.f32 %v8465_v34, %v2656_v33 }
 0x299   : > { %1575 = vst.msk [vmem:[%s8138_s17 + $0x40] sm:$0xff] %vm1566_vm13, %v1535_v49  ;;  %2862 = vrot.lane.b32.xlu1 %v6096_v56, %s6164_s30 }
 0x29a   : > { %6107 = vtanh.f32 %v2816_v29 }
 0x29b   : > { %v8586_v63 = vpop.permute.xlu1 %1452 }
 0x29c   : > { %v6104_v24 = vpop.eup %6103 }
 0x29d   : > { %4367 = vrot.lane.b32.xlu0 %v4237_v41, %s6165_s29  ;;  %2864 = vrot.lane.b32.xlu2 %v6098_v32, %s6164_s30  ;;  %v6106_v5 = vpop.eup %6105  ;;  %v9319_v41 = vld [vmem:[#allocation16_spill] sm:$0xff] }
 0x29e   : > { %v2657_v32 = vmul.f32 %v9319_v41, %v7892_v2  ;;  %v9325_v41 = vld [vmem:[#allocation46_spill] sm:$0xff] }
 0x29f   : > { %v8590_v44 = vpop.permute.xlu2 %4205  ;;  %v8592_v20 = vpop.permute.xlu0 %4201 }
 0x2a0   : > { %v2817_v34 = vadd.f32 %v8538_v19, %v2657_v32  ;;  %v6108_v19 = vpop.eup %6107 }
 0x2a1   : > { %1603 = vrot.lane.b32.xlu1 %v1488_v36, %s6166_s18  ;;  %v9320_v36 = vld [vmem:[#allocation2_spill] sm:$0xff] }
 0x2a2   : > { %6109 = vtanh.f32 %v2817_v34 }
 0x2a3   : > { %v8599_v14 = vpop.permute.xlu1 %2780 }
 0x2a5   : > { %2866 = vrot.lane.b32.xlu0 %v6100_v17, %s6164_s30  ;;  %1605 = vrot.lane.b32.xlu2 %v1489_v47, %s6166_s18  ;;  %v9321_v47 = vld [vmem:[#allocation30_spill] sm:$0xff] }
 0x2a6   : > { %v4079_v17 = vmul.f32 %v9321_v47, %v9320_v36 }
 0x2a7   : > { %v8603_v51 = vpop.permute.xlu2 %1460  ;;  %v8605_v35 = vpop.permute.xlu0 %1456 }
 0x2a9   : > { %4285 = vrot.lane.b32.xlu1 %v6102_v31, %s6164_s30 }
 0x2ab   : > { %v1537_v50 = vpop.permute.xlu1 %1536 }
 0x2ac   : > { %1576 = vst.msk [vmem:[%s8138_s17 + $0x48] sm:$0xff] %vm1566_vm13, %v1537_v50 }
 0x2ad   : > { %1607 = vrot.lane.b32.xlu0 %v1490_v22, %s6166_s18  ;;  %4287 = vrot.lane.b32.xlu2 %v6104_v24, %s6164_s30  ;;  %v9322_v22 = vld [vmem:[#allocation49_spill] sm:$0xff]  ;;  %v9323_v24 = vld [vmem:[#allocation20_spill] sm:$0xff] }
 0x2ae   : > { %v2658_v50 = vmul.f32 %v9323_v24, %v9322_v22 }
 0x2af   : > { %v8617_v49 = vpop.permute.xlu2 %2788  ;;  %v8619_v3 = vpop.permute.xlu0 %2784 }
 0x2b1   : > { %2946 = vrot.lane.b32.xlu1 %v2815_v42, %s6165_s29  ;;  %v4239_v42 = vadd.f32 %v8513_v58, %v4079_v17  ;;  %v2818_v58 = vadd.f32 %v8463_v57, %v2658_v50  ;;  %v1491_v57 = vmul.f32 %v8434_v40, %v9325_v41 }
 0x2b3   : > { %v8625_v56 = vpop.permute.xlu1 %4203  ;;  %6111 = vtanh.f32 %v2818_v58 }
 0x2b4   : > { %6113 = vtanh.f32 %v4239_v42 }
 0x2b5   : > { %4289 = vrot.lane.b32.xlu0 %v6106_v5, %s6164_s30  ;;  %2948 = vrot.lane.b32.xlu2 %v2816_v29, %s6165_s29  ;;  %v6110_v29 = vpop.eup %6109 }
 0x2b7   : > { %v1545_v61 = vpop.permute.xlu2 %1544  ;;  %v1541_v39 = vpop.permute.xlu0 %1540 }
 0x2b8   : > { %1580 = vst.msk [vmem:[%s8138_s17 + $0x68] sm:$0xff] %vm1566_vm13, %v1545_v61 }
 0x2b9   : > { %1578 = vst.msk [vmem:[%s8138_s17 + $0x58] sm:$0xff] %vm1566_vm13, %v1541_v39  ;;  %4369 = vrot.lane.b32.xlu1 %v4238_v6, %s6165_s29  ;;  %v9324_v6 = vld [vmem:[#allocation31_spill] sm:$0xff]  ;;  %v6112_v47 = vpop.eup %6111 }
 0x2ba   : > { %v4080_v10 = vmul.f32 %v9324_v6, %v7995_v48  ;;  %v6114_v50 = vpop.eup %6113  ;;  %v9329_v6 = vld [vmem:[#allocation48_spill] sm:$0xff] }
 0x2bb   : > { %v8640_v55 = vpop.permute.xlu1 %1458 }
 0x2bc   : > { %v4240_v33 = vadd.f32 %v8571_v46, %v4080_v10  ;;  %v9326_v46 = vld [vmem:[#allocation47_spill] sm:$0xff]  ;;  %v1493_v10 = vmul.f32 %v8586_v63, %v9329_v6  ;;  %v9333_v6 = vld [vmem:[#allocation53_spill] sm:$0xff] }
 0x2bd   : > { %2950 = vrot.lane.b32.xlu0 %v2817_v34, %s6165_s29  ;;  %4371 = vrot.lane.b32.xlu2 %v4239_v42, %s6165_s29  ;;  %v1492_v32 = vmul.f32 %v8547_v8, %v9326_v46  ;;  %v9327_v8 = vld [vmem:[#allocation4_spill] sm:$0xff]  ;;  %v9328_v42 = vld [vmem:[#allocation38_spill] sm:$0xff] }
 0x2be   : > { %6115 = vtanh.f32 %v4240_v33  ;;  %v4081_v24 = vmul.f32 %v9328_v42, %v9327_v8  ;;  %v9331_v46 = vld [vmem:[#allocation18_spill] sm:$0xff] }
 0x2bf   : > { %v8644_v59 = vpop.permute.xlu2 %4211  ;;  %v8646_v31 = vpop.permute.xlu0 %4207 }
 0x2c1   : > { %2868 = vrot.lane.b32.xlu1 %v6108_v19, %s6164_s30  ;;  %v4241_v19 = vadd.f32 %v8511_v15, %v4081_v24  ;;  %v9330_v15 = vld [vmem:[#allocation3_spill] sm:$0xff] }
 0x2c2   : > { %v9332_v24 = vld [vmem:[#allocation19_spill] sm:$0xff] }
 0x2c3   : > { %v8655_v5 = vpop.permute.xlu1 %2786  ;;  %6117 = vtanh.f32 %v4241_v19 }
 0x2c5   : > { %4373 = vrot.lane.b32.xlu0 %v4240_v33, %s6165_s29  ;;  %2870 = vrot.lane.b32.xlu2 %v6110_v29, %s6164_s30  ;;  %v6116_v29 = vpop.eup %6115 }
 0x2c7   : > { %v8659_v61 = vpop.permute.xlu2 %1466  ;;  %v8661_v39 = vpop.permute.xlu0 %1462 }
 0x2c9   : > { %1609 = vrot.lane.b32.xlu1 %v1491_v57, %s6166_s18 }
 0x2cb   : > { %v1543_v17 = vpop.permute.xlu1 %1542 }
 0x2cc   : > { %1579 = vst.msk [vmem:[%s8138_s17 + $0x60] sm:$0xff] %vm1566_vm13, %v1543_v17 }
 0x2cd   : > { %2872 = vrot.lane.b32.xlu0 %v6112_v47, %s6164_s30  ;;  %1611 = vrot.lane.b32.xlu2 %v1492_v32, %s6166_s18  ;;  %v2659_v32 = vmul.f32 %v9331_v46, %v9330_v15  ;;  %v6118_v47 = vpop.eup %6117 }
 0x2cf   : > { %v1600_v40 = vpop.permute.xlu2 %1599  ;;  %v8678_v34 = vpop.permute.xlu0 %2790  ;;  %v2819_v63 = vadd.f32 %v8562_v4, %v2659_v32 }
 0x2d0   : > { %1647 = vst.msk [vmem:[%s8676_s21] sm:$0xff] %vm1566_vm13, %v1600_v40 }
 0x2d1   : > { %4291 = vrot.lane.b32.xlu1 %v6114_v50, %s6164_s30  ;;  %v2660_v50 = vmul.f32 %v9332_v24, %v8099_v9  ;;  %6119 = vtanh.f32 %v2819_v63 }
 0x2d3   : > { %v8688_v41 = vpop.permute.xlu1 %4209  ;;  %v2820_v4 = vadd.f32 %v8599_v14, %v2660_v50 }
 0x2d5   : > { %1613 = vrot.lane.b32.xlu0 %v1493_v10, %s6166_s18  ;;  %4293 = vrot.lane.b32.xlu2 %v6116_v29, %s6164_s30  ;;  %v9334_v10 = vld [vmem:[#allocation33_spill] sm:$0xff]  ;;  %6121 = vtanh.f32 %v2820_v4 }
 0x2d7   : > { %v8692_v33 = vpop.permute.xlu2 %2794  ;;  %v1547_v57 = vpop.permute.xlu0 %1546 }
 0x2d8   : > { %1581 = vst.msk [vmem:[%s8138_s17 + $0x70] sm:$0xff] %vm1566_vm13, %v1547_v57 }
 0x2d9   : > { %2952 = vrot.lane.b32.xlu1 %v2818_v58, %s6165_s29  ;;  %v4082_v58 = vmul.f32 %v9334_v10, %v9333_v6 }
 0x2db   : > { %v8700_v17 = vpop.permute.xlu1 %1464  ;;  %v4242_v29 = vadd.f32 %v8592_v20, %v4082_v58 }
 0x2dd   : > { %4295 = vrot.lane.b32.xlu0 %v6118_v47, %s6164_s30  ;;  %2954 = vrot.lane.b32.xlu2 %v2819_v63, %s6165_s29  ;;  %v9335_v47 = vld [vmem:[#allocation5_spill] sm:$0xff]  ;;  %v9337_v63 = vld [vmem:[#allocation34_spill] sm:$0xff] }
 0x2de   : > { %v4083_v24 = vmul.f32 %v9337_v63, %v8209_v16  ;;  %v9338_v63 = vld [vmem:[#allocation50_spill] sm:$0xff] }
 0x2df   : > { %v2943_v40 = vpop.permute.xlu2 %2942  ;;  %v8704_v42 = vpop.permute.xlu0 %4213 }
 0x2e0   : > { %5225 = vst.msk [vmem:[%s8138_s17 + $0x88] sm:$0xff] %vm1566_vm13, %v2943_v40  ;;  %v9336_v40 = vld [vmem:[#allocation23_spill] sm:$0xff]  ;;  %v4243_v50 = vadd.f32 %v8625_v56, %v4083_v24 }
 0x2e1   : > { %4375 = vrot.lane.b32.xlu1 %v4241_v19, %s6165_s29  ;;  %v2661_v14 = vmul.f32 %v9336_v40, %v9335_v47  ;;  %v6120_v19 = vpop.eup %6119  ;;  %v9339_v56 = vld [vmem:[#allocation51_spill] sm:$0xff] }
 0x2e2   : > { %v6122_v10 = vpop.eup %6121 }
 0x2e3   : > { %v8715_v57 = vpop.permute.xlu1 %2792  ;;  %v2821_v20 = vadd.f32 %v8560_v53, %v2661_v14  ;;  %v1494_v53 = vmul.f32 %v8545_v21, %v9338_v63  ;;  %v1495_v14 = vmul.f32 %v8605_v35, %v9339_v56  ;;  %v9341_v63 = vld [vmem:[#allocation52_spill] sm:$0xff] }
 0x2e5   : > { %2956 = vrot.lane.b32.xlu0 %v2820_v4, %s6165_s29  ;;  %4377 = vrot.lane.b32.xlu2 %v4242_v29, %s6165_s29  ;;  %6123 = vtanh.f32 %v2821_v20 }
 0x2e6   : > { %6125 = vtanh.f32 %v4242_v29 }
 0x2e7   : > { %v8719_v46 = vpop.permute.xlu2 %4217  ;;  %v8721_v32 = vpop.permute.xlu0 %1468  ;;  %6127 = vtanh.f32 %v4243_v50 }
 0x2e9   : > { %2874 = vrot.lane.b32.xlu1 %v6120_v19, %s6164_s30 }
 0x2eb   : > { %v1549_v58 = vpop.permute.xlu1 %1548  ;;  %v6124_v19 = vpop.eup %6123 }
 0x2ec   : > { %1582 = vst.msk [vmem:[%s8138_s17 + $0x78] sm:$0xff] %vm1566_vm13, %v1549_v58  ;;  %v9340_v58 = vld [vmem:[#allocation41_spill] sm:$0xff]  ;;  %v6126_v29 = vpop.eup %6125 }
 0x2ed   : > { %4379 = vrot.lane.b32.xlu0 %v4243_v50, %s6165_s29  ;;  %2876 = vrot.lane.b32.xlu2 %v6122_v10, %s6164_s30  ;;  %v6128_v56 = vpop.eup %6127 }
 0x2ef   : > { %v4366_v4 = vpop.permute.xlu2 %4365  ;;  %v8734_v40 = vpop.permute.xlu0 %2860 }
 0x2f0   : > { %5569 = vst.msk [vmem:[%s8138_s17 + $0x108] sm:$0xff] %vm1566_vm13, %v4366_v4  ;;  %v4084_v4 = vmul.f32 %v9340_v58, %v8227_v62 }
 0x2f1   : > { %1615 = vrot.lane.b32.xlu1 %v1494_v53, %s6166_s18  ;;  %v1496_v53 = vmul.f32 %v8640_v55, %v9341_v63 }
 0x2f2   : > { %v4244_v35 = vadd.f32 %v8590_v44, %v4084_v4  ;;  %v9342_v44 = vld [vmem:[#allocation54_spill] sm:$0xff] }
 0x2f3   : > { %v2941_v24 = vpop.permute.xlu1 %2940 }
 0x2f4   : > { %5224 = vst.msk [vmem:[%s8138_s17 + $0x80] sm:$0xff] %vm1566_vm13, %v2941_v24  ;;  %6129 = vtanh.f32 %v4244_v35  ;;  %v9343_v24 = vld [vmem:[#allocation21_spill] sm:$0xff] }
 0x2f5   : > { %2878 = vrot.lane.b32.xlu0 %v6124_v19, %s6164_s30  ;;  %1617 = vrot.lane.b32.xlu2 %v1495_v14, %s6166_s18 }
 0x2f7   : > { %v8747_v10 = vpop.permute.xlu2 %2864  ;;  %v1602_v21 = vpop.permute.xlu0 %1601 }
 0x2f8   : > { %1648 = vst.msk [vmem:[%s8676_s21 + $0x8] sm:$0xff] %vm1566_vm13, %v1602_v21  ;;  %v2662_v21 = vmul.f32 %v9343_v24, %v9342_v44 }
 0x2f9   : > { %4297 = vrot.lane.b32.xlu1 %v6126_v29, %s6164_s30 }
 0x2fa   : > { %v2822_v55 = vadd.f32 %v8619_v3, %v2662_v21  ;;  %v6130_v58 = vpop.eup %6129 }
 0x2fb   : > { %v8757_v50 = vpop.permute.xlu1 %4215 }
 0x2fc   : > { %6131 = vtanh.f32 %v2822_v55 }
 0x2fd   : > { %1619 = vrot.lane.b32.xlu0 %v1496_v53, %s6166_s18  ;;  %4299 = vrot.lane.b32.xlu2 %v6128_v56, %s6164_s30  ;;  %v9344_v53 = vld [vmem:[#allocation22_spill] sm:$0xff] }
 0x2fe   : > { %v2663_v56 = vmul.f32 %v9344_v53, %v8309_v13  ;;  %v9347_v53 = vld [vmem:[#allocation26_spill] sm:$0xff] }
 0x2ff   : > { %v1606_v14 = vpop.permute.xlu2 %1605  ;;  %v8761_v19 = vpop.permute.xlu0 %4283 }
 0x300   : > { %1650 = vst.msk [vmem:[%s8676_s21 + $0x18] sm:$0xff] %vm1566_vm13, %v1606_v14  ;;  %v2823_v14 = vadd.f32 %v8655_v5, %v2663_v56 }
 0x301   : > { %2958 = vrot.lane.b32.xlu1 %v2821_v20, %s6165_s29  ;;  %v9345_v20 = vld [vmem:[#allocation36_spill] sm:$0xff] }
 0x302   : > { %v4085_v3 = vmul.f32 %v9345_v20, %v8272_v1  ;;  %6133 = vtanh.f32 %v2823_v14  ;;  %v6132_v5 = vpop.eup %6131 }
 0x303   : > { %v4364_v4 = vpop.permute.xlu1 %4363 }
 0x304   : > { %5568 = vst.msk [vmem:[%s8138_s17 + $0x100] sm:$0xff] %vm1566_vm13, %v4364_v4  ;;  %v4245_v24 = vadd.f32 %v8646_v31, %v4085_v3 }
 0x305   : > { %4301 = vrot.lane.b32.xlu0 %v6130_v58, %s6164_s30  ;;  %2960 = vrot.lane.b32.xlu2 %v2822_v55, %s6165_s29 }
 0x307   : > { %v8773_v29 = vpop.permute.xlu2 %4287  ;;  %v2945_v63 = vpop.permute.xlu0 %2944 }
 0x308   : > { %5226 = vst.msk [vmem:[%s8138_s17 + $0x90] sm:$0xff] %vm1566_vm13, %v2945_v63  ;;  %v9346_v63 = vld [vmem:[#allocation6_spill] sm:$0xff]  ;;  %v6134_v3 = vpop.eup %6133 }
 0x309   : > { %4381 = vrot.lane.b32.xlu1 %v4244_v35, %s6165_s29  ;;  %v2664_v20 = vmul.f32 %v9347_v53, %v9346_v63  ;;  %v9348_v35 = vld [vmem:[#allocation37_spill] sm:$0xff] }
 0x30a   : > { %v4086_v31 = vmul.f32 %v9348_v35, %v8394_v28 }
 0x30b   : > { %v8784_v21 = vpop.permute.xlu1 %2862  ;;  %v2824_v55 = vadd.f32 %v8617_v49, %v2664_v20 }
 0x30c   : > { %v4246_v56 = vadd.f32 %v8688_v41, %v4086_v31  ;;  %v9350_v41 = vld [vmem:[#allocation56_spill] sm:$0xff] }
 0x30d   : > { %2962 = vrot.lane.b32.xlu0 %v2823_v14, %s6165_s29  ;;  %4383 = vrot.lane.b32.xlu2 %v4245_v24, %s6165_s29  ;;  %6135 = vtanh.f32 %v2824_v55  ;;  %v1498_v20 = vmul.f32 %v8661_v39, %v9350_v41 }
 0x30e   : > { %6137 = vtanh.f32 %v4245_v24 }
 0x30f   : > { %v2949_v58 = vpop.permute.xlu2 %2948  ;;  %v4368_v4 = vpop.permute.xlu0 %4367  ;;  %6139 = vtanh.f32 %v4246_v56 }
 0x310   : > { %5228 = vst.msk [vmem:[%s8138_s17 + $0xa0] sm:$0xff] %vm1566_vm13, %v2949_v58 }
 0x311   : > { %5570 = vst.msk [vmem:[%s8138_s17 + $0x110] sm:$0xff] %vm1566_vm13, %v4368_v4  ;;  %2880 = vrot.lane.b32.xlu1 %v6132_v5, %s6164_s30  ;;  %v9349_v4 = vld [vmem:[#allocation55_spill] sm:$0xff] }
 0x312   : > { %v1497_v49 = vmul.f32 %v8603_v51, %v9349_v4 }
 0x313   : > { %v1604_v14 = vpop.permute.xlu1 %1603  ;;  %v6136_v5 = vpop.eup %6135 }
 0x314   : > { %1649 = vst.msk [vmem:[%s8676_s21 + $0x10] sm:$0xff] %vm1566_vm13, %v1604_v14  ;;  %v6138_v24 = vpop.eup %6137 }
 0x315   : > { %4385 = vrot.lane.b32.xlu0 %v4246_v56, %s6165_s29  ;;  %2882 = vrot.lane.b32.xlu2 %v6134_v3, %s6164_s30  ;;  %v9351_v3 = vld [vmem:[#allocation44_spill] sm:$0xff]  ;;  %v6140_v4 = vpop.eup %6139 }
 0x316   : > { %v4087_v14 = vmul.f32 %v9351_v3, %v8405_v27 }
 0x317   : > { %v4372_v58 = vpop.permute.xlu2 %4371  ;;  %v8803_v53 = vpop.permute.xlu0 %2866 }
 0x318   : > { %5572 = vst.msk [vmem:[%s8138_s17 + $0x120] sm:$0xff] %vm1566_vm13, %v4372_v58  ;;  %v4247_v39 = vadd.f32 %v8644_v59, %v4087_v14  ;;  %v1499_v58 = vmul.f32 %v8700_v17, %v9295_v12  ;;  %v9352_v59 = vld [vmem:[#allocation24_spill] sm:$0xff]  ;;  %v9353_v14 = vld [vmem:[#allocation25_spill] sm:$0xff] }
 0x319   : > { %1621 = vrot.lane.b32.xlu1 %v1497_v49, %s6166_s18 }
 0x31a   : > { %6141 = vtanh.f32 %v4247_v39 }
 0x31b   : > { %v8812_v35 = vpop.permute.xlu1 %4285 }
 0x31d   : > { %2884 = vrot.lane.b32.xlu0 %v6136_v5, %s6164_s30  ;;  %1623 = vrot.lane.b32.xlu2 %v1498_v20, %s6166_s18  ;;  %v2665_v20 = vmul.f32 %v9352_v59, %v8364_v43 }
 0x31f   : > { %v8816_v31 = vpop.permute.xlu2 %2870  ;;  %v1608_v51 = vpop.permute.xlu0 %1607  ;;  %v2825_v12 = vadd.f32 %v8678_v34, %v2665_v20  ;;  %v9355_v20 = vld [vmem:[#allocation29_spill] sm:$0xff] }
 0x320   : > { %1651 = vst.msk [vmem:[%s8676_s21 + $0x20] sm:$0xff] %vm1566_vm13, %v1608_v51  ;;  %v6142_v17 = vpop.eup %6141 }
 0x321   : > { %4303 = vrot.lane.b32.xlu1 %v6138_v24, %s6164_s30  ;;  %v2666_v24 = vmul.f32 %v9353_v14, %v8460_v18  ;;  %6143 = vtanh.f32 %v2825_v12 }
 0x323   : > { %v2947_v56 = vpop.permute.xlu1 %2946 }
 0x324   : > { %5227 = vst.msk [vmem:[%s8138_s17 + $0x98] sm:$0xff] %vm1566_vm13, %v2947_v56 }
 0x325   : > { %1625 = vrot.lane.b32.xlu0 %v1499_v58, %s6166_s18  ;;  %4305 = vrot.lane.b32.xlu2 %v6140_v4, %s6164_s30  ;;  %v2826_v58 = vadd.f32 %v8715_v57, %v2666_v24 }
 0x327   : > { %v1612_v49 = vpop.permute.xlu2 %1611  ;;  %v8830_v41 = vpop.permute.xlu0 %4289  ;;  %6145 = vtanh.f32 %v2826_v58 }
 0x328   : > { %1653 = vst.msk [vmem:[%s8676_s21 + $0x30] sm:$0xff] %vm1566_vm13, %v1612_v49  ;;  %v6144_v57 = vpop.eup %6143 }
 0x329   : > { %2964 = vrot.lane.b32.xlu1 %v2824_v55, %s6165_s29  ;;  %v9354_v55 = vld [vmem:[#allocation39_spill] sm:$0xff] }
 0x32a   : > { %v4088_v34 = vmul.f32 %v9354_v55, %v8445_v11 }
 0x32b   : > { %v4370_v5 = vpop.permute.xlu1 %4369 }
 0x32c   : > { %5571 = vst.msk [vmem:[%s8138_s17 + $0x118] sm:$0xff] %vm1566_vm13, %v4370_v5  ;;  %v4248_v4 = vadd.f32 %v8704_v42, %v4088_v34 }
 0x32d   : > { %4307 = vrot.lane.b32.xlu0 %v6142_v17, %s6164_s30  ;;  %2966 = vrot.lane.b32.xlu2 %v2825_v12, %s6165_s29  ;;  %v2667_v17 = vmul.f32 %v9355_v20, %v8497_v30 }
 0x32f   : > { %v8842_v51 = vpop.permute.xlu2 %4293  ;;  %v2951_v3 = vpop.permute.xlu0 %2950  ;;  %v2827_v12 = vadd.f32 %v8692_v33, %v2667_v17  ;;  %v1500_v33 = vmul.f32 %v8659_v61, %v7463_v26 }
 0x330   : > { %5229 = vst.msk [vmem:[%s8138_s17 + $0xa8] sm:$0xff] %vm1566_vm13, %v2951_v3  ;;  %v6146_v3 = vpop.eup %6145 }
 0x331   : > { %4387 = vrot.lane.b32.xlu1 %v4247_v39, %s6165_s29  ;;  %v9356_v39 = vld [vmem:[#allocation40_spill] sm:$0xff]  ;;  %6147 = vtanh.f32 %v2827_v12 }
 0x332   : > { %v4089_v42 = vmul.f32 %v9356_v39, %v8542_v54  ;;  %6149 = vtanh.f32 %v4248_v4 }
 0x333   : > { %v8853_v56 = vpop.permute.xlu1 %2868 }
 0x334   : > { %v4249_v5 = vadd.f32 %v8757_v50, %v4089_v42  ;;  %v1501_v50 = vmul.f32 %v8721_v32, %v9302_v52  ;;  %v2908_v52 = vmul.f32 %v8734_v40, %v9304_v0  ;;  %v9358_v32 = vld [vmem:[#allocation60_spill] sm:$0xff] }
 0x335   : > { %2968 = vrot.lane.b32.xlu0 %v2826_v58, %s6165_s29  ;;  %4389 = vrot.lane.b32.xlu2 %v4248_v4, %s6165_s29  ;;  %v2909_v17 = vmul.f32 %v8784_v21, %v9358_v32 }
 0x337   : > { %v2955_v49 = vpop.permute.xlu2 %2954  ;;  %v4374_v59 = vpop.permute.xlu0 %4373 }
 0x338   : > { %5231 = vst.msk [vmem:[%s8138_s17 + $0xb8] sm:$0xff] %vm1566_vm13, %v2955_v49  ;;  %v6148_v34 = vpop.eup %6147  ;;  %v9357_v49 = vld [vmem:[#allocation45_spill] sm:$0xff] }
 0x339   : > { %5573 = vst.msk [vmem:[%s8138_s17 + $0x128] sm:$0xff] %vm1566_vm13, %v4374_v59  ;;  %2886 = vrot.lane.b32.xlu1 %v6144_v57, %s6164_s30  ;;  %v4090_v59 = vmul.f32 %v9357_v49, %v8551_v60  ;;  %v6150_v61 = vpop.eup %6149  ;;  %v4333_v49 = vmul.f32 %v8773_v29, %v7786_v45  ;;  %v2913_v45 = vmul.f32 %v8816_v31, %v7892_v2 }
 0x33a   : > { %v4336_v31 = vmul.f32 %v8842_v51, %v7995_v48 }
 0x33b   : > { %v1610_v14 = vpop.permute.xlu1 %1609  ;;  %v4250_v4 = vadd.f32 %v8719_v46, %v4090_v59 }
 0x33c   : > { %1652 = vst.msk [vmem:[%s8676_s21 + $0x28] sm:$0xff] %vm1566_vm13, %v1610_v14  ;;  %v4332_v14 = vmul.f32 %v8812_v35, %v7639_v7  ;;  %v2911_v7 = vmul.f32 %v8803_v53, %v7701_v25  ;;  %v4334_v25 = vmul.f32 %v8830_v41, %v7806_v38 }
 0x33d   : > { %4391 = vrot.lane.b32.xlu0 %v4249_v5, %s6165_s29  ;;  %2888 = vrot.lane.b32.xlu2 %v6146_v3, %s6164_s30  ;;  %6151 = vtanh.f32 %v4250_v4  ;;  %v9359_v3 = vld [vmem:[#allocation61_spill] sm:$0xff] }
 0x33e   : > { %6153 = vtanh.f32 %v4249_v5 }
 0x33f   : > { %v4378_v24 = vpop.permute.xlu2 %4377  ;;  %v8872_v55 = vpop.permute.xlu0 %2872 }
 0x340   : > { %5575 = vst.msk [vmem:[%s8138_s17 + $0x138] sm:$0xff] %vm1566_vm13, %v4378_v24  ;;  %v2914_v38 = vmul.f32 %v8872_v55, %v9322_v22 }
 0x341   : > { %1627 = vrot.lane.b32.xlu1 %v1500_v33, %s6166_s18 }
 0x343   : > { %v4292_v58 = vpop.permute.xlu1 %4291  ;;  %v6152_v0 = vpop.eup %6151 }
 0x344   : > { %v6154_v40 = vpop.eup %6153 }
 0x345   : > { %2890 = vrot.lane.b32.xlu0 %v6148_v34, %s6164_s30  ;;  %1629 = vrot.lane.b32.xlu2 %v1501_v50, %s6166_s18  ;;  %v2910_v34 = vmul.f32 %v8747_v10, %v7683_v37 }
 0x347   : > { %v8885_v20 = vpop.permute.xlu2 %2876  ;;  %v1614_v26 = vpop.permute.xlu0 %1613 }
 0x348   : > { %1654 = vst.msk [vmem:[%s8676_s21 + $0x38] sm:$0xff] %vm1566_vm13, %v1614_v26  ;;  %v2916_v48 = vmul.f32 %v8885_v20, %v8099_v9 }
 0x349   : > { %4309 = vrot.lane.b32.xlu1 %v6150_v61, %s6164_s30 }
 0x34b   : > { %v2953_v57 = vpop.permute.xlu1 %2952 }
 0x34c   : > { %5230 = vst.msk [vmem:[%s8138_s17 + $0xb0] sm:$0xff] %vm1566_vm13, %v2953_v57 }
 0x34d   : > { %3023 = vrot.lane.b32.xlu0 %v2909_v17, %s6166_s18  ;;  %3021 = vrot.lane.b32.xlu2 %v2908_v52, %s6166_s18 }
 0x34f   : > { %v1618_v46 = vpop.permute.xlu2 %1617  ;;  %v4296_v39 = vpop.permute.xlu0 %4295 }
 0x350   : > { %1656 = vst.msk [vmem:[%s8676_s21 + $0x48] sm:$0xff] %vm1566_vm13, %v1618_v46  ;;  %v4337_v22 = vmul.f32 %v4296_v39, %v9327_v8 }
 0x351   : > { %2970 = vrot.lane.b32.xlu1 %v2827_v12, %s6165_s29  ;;  %v4331_v12 = vmul.f32 %v8761_v19, %v9359_v3  ;;  %v2912_v19 = vmul.f32 %v8853_v56, %v7746_v23  ;;  %v4335_v23 = vmul.f32 %v4292_v58, %v9320_v36 }
 0x353   : > { %v4376_v42 = vpop.permute.xlu1 %4375 }
 0x354   : > { %5574 = vst.msk [vmem:[%s8138_s17 + $0x130] sm:$0xff] %vm1566_vm13, %v4376_v42 }
 0x355   : > { %4313 = vrot.lane.b32.xlu0 %v6152_v0, %s6164_s30  ;;  %4311 = vrot.lane.b32.xlu2 %v6154_v40, %s6164_s30 }
 0x357   : > { %v8906_v21 = vpop.permute.xlu2 %4299  ;;  %v2957_v5 = vpop.permute.xlu0 %2956 }
 0x358   : > { %5232 = vst.msk [vmem:[%s8138_s17 + $0xc0] sm:$0xff] %vm1566_vm13, %v2957_v5  ;;  %v4339_v9 = vmul.f32 %v8906_v21, %v8209_v16 }
 0x359   : > { %4393 = vrot.lane.b32.xlu1 %v4250_v4, %s6165_s29 }
 0x35b   : > { %v2875_v24 = vpop.permute.xlu1 %2874 }
 0x35c   : > { %v2915_v36 = vmul.f32 %v2875_v24, %v9330_v15 }
 0x35d   : > { %4446 = vrot.lane.b32.xlu0 %v4332_v14, %s6166_s18  ;;  %4444 = vrot.lane.b32.xlu2 %v4331_v12, %s6166_s18 }
 0x35f   : > { %v2961_v33 = vpop.permute.xlu2 %2960  ;;  %v4380_v50 = vpop.permute.xlu0 %4379 }
 0x360   : > { %5234 = vst.msk [vmem:[%s8138_s17 + $0xd0] sm:$0xff] %vm1566_vm13, %v2961_v33 }
 0x361   : > { %5576 = vst.msk [vmem:[%s8138_s17 + $0x140] sm:$0xff] %vm1566_vm13, %v4380_v50  ;;  %3025 = vrot.lane.b32.xlu1 %v2910_v34, %s6166_s18 }
 0x363   : > { %v1616_v35 = vpop.permute.xlu1 %1615 }
 0x364   : > { %1655 = vst.msk [vmem:[%s8676_s21 + $0x40] sm:$0xff] %vm1566_vm13, %v1616_v35 }
 0x365   : > { %3029 = vrot.lane.b32.xlu0 %v2912_v19, %s6166_s18  ;;  %3027 = vrot.lane.b32.xlu2 %v2911_v7, %s6166_s18 }
 0x367   : > { %v4384_v37 = vpop.permute.xlu2 %4383  ;;  %v2879_v10 = vpop.permute.xlu0 %2878 }
 0x368   : > { %5578 = vst.msk [vmem:[%s8138_s17 + $0x150] sm:$0xff] %vm1566_vm13, %v4384_v37  ;;  %v2917_v8 = vmul.f32 %v2879_v10, %v9335_v47 }
 0x369   : > { %4448 = vrot.lane.b32.xlu1 %v4333_v49, %s6166_s18 }
 0x36b   : > { %v4298_v53 = vpop.permute.xlu1 %4297 }
 0x36c   : > { %v4338_v15 = vmul.f32 %v4298_v53, %v9333_v6 }
 0x36d   : > { %4452 = vrot.lane.b32.xlu0 %v4335_v23, %s6166_s18  ;;  %4450 = vrot.lane.b32.xlu2 %v4334_v25, %s6166_s18 }
 0x36f   : > { %v2883_v56 = vpop.permute.xlu2 %2882  ;;  %v1620_v59 = vpop.permute.xlu0 %1619 }
 0x370   : > { %1657 = vst.msk [vmem:[%s8676_s21 + $0x50] sm:$0xff] %vm1566_vm13, %v1620_v59  ;;  %v2919_v32 = vmul.f32 %v2883_v56, %v8309_v13 }
 0x371   : > { %3031 = vrot.lane.b32.xlu1 %v2913_v45, %s6166_s18 }
 0x373   : > { %v2959_v29 = vpop.permute.xlu1 %2958 }
 0x374   : > { %5233 = vst.msk [vmem:[%s8138_s17 + $0xc8] sm:$0xff] %vm1566_vm13, %v2959_v29 }
 0x375   : > { %3035 = vrot.lane.b32.xlu0 %v2915_v36, %s6166_s18  ;;  %3033 = vrot.lane.b32.xlu2 %v2914_v38, %s6166_s18 }
 0x377   : > { %v1624_v41 = vpop.permute.xlu2 %1623  ;;  %v4302_v2 = vpop.permute.xlu0 %4301 }
 0x378   : > { %1659 = vst.msk [vmem:[%s8676_s21 + $0x60] sm:$0xff] %vm1566_vm13, %v1624_v41  ;;  %v4340_v47 = vmul.f32 %v4302_v2, %v8227_v62 }
 0x379   : > { %4454 = vrot.lane.b32.xlu1 %v4336_v31, %s6166_s18 }
 0x37b   : > { %v4382_v55 = vpop.permute.xlu1 %4381 }
 0x37c   : > { %5577 = vst.msk [vmem:[%s8138_s17 + $0x148] sm:$0xff] %vm1566_vm13, %v4382_v55 }
 0x37d   : > { %4458 = vrot.lane.b32.xlu0 %v4338_v15, %s6166_s18  ;;  %4456 = vrot.lane.b32.xlu2 %v4337_v22, %s6166_s18 }
 0x37f   : > { %v4306_v58 = vpop.permute.xlu2 %4305  ;;  %v2963_v26 = vpop.permute.xlu0 %2962 }
 0x380   : > { %5235 = vst.msk [vmem:[%s8138_s17 + $0xd8] sm:$0xff] %vm1566_vm13, %v2963_v26  ;;  %v4342_v39 = vmul.f32 %v4306_v58, %v8394_v28 }
 0x381   : > { %3037 = vrot.lane.b32.xlu1 %v2916_v48, %s6166_s18 }
 0x383   : > { %v2881_v6 = vpop.permute.xlu1 %2880 }
 0x384   : > { %v2918_v51 = vmul.f32 %v2881_v6, %v9342_v44 }
 0x385   : > { %3039 = vrot.lane.b32.xlu2 %v2917_v8, %s6166_s18 }
 0x386   : > { %3041 = vrot.lane.b32.xlu0 %v2918_v51, %s6166_s18 }
 0x387   : > { %v2967_v61 = vpop.permute.xlu2 %2966  ;;  %v4386_v4 = vpop.permute.xlu0 %4385 }
 0x388   : > { %5237 = vst.msk [vmem:[%s8138_s17 + $0xe8] sm:$0xff] %vm1566_vm13, %v2967_v61 }
 0x389   : > { %5579 = vst.msk [vmem:[%s8138_s17 + $0x158] sm:$0xff] %vm1566_vm13, %v4386_v4  ;;  %4460 = vrot.lane.b32.xlu1 %v4339_v9, %s6166_s18 }
 0x38b   : > { %v1622_v20 = vpop.permute.xlu1 %1621 }
 0x38c   : > { %1658 = vst.msk [vmem:[%s8676_s21 + $0x58] sm:$0xff] %vm1566_vm13, %v1622_v20 }
 0x38d   : > { %4462 = vrot.lane.b32.xlu2 %v4340_v47, %s6166_s18 }
 0x38f   : > { %v4390_v44 = vpop.permute.xlu2 %4389  ;;  %v2885_v52 = vpop.permute.xlu0 %2884 }
 0x390   : > { %5581 = vst.msk [vmem:[%s8138_s17 + $0x168] sm:$0xff] %vm1566_vm13, %v4390_v44  ;;  %v2920_v16 = vmul.f32 %v2885_v52, %v9346_v63 }
 0x391   : > { %3043 = vrot.lane.b32.xlu1 %v2919_v32, %s6166_s18 }
 0x393   : > { %v4304_v17 = vpop.permute.xlu1 %4303 }
 0x394   : > { %v4341_v62 = vmul.f32 %v4304_v17, %v8272_v1 }
 0x395   : > { %3045 = vrot.lane.b32.xlu2 %v2920_v16, %s6166_s18 }
 0x396   : > { %4464 = vrot.lane.b32.xlu0 %v4341_v62, %s6166_s18 }
 0x397   : > { %v2889_v57 = vpop.permute.xlu2 %2888  ;;  %v1626_v46 = vpop.permute.xlu0 %1625 }
 0x398   : > { %1660 = vst.msk [vmem:[%s8676_s21 + $0x68] sm:$0xff] %vm1566_vm13, %v1626_v46  ;;  %v2922_v0 = vmul.f32 %v2889_v57, %v8460_v18 }
 0x399   : > { %4466 = vrot.lane.b32.xlu1 %v4342_v39, %s6166_s18 }
 0x39b   : > { %v2965_v13 = vpop.permute.xlu1 %2964 }
 0x39c   : > { %5236 = vst.msk [vmem:[%s8138_s17 + $0xe0] sm:$0xff] %vm1566_vm13, %v2965_v13 }
 0x39f   : > { %v1630_v63 = vpop.permute.xlu2 %1629  ;;  %v4308_v1 = vpop.permute.xlu0 %4307 }
 0x3a0   : > { %1662 = vst.msk [vmem:[%s8676_s21 + $0x78] sm:$0xff] %vm1566_vm13, %v1630_v63  ;;  %v4343_v40 = vmul.f32 %v4308_v1, %v8405_v27 }
 0x3a1   : > { %3049 = vrot.lane.b32.xlu1 %v2922_v0, %s6166_s18 }
 0x3a2   : > { %4468 = vrot.lane.b32.xlu2 %v4343_v40, %s6166_s18 }
 0x3a3   : > { %v4388_v28 = vpop.permute.xlu1 %4387 }
 0x3a4   : > { %5580 = vst.msk [vmem:[%s8138_s17 + $0x160] sm:$0xff] %vm1566_vm13, %v4388_v28 }
 0x3a7   : > { %v3022_v42 = vpop.permute.xlu2 %3021  ;;  %v2969_v21 = vpop.permute.xlu0 %2968 }
 0x3a8   : > { %5240 = vst.msk [vmem:[%s8676_s21 + $0x80] sm:$0xff] %vm1566_vm13, %v3022_v42 }
 0x3a9   : > { %5238 = vst.msk [vmem:[%s8138_s17 + $0xf0] sm:$0xff] %vm1566_vm13, %v2969_v21 }
 0x3ab   : > { %v2887_v18 = vpop.permute.xlu1 %2886 }
 0x3ac   : > { %v2921_v5 = vmul.f32 %v2887_v18, %v8364_v43 }
 0x3ae   : > { %3047 = vrot.lane.b32.xlu0 %v2921_v5, %s6166_s18 }
 0x3af   : > { %v4312_v3 = vpop.permute.xlu2 %4311  ;;  %v4392_v27 = vpop.permute.xlu0 %4391 }
 0x3b0   : > { %v4345_v12 = vmul.f32 %v4312_v3, %v8542_v54  ;;  %5582 = vst.msk [vmem:[%s8138_s17 + $0x170] sm:$0xff] %vm1566_vm13, %v4392_v27 }
 0x3b2   : > { %4472 = vrot.lane.b32.xlu1 %v4345_v12, %s6166_s18 }
 0x3b3   : > { %v1628_v14 = vpop.permute.xlu1 %1627 }
 0x3b4   : > { %1661 = vst.msk [vmem:[%s8676_s21 + $0x70] sm:$0xff] %vm1566_vm13, %v1628_v14 }
 0x3b7   : > { %v4445_v24 = vpop.permute.xlu2 %4444  ;;  %v2891_v33 = vpop.permute.xlu0 %2890 }
 0x3b8   : > { %5584 = vst.msk [vmem:[%s8676_s21 + $0x100] sm:$0xff] %vm1566_vm13, %v4445_v24  ;;  %v2923_v43 = vmul.f32 %v2891_v33, %v8497_v30 }
 0x3ba   : > { %3051 = vrot.lane.b32.xlu2 %v2923_v43, %s6166_s18 }
 0x3bb   : > { %v4310_v54 = vpop.permute.xlu1 %4309 }
 0x3bc   : > { %v4344_v50 = vmul.f32 %v4310_v54, %v8445_v11 }
 0x3be   : > { %4470 = vrot.lane.b32.xlu0 %v4344_v50, %s6166_s18 }
 0x3bf   : > { %v3028_v34 = vpop.permute.xlu2 %3027  ;;  %v3024_v7 = vpop.permute.xlu0 %3023 }
 0x3c0   : > { %5243 = vst.msk [vmem:[%s8676_s21 + $0x98] sm:$0xff] %vm1566_vm13, %v3028_v34 }
 0x3c1   : > { %5241 = vst.msk [vmem:[%s8676_s21 + $0x88] sm:$0xff] %vm1566_vm13, %v3024_v7 }
 0x3c3   : > { %v2971_v19 = vpop.permute.xlu1 %2970 }
 0x3c4   : > { %5239 = vst.msk [vmem:[%s8138_s17 + $0xf8] sm:$0xff] %vm1566_vm13, %v2971_v19 }
 0x3c7   : > { %v4451_v30 = vpop.permute.xlu2 %4450  ;;  %v4314_v35 = vpop.permute.xlu0 %4313 }
 0x3c8   : > { %5587 = vst.msk [vmem:[%s8676_s21 + $0x118] sm:$0xff] %vm1566_vm13, %v4451_v30  ;;  %v4346_v11 = vmul.f32 %v4314_v35, %v8551_v60 }
 0x3ca   : > { %4474 = vrot.lane.b32.xlu2 %v4346_v11, %s6166_s18 }
 0x3cb   : > { %v4394_v37 = vpop.permute.xlu1 %4393 }
 0x3cc   : > { %5583 = vst.msk [vmem:[%s8138_s17 + $0x178] sm:$0xff] %vm1566_vm13, %v4394_v37 }
 0x3cf   : > { %v3034_v10 = vpop.permute.xlu2 %3033  ;;  %v4447_v49 = vpop.permute.xlu0 %4446 }
 0x3d0   : > { %5246 = vst.msk [vmem:[%s8676_s21 + $0xb0] sm:$0xff] %vm1566_vm13, %v3034_v10 }
 0x3d1   : > { %5585 = vst.msk [vmem:[%s8676_s21 + $0x108] sm:$0xff] %vm1566_vm13, %v4447_v49 }
 0x3d3   : > { %v3026_v25 = vpop.permute.xlu1 %3025 }
 0x3d4   : > { %5242 = vst.msk [vmem:[%s8676_s21 + $0x90] sm:$0xff] %vm1566_vm13, %v3026_v25 }
 0x3d7   : > { %v4457_v60 = vpop.permute.xlu2 %4456  ;;  %v3030_v23 = vpop.permute.xlu0 %3029 }
 0x3d8   : > { %5590 = vst.msk [vmem:[%s8676_s21 + $0x130] sm:$0xff] %vm1566_vm13, %v4457_v60 }
 0x3d9   : > { %5244 = vst.msk [vmem:[%s8676_s21 + $0xa0] sm:$0xff] %vm1566_vm13, %v3030_v23 }
 0x3db   : > { %v4449_v53 = vpop.permute.xlu1 %4448 }
 0x3dc   : > { %5586 = vst.msk [vmem:[%s8676_s21 + $0x110] sm:$0xff] %vm1566_vm13, %v4449_v53 }
 0x3df   : > { %v3040_v56 = vpop.permute.xlu2 %3039  ;;  %v4453_v59 = vpop.permute.xlu0 %4452 }
 0x3e0   : > { %5249 = vst.msk [vmem:[%s8676_s21 + $0xc8] sm:$0xff] %vm1566_vm13, %v3040_v56 }
 0x3e1   : > { %5588 = vst.msk [vmem:[%s8676_s21 + $0x120] sm:$0xff] %vm1566_vm13, %v4453_v59 }
 0x3e3   : > { %v3032_v45 = vpop.permute.xlu1 %3031 }
 0x3e4   : > { %5245 = vst.msk [vmem:[%s8676_s21 + $0xa8] sm:$0xff] %vm1566_vm13, %v3032_v45 }
 0x3e7   : > { %v4463_v38 = vpop.permute.xlu2 %4462  ;;  %v3036_v36 = vpop.permute.xlu0 %3035 }
 0x3e8   : > { %5593 = vst.msk [vmem:[%s8676_s21 + $0x148] sm:$0xff] %vm1566_vm13, %v4463_v38 }
 0x3e9   : > { %5247 = vst.msk [vmem:[%s8676_s21 + $0xb8] sm:$0xff] %vm1566_vm13, %v3036_v36 }
 0x3eb   : > { %v4455_v29 = vpop.permute.xlu1 %4454 }
 0x3ec   : > { %5589 = vst.msk [vmem:[%s8676_s21 + $0x128] sm:$0xff] %vm1566_vm13, %v4455_v29 }
 0x3ef   : > { %v3046_v41 = vpop.permute.xlu2 %3045  ;;  %v4459_v2 = vpop.permute.xlu0 %4458 }
 0x3f0   : > { %5252 = vst.msk [vmem:[%s8676_s21 + $0xe0] sm:$0xff] %vm1566_vm13, %v3046_v41 }
 0x3f1   : > { %5591 = vst.msk [vmem:[%s8676_s21 + $0x138] sm:$0xff] %vm1566_vm13, %v4459_v2 }
 0x3f3   : > { %v3038_v31 = vpop.permute.xlu1 %3037 }
 0x3f4   : > { %5248 = vst.msk [vmem:[%s8676_s21 + $0xc0] sm:$0xff] %vm1566_vm13, %v3038_v31 }
 0x3f8   : > { %v3042_v22 = vpop.permute.xlu0 %3041 }
 0x3f9   : > { %5250 = vst.msk [vmem:[%s8676_s21 + $0xd0] sm:$0xff] %vm1566_vm13, %v3042_v22 }
 0x3fb   : > { %v4461_v55 = vpop.permute.xlu1 %4460 }
 0x3fc   : > { %v4469_v15 = vpop.permute.xlu2 %4468  ;;  %5592 = vst.msk [vmem:[%s8676_s21 + $0x140] sm:$0xff] %vm1566_vm13, %v4461_v55 }
 0x3fd   : > { %5596 = vst.msk [vmem:[%s8676_s21 + $0x160] sm:$0xff] %vm1566_vm13, %v4469_v15 }
 0x403   : > { %v3044_v58 = vpop.permute.xlu1 %3043 }
 0x404   : > { %5251 = vst.msk [vmem:[%s8676_s21 + $0xd8] sm:$0xff] %vm1566_vm13, %v3044_v58 }
 0x408   : > { %v4465_v26 = vpop.permute.xlu0 %4464 }
 0x409   : > { %5594 = vst.msk [vmem:[%s8676_s21 + $0x150] sm:$0xff] %vm1566_vm13, %v4465_v26 }
 0x40b   : > { %v4467_v48 = vpop.permute.xlu1 %4466 }
 0x40c   : > { %5595 = vst.msk [vmem:[%s8676_s21 + $0x158] sm:$0xff] %vm1566_vm13, %v4467_v48 }
 0x413   : > { %v3050_v6 = vpop.permute.xlu1 %3049 }
 0x414   : > { %v3052_v8 = vpop.permute.xlu2 %3051  ;;  %5254 = vst.msk [vmem:[%s8676_s21 + $0xf0] sm:$0xff] %vm1566_vm13, %v3050_v6 }
 0x415   : > { %5255 = vst.msk [vmem:[%s8676_s21 + $0xf8] sm:$0xff] %vm1566_vm13, %v3052_v8 }
 0x420   : > { %v3048_v51 = vpop.permute.xlu0 %3047 }
 0x421   : > { %5253 = vst.msk [vmem:[%s8676_s21 + $0xe8] sm:$0xff] %vm1566_vm13, %v3048_v51 }
 0x424   : > { %v4473_v61 = vpop.permute.xlu1 %4472  ;;  %v4475_v4 = vpop.permute.xlu2 %4474 }
 0x425   : > { %5598 = vst.msk [vmem:[%s8676_s21 + $0x170] sm:$0xff] %vm1566_vm13, %v4473_v61 }
 0x426   : > { %5599 = vst.msk [vmem:[%s8676_s21 + $0x178] sm:$0xff] %vm1566_vm13, %v4475_v4 }
 0x430   : > { %v4471_v9 = vpop.permute.xlu0 %4470 }
 0x431   : > { %5597 = vst.msk [vmem:[%s8676_s21 + $0x168] sm:$0xff] %vm1566_vm13, %v4471_v9 }
 0x432 PF: > { %s15_s15 = sadd.s32 1, %s6161_s15  }
 0x433   : > { %p12_p5 = scmp.ge.s32.totalorder %s15_s15, 6  }
 0x435   :  { %14 = sbr.rel (!%p12_p5) target bundleno = 1 (0x1), region = 93 }

</bundles_post_ra>
